<compile_context>
chip_gen: v7x
topology: tpu7x:2x2x1
jax: 0.10.0
libtpu: 0.0.40
codegen_flags: <defaults>
</compile_context>

<pallas_src>
import functools

import jax
import jax.numpy as jnp
from jax import lax
from jax.experimental import pallas as pl
from jax.experimental.pallas import tpu as pltpu  # noqa: F401  (TPU backend)

EPS = 1e-5          # nn.LayerNorm default eps
NB_FEATURES = 64    # Performer random-feature count


# ----------------------------- shared math ---------------------------------
def _layernorm(x, g, b):
    mu = jnp.mean(x, axis=-1, keepdims=True)
    var = jnp.mean((x - mu) ** 2, axis=-1, keepdims=True)
    return (x - mu) * lax.rsqrt(var + EPS) * g + b


def _elu_plus_one(x):
    # F.elu(x) + 1  ==  x + 1 (x > 0)  |  exp(x) (x <= 0); exp arg clamped.
    return jnp.where(x > 0, x + 1.0, jnp.exp(jnp.minimum(x, 0.0)))


def _gelu_exact(x):
    # nn.GELU() default = exact erf form
    return 0.5 * x * (1.0 + lax.erf(x / jnp.sqrt(2.0).astype(x.dtype)))


# ----------------------------- fused Pallas kernel ---------------------------
def fused_forward_kernel(
        patches_ref,                       # (B*N, P)
        mask_ref,                          # (H*F, dim) block-diag 0/1 mask
        tok_w_ref, tok_g_ref, tok_b_ref,   # (P, dim), (1, dim), (1, dim)
        ln1_g_ref, ln1_b_ref,              # (L, 1, dim)
        wq_pm_ref, wk_pm_ref, wv_ref,      # (L, dim, H*F) x2, (L, dim, dim)
        wproj_ref, bproj_ref,              # (L, dim, dim), (L, 1, dim)
        ln2_g_ref, ln2_b_ref,              # (L, 1, dim)
        w1_ref, b1_ref,                    # (L, dim, 2*dim), (L, 1, 2*dim)
        w2_ref, b2_ref,                    # (L, 2*dim, dim), (L, 1, dim)
        norm_g_ref, norm_b_ref,            # (1, dim)
        wpool_ref, bpool_ref,              # (dim, 1), (1, 1)
        wfc_ref, bfc_ref,                  # (dim, C), (1, C)
        out_ref,                           # (B, C)
        *, batch, tokens, layers):
    mask = mask_ref[...]                                           # (HF, dim)

    # ---- tokenizer: patch-embed matmul + LayerNorm --------------------------
    x = jnp.dot(patches_ref[...], tok_w_ref[...],
                preferred_element_type=jnp.float32)                # (BN, dim)
    x = _layernorm(x, tok_g_ref[...], tok_b_ref[...])

    # ---- Performer blocks (activations stay resident) -----------------------
    for l in range(layers):
        h = _layernorm(x, ln1_g_ref[l], ln1_b_ref[l])

        # fused (qkv -> random features), lane-dense width heads*F = 256
        q_phi = _elu_plus_one(jnp.dot(h, wq_pm_ref[l],
                                      preferred_element_type=jnp.float32))
        k_phi = _elu_plus_one(jnp.dot(h, wk_pm_ref[l],
                                      preferred_element_type=jnp.float32))
        v = jnp.dot(h, wv_ref[l], preferred_element_type=jnp.float32)

        attn_rows = []
        for b in range(batch):                     # per-sample token reduction
            r = slice(b * tokens, (b + 1) * tokens)
            qb, kb, vb = q_phi[r], k_phi[r], v[r]  # (N, HF), (N, HF), (N, dim)
            # kv = sum_n k_phi[n]^T v[n], restricted to same-head blocks
            kv = lax.dot_general(kb, vb, (((0,), (0,)), ((), ())),
                                 preferred_element_type=jnp.float32) * mask
            num = jnp.dot(qb, kv, preferred_element_type=jnp.float32)  # (N, dim)
            ksum = jnp.sum(kb, axis=0, keepdims=True)                  # (1, HF)
            # per-head denominator replicated across d_head lanes via mask
            den = jnp.dot(qb * ksum, mask,
                          preferred_element_type=jnp.float32)          # (N, dim)
            attn_rows.append(num * pl.reciprocal(den, approx=True))
        attn = jnp.concatenate(attn_rows, axis=0)                      # (BN, dim)

        attn = jnp.dot(attn, wproj_ref[l],
                       preferred_element_type=jnp.float32) + bproj_ref[l]
        x = x + attn

        # MLP
        h2 = _layernorm(x, ln2_g_ref[l], ln2_b_ref[l])
        m = jnp.dot(h2, w1_ref[l], preferred_element_type=jnp.float32) + b1_ref[l]
        m = _gelu_exact(m)
        m = jnp.dot(m, w2_ref[l], preferred_element_type=jnp.float32) + b2_ref[l]
        x = x + m

    # ---- head: LayerNorm + attention pooling + classifier -------------------
    hN = _layernorm(x, norm_g_ref[...], norm_b_ref[...])               # (BN, dim)
    s = jnp.dot(hN, wpool_ref[...],
                preferred_element_type=jnp.float32) + bpool_ref[...]   # (BN, 1)
    pooled_rows = []
    for b in range(batch):
        r = slice(b * tokens, (b + 1) * tokens)
        hb, sb = hN[r], s[r]
        sb = sb - jnp.max(sb, axis=0, keepdims=True)
        eb = jnp.exp(sb)
        wb = eb * pl.reciprocal(jnp.sum(eb, axis=0, keepdims=True), approx=True)
        pooled_rows.append(jnp.sum(wb * hb, axis=0, keepdims=True))    # (1, dim)
    pooled = jnp.concatenate(pooled_rows, axis=0)                      # (B, dim)
    out_ref[...] = (jnp.dot(pooled, wfc_ref[...],
                            preferred_element_type=jnp.float32) + bfc_ref[...])


# ----------------------------- host-side param fusion ------------------------
def _prepare_fused_params(params, heads):
    dim = params["conv_w"].shape[1]
    D = dim // heads
    blocks = params["blocks"]
    F = blocks[0]["proj_mat"].shape[-1]

    wq_pm, wk_pm, wv = [], [], []
    for blk in blocks:
        wq = blk["w_qkv"][:, :dim]
        wk = blk["w_qkv"][:, dim:2 * dim]
        pm = blk["proj_mat"]                                   # (H, D, F)
        wq_pm.append(jnp.concatenate(
            [wq[:, h * D:(h + 1) * D] @ pm[h] for h in range(heads)], axis=1))
        wk_pm.append(jnp.concatenate(
            [wk[:, h * D:(h + 1) * D] @ pm[h] for h in range(heads)], axis=1))
        wv.append(blk["w_qkv"][:, 2 * dim:])

    # block-diagonal head mask: mask[h*F + f, h'*D + d] = (h == h')
    row_h = jnp.arange(heads * F) // F
    col_h = jnp.arange(dim) // D
    mask = (row_h[:, None] == col_h[None, :]).astype(jnp.float32)

    stk = lambda key: jnp.stack([b[key] for b in blocks])  # noqa: E731
    return dict(
        mask=mask,
        wq_pm=jnp.stack(wq_pm), wk_pm=jnp.stack(wk_pm), wv=jnp.stack(wv),
        ln1_g=stk("ln1_g"), ln1_b=stk("ln1_b"),
        w_proj=stk("w_proj"), b_proj=stk("b_proj"),
        ln2_g=stk("ln2_g"), ln2_b=stk("ln2_b"),
        w1=stk("w1"), b1=stk("b1"), w2=stk("w2"), b2=stk("b2"),
    )


# ----------------------------- model glue -----------------------------------
def extract_patches(x, patch):
    # x: (B, 1, 22, T) NCHW  ->  (B, N, 22*patch) im2col of the strided conv
    B, C, Hc, T = x.shape
    assert C == 1 and T % patch == 0
    N = T // patch
    xp = x.reshape(B, Hc, N, patch)           # (B, 22, N, patch)
    xp = jnp.transpose(xp, (0, 2, 1, 3))      # (B, N, 22, patch)
    return xp.reshape(B, N, Hc * patch)


def eeg_patch_performer(x, params, heads, patch):
    patches = extract_patches(x, patch)                      # (B, N, P)
    B, N, P = patches.shape
    num_classes = params["w_fc"].shape[1]
    layers = len(params["blocks"])
    fp = _prepare_fused_params(params, heads)

    kernel = functools.partial(fused_forward_kernel,
                               batch=B, tokens=N, layers=layers)
    args = (patches.reshape(B * N, P), fp["mask"],
            params["conv_w"], params["tok_g"], params["tok_b"],
            fp["ln1_g"], fp["ln1_b"],
            fp["wq_pm"], fp["wk_pm"], fp["wv"],
            fp["w_proj"], fp["b_proj"],
            fp["ln2_g"], fp["ln2_b"],
            fp["w1"], fp["b1"], fp["w2"], fp["b2"],
            params["norm_g"], params["norm_b"],
            params["w_pool"], params["b_pool"],
            params["w_fc"], params["b_fc"])

    # Single fused call: whole arrays live in VMEM, no grid, no per-layer HBM traffic.
    return pl.pallas_call(
        kernel,
        out_shape=jax.ShapeDtypeStruct((B, num_classes), jnp.float32),
    )(*args)


# ----------------------------- params ---------------------------------------
def init_params(key, dim=32, heads=4, layers=2, patch=10, num_classes=2):
    keys = list(jax.random.split(key, 8 + 8 * layers))
    it = iter(keys)

    def nrm(shape, scale=0.1):
        return scale * jax.random.normal(next(it), shape, jnp.float32)

    P = 22 * patch
    params = {
        "conv_w": nrm((P, dim), 0.05),
        "tok_g": jnp.ones((1, dim), jnp.float32),
        "tok_b": jnp.zeros((1, dim), jnp.float32),
        "norm_g": jnp.ones((1, dim), jnp.float32),
        "norm_b": jnp.zeros((1, dim), jnp.float32),
        "w_pool": nrm((dim, 1)),
        "b_pool": nrm((1, 1), 0.01),
        "w_fc": nrm((dim, num_classes)),
        "b_fc": nrm((1, num_classes), 0.01),
        "blocks": [],
    }
    for _ in range(layers):
        params["blocks"].append(dict(
            ln1_g=jnp.ones((1, dim), jnp.float32),
            ln1_b=jnp.zeros((1, dim), jnp.float32),
            w_qkv=nrm((dim, 3 * dim)),
            proj_mat=jax.random.normal(next(it), (heads, dim // heads, NB_FEATURES),
                                       jnp.float32),
            w_proj=nrm((dim, dim)),
            b_proj=nrm((1, dim), 0.01),
            ln2_g=jnp.ones((1, dim), jnp.float32),
            ln2_b=jnp.zeros((1, dim), jnp.float32),
            w1=nrm((dim, 2 * dim)),
            b1=nrm((1, 2 * dim), 0.01),
            w2=nrm((2 * dim, dim)),
            b2=nrm((1, dim), 0.01),
        ))
    return params


# ----------------------------- pure-JAX reference ---------------------------
def reference_forward(x, params, heads, patch):
    patches = extract_patches(x, patch)
    t = _layernorm(patches @ params["conv_w"], params["tok_g"], params["tok_b"])
    B, N, dim = t.shape
    D = dim // heads
    for blk in params["blocks"]:
        h = _layernorm(t, blk["ln1_g"], blk["ln1_b"])
        qkv = h @ blk["w_qkv"]
        q = qkv[..., :dim].reshape(B, N, heads, D)
        k = qkv[..., dim:2 * dim].reshape(B, N, heads, D)
        v = qkv[..., 2 * dim:].reshape(B, N, heads, D)
        pm = blk["proj_mat"]
        q_phi = _elu_plus_one(jnp.einsum("bnhd,hdf->bnhf", q, pm))
        k_phi = _elu_plus_one(jnp.einsum("bnhd,hdf->bnhf", k, pm))
        kv = jnp.einsum("bnhf,bnhd->bhfd", k_phi, v)
        z = 1.0 / jnp.einsum("bnhf,bhf->bnh", q_phi, k_phi.sum(axis=1))
        out = jnp.einsum("bnhf,bhfd,bnh->bnhd", q_phi, kv, z).reshape(B, N, dim)
        t = t + out @ blk["w_proj"] + blk["b_proj"]
        h2 = _layernorm(t, blk["ln2_g"], blk["ln2_b"])
        m = _gelu_exact(h2 @ blk["w1"] + blk["b1"]) @ blk["w2"] + blk["b2"]
        t = t + m
    h = _layernorm(t, params["norm_g"], params["norm_b"])
    s = h @ params["w_pool"] + params["b_pool"]            # (B, N, 1)
    w = jax.nn.softmax(s, axis=1)
    pooled = jnp.squeeze(jnp.swapaxes(w, -1, -2) @ h, axis=1)   # (B, dim)
    return pooled @ params["w_fc"] + params["b_fc"]


# ----------------------------- main ------------------------------------------
if __name__ == "__main__":
    B, patch, T = 2, 10, 40           # N = T // patch = 4 tokens
    dim, heads, layers, num_classes = 32, 4, 2, 2

    key = jax.random.PRNGKey(0)
    k_x, k_p = jax.random.split(key)
    x = jax.random.normal(k_x, (B, 1, 22, T), jnp.float32)   # NCHW like PyTorch
    params = init_params(k_p, dim=dim, heads=heads, layers=layers,
                         patch=patch, num_classes=num_classes)

    out = eeg_patch_performer(x, params, heads=heads, patch=patch)
    out = jax.block_until_ready(out)

    ref = reference_forward(x, params, heads=heads, patch=patch)
    assert out.shape == (B, num_classes)
    max_err = float(jnp.max(jnp.abs(out - ref)))
    assert max_err < 1e-2, f"mismatch vs reference: {max_err}"

    print("KERNEL_OK")
</pallas_src>

<mosaic_0001>
module attributes {stable_mosaic.version = 11 : i64} {
  func.func @fused_forward_kernel(%arg0: memref<8x220xf32, #tpu.memory_space<vmem>>, %arg1: memref<256x32xf32, #tpu.memory_space<vmem>>, %arg2: memref<220x32xf32, #tpu.memory_space<vmem>>, %arg3: memref<1x32xf32, #tpu.memory_space<vmem>>, %arg4: memref<1x32xf32, #tpu.memory_space<vmem>>, %arg5: memref<2x1x32xf32, #tpu.memory_space<vmem>>, %arg6: memref<2x1x32xf32, #tpu.memory_space<vmem>>, %arg7: memref<2x32x256xf32, #tpu.memory_space<vmem>>, %arg8: memref<2x32x256xf32, #tpu.memory_space<vmem>>, %arg9: memref<2x32x32xf32, #tpu.memory_space<vmem>>, %arg10: memref<2x32x32xf32, #tpu.memory_space<vmem>>, %arg11: memref<2x1x32xf32, #tpu.memory_space<vmem>>, %arg12: memref<2x1x32xf32, #tpu.memory_space<vmem>>, %arg13: memref<2x1x32xf32, #tpu.memory_space<vmem>>, %arg14: memref<2x32x64xf32, #tpu.memory_space<vmem>>, %arg15: memref<2x1x64xf32, #tpu.memory_space<vmem>>, %arg16: memref<2x64x32xf32, #tpu.memory_space<vmem>>, %arg17: memref<2x1x32xf32, #tpu.memory_space<vmem>>, %arg18: memref<1x32xf32, #tpu.memory_space<vmem>>, %arg19: memref<1x32xf32, #tpu.memory_space<vmem>>, %arg20: memref<32x1xf32, #tpu.memory_space<vmem>>, %arg21: memref<1x1xf32, #tpu.memory_space<vmem>>, %arg22: memref<32x2xf32, #tpu.memory_space<vmem>>, %arg23: memref<1x2xf32, #tpu.memory_space<vmem>>, %arg24: memref<2x2xf32, #tpu.memory_space<vmem>>) attributes {dimension_semantics = [], scalar_prefetch = 0 : i64, scratch_operands = 0 : i64, tpu.core_type = #tpu.core_type<tc>} {
    %c0 = arith.constant 0 : index
    %c0_0 = arith.constant 0 : index
    %0 = vector.load %arg1[%c0, %c0_0] : memref<256x32xf32, #tpu.memory_space<vmem>>, vector<256x32xf32>
    %c0_1 = arith.constant 0 : index
    %c0_2 = arith.constant 0 : index
    %1 = vector.load %arg0[%c0_1, %c0_2] : memref<8x220xf32, #tpu.memory_space<vmem>>, vector<8x220xf32>
    %c0_3 = arith.constant 0 : index
    %c0_4 = arith.constant 0 : index
    %2 = vector.load %arg2[%c0_3, %c0_4] : memref<220x32xf32, #tpu.memory_space<vmem>>, vector<220x32xf32>
    %cst = arith.constant dense<0.000000e+00> : vector<8x32xf32>
    %3 = tpu.matmul %1, %2, %cst {dimension_numbers = #tpu.dot_dimension_numbers<[1], [0], [0], [1], [0, 0, 1, 1], [], []>} : vector<8x220xf32>, vector<220x32xf32>, vector<8x32xf32> -> vector<8x32xf32>
    %c0_5 = arith.constant 0 : index
    %c0_6 = arith.constant 0 : index
    %4 = vector.load %arg3[%c0_5, %c0_6] : memref<1x32xf32, #tpu.memory_space<vmem>>, vector<1x32xf32>
    %c0_7 = arith.constant 0 : index
    %c0_8 = arith.constant 0 : index
    %5 = vector.load %arg4[%c0_7, %c0_8] : memref<1x32xf32, #tpu.memory_space<vmem>>, vector<1x32xf32>
    %cst_9 = arith.constant dense<0.000000e+00> : vector<8xf32>
    %6 = vector.multi_reduction <add>, %3, %cst_9 [1] : vector<8x32xf32> to vector<8xf32>
    %7 = vector.shape_cast %6 : vector<8xf32> to vector<8x1xf32>
    %cst_10 = arith.constant 3.200000e+01 : f32
    %8 = vector.broadcast %cst_10 : f32 to vector<8x1xf32>
    %9 = arith.divf %7, %8 : vector<8x1xf32>
    %10 = vector.broadcast %9 : vector<8x1xf32> to vector<8x32xf32>
    %11 = arith.subf %3, %10 : vector<8x32xf32>
    %12 = arith.mulf %11, %11 : vector<8x32xf32>
    %cst_11 = arith.constant dense<0.000000e+00> : vector<8xf32>
    %13 = vector.multi_reduction <add>, %12, %cst_11 [1] : vector<8x32xf32> to vector<8xf32>
    %14 = vector.shape_cast %13 : vector<8xf32> to vector<8x1xf32>
    %cst_12 = arith.constant 3.200000e+01 : f32
    %15 = vector.broadcast %cst_12 : f32 to vector<8x1xf32>
    %16 = arith.divf %14, %15 : vector<8x1xf32>
    %17 = vector.broadcast %9 : vector<8x1xf32> to vector<8x32xf32>
    %18 = arith.subf %3, %17 : vector<8x32xf32>
    %cst_13 = arith.constant 9.99999974E-6 : f32
    %19 = vector.broadcast %cst_13 : f32 to vector<8x1xf32>
    %20 = arith.addf %16, %19 : vector<8x1xf32>
    %21 = math.rsqrt %20 : vector<8x1xf32>
    %22 = vector.broadcast %21 : vector<8x1xf32> to vector<8x32xf32>
    %23 = arith.mulf %18, %22 : vector<8x32xf32>
    %24 = vector.broadcast %4 : vector<1x32xf32> to vector<8x32xf32>
    %25 = arith.mulf %23, %24 : vector<8x32xf32>
    %26 = vector.broadcast %5 : vector<1x32xf32> to vector<8x32xf32>
    %27 = arith.addf %25, %26 : vector<8x32xf32>
    %c0_14 = arith.constant 0 : index
    %c0_15 = arith.constant 0 : index
    %c0_16 = arith.constant 0 : index
    %28 = vector.load %arg5[%c0_14, %c0_15, %c0_16] : memref<2x1x32xf32, #tpu.memory_space<vmem>>, vector<1x1x32xf32>
    %29 = vector.shape_cast %28 : vector<1x1x32xf32> to vector<1x32xf32>
    %c0_17 = arith.constant 0 : index
    %c0_18 = arith.constant 0 : index
    %c0_19 = arith.constant 0 : index
    %30 = vector.load %arg6[%c0_17, %c0_18, %c0_19] : memref<2x1x32xf32, #tpu.memory_space<vmem>>, vector<1x1x32xf32>
    %31 = vector.shape_cast %30 : vector<1x1x32xf32> to vector<1x32xf32>
    %cst_20 = arith.constant dense<0.000000e+00> : vector<8xf32>
    %32 = vector.multi_reduction <add>, %27, %cst_20 [1] : vector<8x32xf32> to vector<8xf32>
    %33 = vector.shape_cast %32 : vector<8xf32> to vector<8x1xf32>
    %cst_21 = arith.constant 3.200000e+01 : f32
    %34 = vector.broadcast %cst_21 : f32 to vector<8x1xf32>
    %35 = arith.divf %33, %34 : vector<8x1xf32>
    %36 = vector.broadcast %35 : vector<8x1xf32> to vector<8x32xf32>
    %37 = arith.subf %27, %36 : vector<8x32xf32>
    %38 = arith.mulf %37, %37 : vector<8x32xf32>
    %cst_22 = arith.constant dense<0.000000e+00> : vector<8xf32>
    %39 = vector.multi_reduction <add>, %38, %cst_22 [1] : vector<8x32xf32> to vector<8xf32>
    %40 = vector.shape_cast %39 : vector<8xf32> to vector<8x1xf32>
    %cst_23 = arith.constant 3.200000e+01 : f32
    %41 = vector.broadcast %cst_23 : f32 to vector<8x1xf32>
    %42 = arith.divf %40, %41 : vector<8x1xf32>
    %43 = vector.broadcast %35 : vector<8x1xf32> to vector<8x32xf32>
    %44 = arith.subf %27, %43 : vector<8x32xf32>
    %cst_24 = arith.constant 9.99999974E-6 : f32
    %45 = vector.broadcast %cst_24 : f32 to vector<8x1xf32>
    %46 = arith.addf %42, %45 : vector<8x1xf32>
    %47 = math.rsqrt %46 : vector<8x1xf32>
    %48 = vector.broadcast %47 : vector<8x1xf32> to vector<8x32xf32>
    %49 = arith.mulf %44, %48 : vector<8x32xf32>
    %50 = vector.broadcast %29 : vector<1x32xf32> to vector<8x32xf32>
    %51 = arith.mulf %49, %50 : vector<8x32xf32>
    %52 = vector.broadcast %31 : vector<1x32xf32> to vector<8x32xf32>
    %53 = arith.addf %51, %52 : vector<8x32xf32>
    %c0_25 = arith.constant 0 : index
    %c0_26 = arith.constant 0 : index
    %c0_27 = arith.constant 0 : index
    %54 = vector.load %arg7[%c0_25, %c0_26, %c0_27] : memref<2x32x256xf32, #tpu.memory_space<vmem>>, vector<1x32x256xf32>
    %55 = vector.shape_cast %54 : vector<1x32x256xf32> to vector<32x256xf32>
    %cst_28 = arith.constant dense<0.000000e+00> : vector<8x256xf32>
    %56 = tpu.matmul %53, %55, %cst_28 {dimension_numbers = #tpu.dot_dimension_numbers<[1], [0], [0], [1], [0, 0, 1, 1], [], []>} : vector<8x32xf32>, vector<32x256xf32>, vector<8x256xf32> -> vector<8x256xf32>
    %cst_29 = arith.constant 0.000000e+00 : f32
    %57 = vector.broadcast %cst_29 : f32 to vector<8x256xf32>
    %58 = arith.cmpf ogt, %56, %57 : vector<8x256xf32>
    %cst_30 = arith.constant 1.000000e+00 : f32
    %59 = vector.broadcast %cst_30 : f32 to vector<8x256xf32>
    %60 = arith.addf %56, %59 : vector<8x256xf32>
    %cst_31 = arith.constant 0.000000e+00 : f32
    %61 = vector.broadcast %cst_31 : f32 to vector<8x256xf32>
    %62 = arith.minimumf %56, %61 : vector<8x256xf32>
    %63 = math.exp %62 : vector<8x256xf32>
    %64 = arith.select %58, %60, %63 : vector<8x256xi1>, vector<8x256xf32>
    %c0_32 = arith.constant 0 : index
    %c0_33 = arith.constant 0 : index
    %c0_34 = arith.constant 0 : index
    %65 = vector.load %arg8[%c0_32, %c0_33, %c0_34] : memref<2x32x256xf32, #tpu.memory_space<vmem>>, vector<1x32x256xf32>
    %66 = vector.shape_cast %65 : vector<1x32x256xf32> to vector<32x256xf32>
    %cst_35 = arith.constant dense<0.000000e+00> : vector<8x256xf32>
    %67 = tpu.matmul %53, %66, %cst_35 {dimension_numbers = #tpu.dot_dimension_numbers<[1], [0], [0], [1], [0, 0, 1, 1], [], []>} : vector<8x32xf32>, vector<32x256xf32>, vector<8x256xf32> -> vector<8x256xf32>
    %cst_36 = arith.constant 0.000000e+00 : f32
    %68 = vector.broadcast %cst_36 : f32 to vector<8x256xf32>
    %69 = arith.cmpf ogt, %67, %68 : vector<8x256xf32>
    %cst_37 = arith.constant 1.000000e+00 : f32
    %70 = vector.broadcast %cst_37 : f32 to vector<8x256xf32>
    %71 = arith.addf %67, %70 : vector<8x256xf32>
    %cst_38 = arith.constant 0.000000e+00 : f32
    %72 = vector.broadcast %cst_38 : f32 to vector<8x256xf32>
    %73 = arith.minimumf %67, %72 : vector<8x256xf32>
    %74 = math.exp %73 : vector<8x256xf32>
    %75 = arith.select %69, %71, %74 : vector<8x256xi1>, vector<8x256xf32>
    %c0_39 = arith.constant 0 : index
    %c0_40 = arith.constant 0 : index
    %c0_41 = arith.constant 0 : index
    %76 = vector.load %arg9[%c0_39, %c0_40, %c0_41] : memref<2x32x32xf32, #tpu.memory_space<vmem>>, vector<1x32x32xf32>
    %77 = vector.shape_cast %76 : vector<1x32x32xf32> to vector<32x32xf32>
    %cst_42 = arith.constant dense<0.000000e+00> : vector<8x32xf32>
    %78 = tpu.matmul %53, %77, %cst_42 {dimension_numbers = #tpu.dot_dimension_numbers<[1], [0], [0], [1], [0, 0, 1, 1], [], []>} : vector<8x32xf32>, vector<32x32xf32>, vector<8x32xf32> -> vector<8x32xf32>
    %79 = vector.extract_strided_slice %64 {offsets = [0, 0], sizes = [4, 256], strides = [1, 1]} : vector<8x256xf32> to vector<4x256xf32>
    %80 = vector.extract_strided_slice %75 {offsets = [0, 0], sizes = [4, 256], strides = [1, 1]} : vector<8x256xf32> to vector<4x256xf32>
    %81 = vector.extract_strided_slice %78 {offsets = [0, 0], sizes = [4, 32], strides = [1, 1]} : vector<8x32xf32> to vector<4x32xf32>
    %cst_43 = arith.constant dense<0.000000e+00> : vector<256x32xf32>
    %82 = tpu.matmul %80, %81, %cst_43 {dimension_numbers = #tpu.dot_dimension_numbers<[0], [0], [1], [1], [0, 1, 1, 1], [], []>} : vector<4x256xf32>, vector<4x32xf32>, vector<256x32xf32> -> vector<256x32xf32>
    %83 = arith.mulf %82, %0 : vector<256x32xf32>
    %cst_44 = arith.constant dense<0.000000e+00> : vector<4x32xf32>
    %84 = tpu.matmul %79, %83, %cst_44 {dimension_numbers = #tpu.dot_dimension_numbers<[1], [0], [0], [1], [0, 0, 1, 1], [], []>} : vector<4x256xf32>, vector<256x32xf32>, vector<4x32xf32> -> vector<4x32xf32>
    %cst_45 = arith.constant dense<0.000000e+00> : vector<256xf32>
    %85 = vector.multi_reduction <add>, %80, %cst_45 [0] : vector<4x256xf32> to vector<256xf32>
    %86 = vector.shape_cast %85 : vector<256xf32> to vector<1x256xf32>
    %87 = vector.broadcast %86 : vector<1x256xf32> to vector<4x256xf32>
    %88 = arith.mulf %79, %87 : vector<4x256xf32>
    %cst_46 = arith.constant dense<0.000000e+00> : vector<4x32xf32>
    %89 = tpu.matmul %88, %0, %cst_46 {dimension_numbers = #tpu.dot_dimension_numbers<[1], [0], [0], [1], [0, 0, 1, 1], [], []>} : vector<4x256xf32>, vector<256x32xf32>, vector<4x32xf32> -> vector<4x32xf32>
    %90 = tpu.reciprocal %89 {approx = true} : vector<4x32xf32> -> vector<4x32xf32>
    %91 = arith.mulf %84, %90 : vector<4x32xf32>
    %92 = vector.extract_strided_slice %64 {offsets = [4, 0], sizes = [4, 256], strides = [1, 1]} : vector<8x256xf32> to vector<4x256xf32>
    %93 = vector.extract_strided_slice %75 {offsets = [4, 0], sizes = [4, 256], strides = [1, 1]} : vector<8x256xf32> to vector<4x256xf32>
    %94 = vector.extract_strided_slice %78 {offsets = [4, 0], sizes = [4, 32], strides = [1, 1]} : vector<8x32xf32> to vector<4x32xf32>
    %cst_47 = arith.constant dense<0.000000e+00> : vector<256x32xf32>
    %95 = tpu.matmul %93, %94, %cst_47 {dimension_numbers = #tpu.dot_dimension_numbers<[0], [0], [1], [1], [0, 1, 1, 1], [], []>} : vector<4x256xf32>, vector<4x32xf32>, vector<256x32xf32> -> vector<256x32xf32>
    %96 = arith.mulf %95, %0 : vector<256x32xf32>
    %cst_48 = arith.constant dense<0.000000e+00> : vector<4x32xf32>
    %97 = tpu.matmul %92, %96, %cst_48 {dimension_numbers = #tpu.dot_dimension_numbers<[1], [0], [0], [1], [0, 0, 1, 1], [], []>} : vector<4x256xf32>, vector<256x32xf32>, vector<4x32xf32> -> vector<4x32xf32>
    %cst_49 = arith.constant dense<0.000000e+00> : vector<256xf32>
    %98 = vector.multi_reduction <add>, %93, %cst_49 [0] : vector<4x256xf32> to vector<256xf32>
    %99 = vector.shape_cast %98 : vector<256xf32> to vector<1x256xf32>
    %100 = vector.broadcast %99 : vector<1x256xf32> to vector<4x256xf32>
    %101 = arith.mulf %92, %100 : vector<4x256xf32>
    %cst_50 = arith.constant dense<0.000000e+00> : vector<4x32xf32>
    %102 = tpu.matmul %101, %0, %cst_50 {dimension_numbers = #tpu.dot_dimension_numbers<[1], [0], [0], [1], [0, 0, 1, 1], [], []>} : vector<4x256xf32>, vector<256x32xf32>, vector<4x32xf32> -> vector<4x32xf32>
    %103 = tpu.reciprocal %102 {approx = true} : vector<4x32xf32> -> vector<4x32xf32>
    %104 = arith.mulf %97, %103 : vector<4x32xf32>
    %105 = tpu.concatenate %91, %104 in 0 : vector<4x32xf32>, vector<4x32xf32> -> vector<8x32xf32>
    %c0_51 = arith.constant 0 : index
    %c0_52 = arith.constant 0 : index
    %c0_53 = arith.constant 0 : index
    %106 = vector.load %arg10[%c0_51, %c0_52, %c0_53] : memref<2x32x32xf32, #tpu.memory_space<vmem>>, vector<1x32x32xf32>
    %107 = vector.shape_cast %106 : vector<1x32x32xf32> to vector<32x32xf32>
    %cst_54 = arith.constant dense<0.000000e+00> : vector<8x32xf32>
    %108 = tpu.matmul %105, %107, %cst_54 {dimension_numbers = #tpu.dot_dimension_numbers<[1], [0], [0], [1], [0, 0, 1, 1], [], []>} : vector<8x32xf32>, vector<32x32xf32>, vector<8x32xf32> -> vector<8x32xf32>
    %c0_55 = arith.constant 0 : index
    %c0_56 = arith.constant 0 : index
    %c0_57 = arith.constant 0 : index
    %109 = vector.load %arg11[%c0_55, %c0_56, %c0_57] : memref<2x1x32xf32, #tpu.memory_space<vmem>>, vector<1x1x32xf32>
    %110 = vector.shape_cast %109 : vector<1x1x32xf32> to vector<1x32xf32>
    %111 = vector.broadcast %110 : vector<1x32xf32> to vector<8x32xf32>
    %112 = arith.addf %108, %111 : vector<8x32xf32>
    %113 = arith.addf %27, %112 : vector<8x32xf32>
    %c0_58 = arith.constant 0 : index
    %c0_59 = arith.constant 0 : index
    %c0_60 = arith.constant 0 : index
    %114 = vector.load %arg12[%c0_58, %c0_59, %c0_60] : memref<2x1x32xf32, #tpu.memory_space<vmem>>, vector<1x1x32xf32>
    %115 = vector.shape_cast %114 : vector<1x1x32xf32> to vector<1x32xf32>
    %c0_61 = arith.constant 0 : index
    %c0_62 = arith.constant 0 : index
    %c0_63 = arith.constant 0 : index
    %116 = vector.load %arg13[%c0_61, %c0_62, %c0_63] : memref<2x1x32xf32, #tpu.memory_space<vmem>>, vector<1x1x32xf32>
    %117 = vector.shape_cast %116 : vector<1x1x32xf32> to vector<1x32xf32>
    %cst_64 = arith.constant dense<0.000000e+00> : vector<8xf32>
    %118 = vector.multi_reduction <add>, %113, %cst_64 [1] : vector<8x32xf32> to vector<8xf32>
    %119 = vector.shape_cast %118 : vector<8xf32> to vector<8x1xf32>
    %cst_65 = arith.constant 3.200000e+01 : f32
    %120 = vector.broadcast %cst_65 : f32 to vector<8x1xf32>
    %121 = arith.divf %119, %120 : vector<8x1xf32>
    %122 = vector.broadcast %121 : vector<8x1xf32> to vector<8x32xf32>
    %123 = arith.subf %113, %122 : vector<8x32xf32>
    %124 = arith.mulf %123, %123 : vector<8x32xf32>
    %cst_66 = arith.constant dense<0.000000e+00> : vector<8xf32>
    %125 = vector.multi_reduction <add>, %124, %cst_66 [1] : vector<8x32xf32> to vector<8xf32>
    %126 = vector.shape_cast %125 : vector<8xf32> to vector<8x1xf32>
    %cst_67 = arith.constant 3.200000e+01 : f32
    %127 = vector.broadcast %cst_67 : f32 to vector<8x1xf32>
    %128 = arith.divf %126, %127 : vector<8x1xf32>
    %129 = vector.broadcast %121 : vector<8x1xf32> to vector<8x32xf32>
    %130 = arith.subf %113, %129 : vector<8x32xf32>
    %cst_68 = arith.constant 9.99999974E-6 : f32
    %131 = vector.broadcast %cst_68 : f32 to vector<8x1xf32>
    %132 = arith.addf %128, %131 : vector<8x1xf32>
    %133 = math.rsqrt %132 : vector<8x1xf32>
    %134 = vector.broadcast %133 : vector<8x1xf32> to vector<8x32xf32>
    %135 = arith.mulf %130, %134 : vector<8x32xf32>
    %136 = vector.broadcast %115 : vector<1x32xf32> to vector<8x32xf32>
    %137 = arith.mulf %135, %136 : vector<8x32xf32>
    %138 = vector.broadcast %117 : vector<1x32xf32> to vector<8x32xf32>
    %139 = arith.addf %137, %138 : vector<8x32xf32>
    %c0_69 = arith.constant 0 : index
    %c0_70 = arith.constant 0 : index
    %c0_71 = arith.constant 0 : index
    %140 = vector.load %arg14[%c0_69, %c0_70, %c0_71] : memref<2x32x64xf32, #tpu.memory_space<vmem>>, vector<1x32x64xf32>
    %141 = vector.shape_cast %140 : vector<1x32x64xf32> to vector<32x64xf32>
    %cst_72 = arith.constant dense<0.000000e+00> : vector<8x64xf32>
    %142 = tpu.matmul %139, %141, %cst_72 {dimension_numbers = #tpu.dot_dimension_numbers<[1], [0], [0], [1], [0, 0, 1, 1], [], []>} : vector<8x32xf32>, vector<32x64xf32>, vector<8x64xf32> -> vector<8x64xf32>
    %c0_73 = arith.constant 0 : index
    %c0_74 = arith.constant 0 : index
    %c0_75 = arith.constant 0 : index
    %143 = vector.load %arg15[%c0_73, %c0_74, %c0_75] : memref<2x1x64xf32, #tpu.memory_space<vmem>>, vector<1x1x64xf32>
    %144 = vector.shape_cast %143 : vector<1x1x64xf32> to vector<1x64xf32>
    %145 = vector.broadcast %144 : vector<1x64xf32> to vector<8x64xf32>
    %146 = arith.addf %142, %145 : vector<8x64xf32>
    %cst_76 = arith.constant 5.000000e-01 : f32
    %147 = vector.broadcast %cst_76 : f32 to vector<8x64xf32>
    %148 = arith.mulf %147, %146 : vector<8x64xf32>
    %cst_77 = arith.constant 2.000000e+00 : f32
    %149 = math.sqrt %cst_77 : f32
    %150 = vector.broadcast %149 : f32 to vector<8x64xf32>
    %151 = arith.divf %146, %150 : vector<8x64xf32>
    %152 = math.erf %151 : vector<8x64xf32>
    %cst_78 = arith.constant 1.000000e+00 : f32
    %153 = vector.broadcast %cst_78 : f32 to vector<8x64xf32>
    %154 = arith.addf %153, %152 : vector<8x64xf32>
    %155 = arith.mulf %148, %154 : vector<8x64xf32>
    %c0_79 = arith.constant 0 : index
    %c0_80 = arith.constant 0 : index
    %c0_81 = arith.constant 0 : index
    %156 = vector.load %arg16[%c0_79, %c0_80, %c0_81] : memref<2x64x32xf32, #tpu.memory_space<vmem>>, vector<1x64x32xf32>
    %157 = vector.shape_cast %156 : vector<1x64x32xf32> to vector<64x32xf32>
    %cst_82 = arith.constant dense<0.000000e+00> : vector<8x32xf32>
    %158 = tpu.matmul %155, %157, %cst_82 {dimension_numbers = #tpu.dot_dimension_numbers<[1], [0], [0], [1], [0, 0, 1, 1], [], []>} : vector<8x64xf32>, vector<64x32xf32>, vector<8x32xf32> -> vector<8x32xf32>
    %c0_83 = arith.constant 0 : index
    %c0_84 = arith.constant 0 : index
    %c0_85 = arith.constant 0 : index
    %159 = vector.load %arg17[%c0_83, %c0_84, %c0_85] : memref<2x1x32xf32, #tpu.memory_space<vmem>>, vector<1x1x32xf32>
    %160 = vector.shape_cast %159 : vector<1x1x32xf32> to vector<1x32xf32>
    %161 = vector.broadcast %160 : vector<1x32xf32> to vector<8x32xf32>
    %162 = arith.addf %158, %161 : vector<8x32xf32>
    %163 = arith.addf %113, %162 : vector<8x32xf32>
    %c1 = arith.constant 1 : index
    %c0_86 = arith.constant 0 : index
    %c0_87 = arith.constant 0 : index
    %164 = vector.load %arg5[%c1, %c0_86, %c0_87] : memref<2x1x32xf32, #tpu.memory_space<vmem>>, vector<1x1x32xf32>
    %165 = vector.shape_cast %164 : vector<1x1x32xf32> to vector<1x32xf32>
    %c1_88 = arith.constant 1 : index
    %c0_89 = arith.constant 0 : index
    %c0_90 = arith.constant 0 : index
    %166 = vector.load %arg6[%c1_88, %c0_89, %c0_90] : memref<2x1x32xf32, #tpu.memory_space<vmem>>, vector<1x1x32xf32>
    %167 = vector.shape_cast %166 : vector<1x1x32xf32> to vector<1x32xf32>
    %cst_91 = arith.constant dense<0.000000e+00> : vector<8xf32>
    %168 = vector.multi_reduction <add>, %163, %cst_91 [1] : vector<8x32xf32> to vector<8xf32>
    %169 = vector.shape_cast %168 : vector<8xf32> to vector<8x1xf32>
    %cst_92 = arith.constant 3.200000e+01 : f32
    %170 = vector.broadcast %cst_92 : f32 to vector<8x1xf32>
    %171 = arith.divf %169, %170 : vector<8x1xf32>
    %172 = vector.broadcast %171 : vector<8x1xf32> to vector<8x32xf32>
    %173 = arith.subf %163, %172 : vector<8x32xf32>
    %174 = arith.mulf %173, %173 : vector<8x32xf32>
    %cst_93 = arith.constant dense<0.000000e+00> : vector<8xf32>
    %175 = vector.multi_reduction <add>, %174, %cst_93 [1] : vector<8x32xf32> to vector<8xf32>
    %176 = vector.shape_cast %175 : vector<8xf32> to vector<8x1xf32>
    %cst_94 = arith.constant 3.200000e+01 : f32
    %177 = vector.broadcast %cst_94 : f32 to vector<8x1xf32>
    %178 = arith.divf %176, %177 : vector<8x1xf32>
    %179 = vector.broadcast %171 : vector<8x1xf32> to vector<8x32xf32>
    %180 = arith.subf %163, %179 : vector<8x32xf32>
    %cst_95 = arith.constant 9.99999974E-6 : f32
    %181 = vector.broadcast %cst_95 : f32 to vector<8x1xf32>
    %182 = arith.addf %178, %181 : vector<8x1xf32>
    %183 = math.rsqrt %182 : vector<8x1xf32>
    %184 = vector.broadcast %183 : vector<8x1xf32> to vector<8x32xf32>
    %185 = arith.mulf %180, %184 : vector<8x32xf32>
    %186 = vector.broadcast %165 : vector<1x32xf32> to vector<8x32xf32>
    %187 = arith.mulf %185, %186 : vector<8x32xf32>
    %188 = vector.broadcast %167 : vector<1x32xf32> to vector<8x32xf32>
    %189 = arith.addf %187, %188 : vector<8x32xf32>
    %c1_96 = arith.constant 1 : index
    %c0_97 = arith.constant 0 : index
    %c0_98 = arith.constant 0 : index
    %190 = vector.load %arg7[%c1_96, %c0_97, %c0_98] : memref<2x32x256xf32, #tpu.memory_space<vmem>>, vector<1x32x256xf32>
    %191 = vector.shape_cast %190 : vector<1x32x256xf32> to vector<32x256xf32>
    %cst_99 = arith.constant dense<0.000000e+00> : vector<8x256xf32>
    %192 = tpu.matmul %189, %191, %cst_99 {dimension_numbers = #tpu.dot_dimension_numbers<[1], [0], [0], [1], [0, 0, 1, 1], [], []>} : vector<8x32xf32>, vector<32x256xf32>, vector<8x256xf32> -> vector<8x256xf32>
    %cst_100 = arith.constant 0.000000e+00 : f32
    %193 = vector.broadcast %cst_100 : f32 to vector<8x256xf32>
    %194 = arith.cmpf ogt, %192, %193 : vector<8x256xf32>
    %cst_101 = arith.constant 1.000000e+00 : f32
    %195 = vector.broadcast %cst_101 : f32 to vector<8x256xf32>
    %196 = arith.addf %192, %195 : vector<8x256xf32>
    %cst_102 = arith.constant 0.000000e+00 : f32
    %197 = vector.broadcast %cst_102 : f32 to vector<8x256xf32>
    %198 = arith.minimumf %192, %197 : vector<8x256xf32>
    %199 = math.exp %198 : vector<8x256xf32>
    %200 = arith.select %194, %196, %199 : vector<8x256xi1>, vector<8x256xf32>
    %c1_103 = arith.constant 1 : index
    %c0_104 = arith.constant 0 : index
    %c0_105 = arith.constant 0 : index
    %201 = vector.load %arg8[%c1_103, %c0_104, %c0_105] : memref<2x32x256xf32, #tpu.memory_space<vmem>>, vector<1x32x256xf32>
    %202 = vector.shape_cast %201 : vector<1x32x256xf32> to vector<32x256xf32>
    %cst_106 = arith.constant dense<0.000000e+00> : vector<8x256xf32>
    %203 = tpu.matmul %189, %202, %cst_106 {dimension_numbers = #tpu.dot_dimension_numbers<[1], [0], [0], [1], [0, 0, 1, 1], [], []>} : vector<8x32xf32>, vector<32x256xf32>, vector<8x256xf32> -> vector<8x256xf32>
    %cst_107 = arith.constant 0.000000e+00 : f32
    %204 = vector.broadcast %cst_107 : f32 to vector<8x256xf32>
    %205 = arith.cmpf ogt, %203, %204 : vector<8x256xf32>
    %cst_108 = arith.constant 1.000000e+00 : f32
    %206 = vector.broadcast %cst_108 : f32 to vector<8x256xf32>
    %207 = arith.addf %203, %206 : vector<8x256xf32>
    %cst_109 = arith.constant 0.000000e+00 : f32
    %208 = vector.broadcast %cst_109 : f32 to vector<8x256xf32>
    %209 = arith.minimumf %203, %208 : vector<8x256xf32>
    %210 = math.exp %209 : vector<8x256xf32>
    %211 = arith.select %205, %207, %210 : vector<8x256xi1>, vector<8x256xf32>
    %c1_110 = arith.constant 1 : index
    %c0_111 = arith.constant 0 : index
    %c0_112 = arith.constant 0 : index
    %212 = vector.load %arg9[%c1_110, %c0_111, %c0_112] : memref<2x32x32xf32, #tpu.memory_space<vmem>>, vector<1x32x32xf32>
    %213 = vector.shape_cast %212 : vector<1x32x32xf32> to vector<32x32xf32>
    %cst_113 = arith.constant dense<0.000000e+00> : vector<8x32xf32>
    %214 = tpu.matmul %189, %213, %cst_113 {dimension_numbers = #tpu.dot_dimension_numbers<[1], [0], [0], [1], [0, 0, 1, 1], [], []>} : vector<8x32xf32>, vector<32x32xf32>, vector<8x32xf32> -> vector<8x32xf32>
    %215 = vector.extract_strided_slice %200 {offsets = [0, 0], sizes = [4, 256], strides = [1, 1]} : vector<8x256xf32> to vector<4x256xf32>
    %216 = vector.extract_strided_slice %211 {offsets = [0, 0], sizes = [4, 256], strides = [1, 1]} : vector<8x256xf32> to vector<4x256xf32>
    %217 = vector.extract_strided_slice %214 {offsets = [0, 0], sizes = [4, 32], strides = [1, 1]} : vector<8x32xf32> to vector<4x32xf32>
    %cst_114 = arith.constant dense<0.000000e+00> : vector<256x32xf32>
    %218 = tpu.matmul %216, %217, %cst_114 {dimension_numbers = #tpu.dot_dimension_numbers<[0], [0], [1], [1], [0, 1, 1, 1], [], []>} : vector<4x256xf32>, vector<4x32xf32>, vector<256x32xf32> -> vector<256x32xf32>
    %219 = arith.mulf %218, %0 : vector<256x32xf32>
    %cst_115 = arith.constant dense<0.000000e+00> : vector<4x32xf32>
    %220 = tpu.matmul %215, %219, %cst_115 {dimension_numbers = #tpu.dot_dimension_numbers<[1], [0], [0], [1], [0, 0, 1, 1], [], []>} : vector<4x256xf32>, vector<256x32xf32>, vector<4x32xf32> -> vector<4x32xf32>
    %cst_116 = arith.constant dense<0.000000e+00> : vector<256xf32>
    %221 = vector.multi_reduction <add>, %216, %cst_116 [0] : vector<4x256xf32> to vector<256xf32>
    %222 = vector.shape_cast %221 : vector<256xf32> to vector<1x256xf32>
    %223 = vector.broadcast %222 : vector<1x256xf32> to vector<4x256xf32>
    %224 = arith.mulf %215, %223 : vector<4x256xf32>
    %cst_117 = arith.constant dense<0.000000e+00> : vector<4x32xf32>
    %225 = tpu.matmul %224, %0, %cst_117 {dimension_numbers = #tpu.dot_dimension_numbers<[1], [0], [0], [1], [0, 0, 1, 1], [], []>} : vector<4x256xf32>, vector<256x32xf32>, vector<4x32xf32> -> vector<4x32xf32>
    %226 = tpu.reciprocal %225 {approx = true} : vector<4x32xf32> -> vector<4x32xf32>
    %227 = arith.mulf %220, %226 : vector<4x32xf32>
    %228 = vector.extract_strided_slice %200 {offsets = [4, 0], sizes = [4, 256], strides = [1, 1]} : vector<8x256xf32> to vector<4x256xf32>
    %229 = vector.extract_strided_slice %211 {offsets = [4, 0], sizes = [4, 256], strides = [1, 1]} : vector<8x256xf32> to vector<4x256xf32>
    %230 = vector.extract_strided_slice %214 {offsets = [4, 0], sizes = [4, 32], strides = [1, 1]} : vector<8x32xf32> to vector<4x32xf32>
    %cst_118 = arith.constant dense<0.000000e+00> : vector<256x32xf32>
    %231 = tpu.matmul %229, %230, %cst_118 {dimension_numbers = #tpu.dot_dimension_numbers<[0], [0], [1], [1], [0, 1, 1, 1], [], []>} : vector<4x256xf32>, vector<4x32xf32>, vector<256x32xf32> -> vector<256x32xf32>
    %232 = arith.mulf %231, %0 : vector<256x32xf32>
    %cst_119 = arith.constant dense<0.000000e+00> : vector<4x32xf32>
    %233 = tpu.matmul %228, %232, %cst_119 {dimension_numbers = #tpu.dot_dimension_numbers<[1], [0], [0], [1], [0, 0, 1, 1], [], []>} : vector<4x256xf32>, vector<256x32xf32>, vector<4x32xf32> -> vector<4x32xf32>
    %cst_120 = arith.constant dense<0.000000e+00> : vector<256xf32>
    %234 = vector.multi_reduction <add>, %229, %cst_120 [0] : vector<4x256xf32> to vector<256xf32>
    %235 = vector.shape_cast %234 : vector<256xf32> to vector<1x256xf32>
    %236 = vector.broadcast %235 : vector<1x256xf32> to vector<4x256xf32>
    %237 = arith.mulf %228, %236 : vector<4x256xf32>
    %cst_121 = arith.constant dense<0.000000e+00> : vector<4x32xf32>
    %238 = tpu.matmul %237, %0, %cst_121 {dimension_numbers = #tpu.dot_dimension_numbers<[1], [0], [0], [1], [0, 0, 1, 1], [], []>} : vector<4x256xf32>, vector<256x32xf32>, vector<4x32xf32> -> vector<4x32xf32>
    %239 = tpu.reciprocal %238 {approx = true} : vector<4x32xf32> -> vector<4x32xf32>
    %240 = arith.mulf %233, %239 : vector<4x32xf32>
    %241 = tpu.concatenate %227, %240 in 0 : vector<4x32xf32>, vector<4x32xf32> -> vector<8x32xf32>
    %c1_122 = arith.constant 1 : index
    %c0_123 = arith.constant 0 : index
    %c0_124 = arith.constant 0 : index
    %242 = vector.load %arg10[%c1_122, %c0_123, %c0_124] : memref<2x32x32xf32, #tpu.memory_space<vmem>>, vector<1x32x32xf32>
    %243 = vector.shape_cast %242 : vector<1x32x32xf32> to vector<32x32xf32>
    %cst_125 = arith.constant dense<0.000000e+00> : vector<8x32xf32>
    %244 = tpu.matmul %241, %243, %cst_125 {dimension_numbers = #tpu.dot_dimension_numbers<[1], [0], [0], [1], [0, 0, 1, 1], [], []>} : vector<8x32xf32>, vector<32x32xf32>, vector<8x32xf32> -> vector<8x32xf32>
    %c1_126 = arith.constant 1 : index
    %c0_127 = arith.constant 0 : index
    %c0_128 = arith.constant 0 : index
    %245 = vector.load %arg11[%c1_126, %c0_127, %c0_128] : memref<2x1x32xf32, #tpu.memory_space<vmem>>, vector<1x1x32xf32>
    %246 = vector.shape_cast %245 : vector<1x1x32xf32> to vector<1x32xf32>
    %247 = vector.broadcast %246 : vector<1x32xf32> to vector<8x32xf32>
    %248 = arith.addf %244, %247 : vector<8x32xf32>
    %249 = arith.addf %163, %248 : vector<8x32xf32>
    %c1_129 = arith.constant 1 : index
    %c0_130 = arith.constant 0 : index
    %c0_131 = arith.constant 0 : index
    %250 = vector.load %arg12[%c1_129, %c0_130, %c0_131] : memref<2x1x32xf32, #tpu.memory_space<vmem>>, vector<1x1x32xf32>
    %251 = vector.shape_cast %250 : vector<1x1x32xf32> to vector<1x32xf32>
    %c1_132 = arith.constant 1 : index
    %c0_133 = arith.constant 0 : index
    %c0_134 = arith.constant 0 : index
    %252 = vector.load %arg13[%c1_132, %c0_133, %c0_134] : memref<2x1x32xf32, #tpu.memory_space<vmem>>, vector<1x1x32xf32>
    %253 = vector.shape_cast %252 : vector<1x1x32xf32> to vector<1x32xf32>
    %cst_135 = arith.constant dense<0.000000e+00> : vector<8xf32>
    %254 = vector.multi_reduction <add>, %249, %cst_135 [1] : vector<8x32xf32> to vector<8xf32>
    %255 = vector.shape_cast %254 : vector<8xf32> to vector<8x1xf32>
    %cst_136 = arith.constant 3.200000e+01 : f32
    %256 = vector.broadcast %cst_136 : f32 to vector<8x1xf32>
    %257 = arith.divf %255, %256 : vector<8x1xf32>
    %258 = vector.broadcast %257 : vector<8x1xf32> to vector<8x32xf32>
    %259 = arith.subf %249, %258 : vector<8x32xf32>
    %260 = arith.mulf %259, %259 : vector<8x32xf32>
    %cst_137 = arith.constant dense<0.000000e+00> : vector<8xf32>
    %261 = vector.multi_reduction <add>, %260, %cst_137 [1] : vector<8x32xf32> to vector<8xf32>
    %262 = vector.shape_cast %261 : vector<8xf32> to vector<8x1xf32>
    %cst_138 = arith.constant 3.200000e+01 : f32
    %263 = vector.broadcast %cst_138 : f32 to vector<8x1xf32>
    %264 = arith.divf %262, %263 : vector<8x1xf32>
    %265 = vector.broadcast %257 : vector<8x1xf32> to vector<8x32xf32>
    %266 = arith.subf %249, %265 : vector<8x32xf32>
    %cst_139 = arith.constant 9.99999974E-6 : f32
    %267 = vector.broadcast %cst_139 : f32 to vector<8x1xf32>
    %268 = arith.addf %264, %267 : vector<8x1xf32>
    %269 = math.rsqrt %268 : vector<8x1xf32>
    %270 = vector.broadcast %269 : vector<8x1xf32> to vector<8x32xf32>
    %271 = arith.mulf %266, %270 : vector<8x32xf32>
    %272 = vector.broadcast %251 : vector<1x32xf32> to vector<8x32xf32>
    %273 = arith.mulf %271, %272 : vector<8x32xf32>
    %274 = vector.broadcast %253 : vector<1x32xf32> to vector<8x32xf32>
    %275 = arith.addf %273, %274 : vector<8x32xf32>
    %c1_140 = arith.constant 1 : index
    %c0_141 = arith.constant 0 : index
    %c0_142 = arith.constant 0 : index
    %276 = vector.load %arg14[%c1_140, %c0_141, %c0_142] : memref<2x32x64xf32, #tpu.memory_space<vmem>>, vector<1x32x64xf32>
    %277 = vector.shape_cast %276 : vector<1x32x64xf32> to vector<32x64xf32>
    %cst_143 = arith.constant dense<0.000000e+00> : vector<8x64xf32>
    %278 = tpu.matmul %275, %277, %cst_143 {dimension_numbers = #tpu.dot_dimension_numbers<[1], [0], [0], [1], [0, 0, 1, 1], [], []>} : vector<8x32xf32>, vector<32x64xf32>, vector<8x64xf32> -> vector<8x64xf32>
    %c1_144 = arith.constant 1 : index
    %c0_145 = arith.constant 0 : index
    %c0_146 = arith.constant 0 : index
    %279 = vector.load %arg15[%c1_144, %c0_145, %c0_146] : memref<2x1x64xf32, #tpu.memory_space<vmem>>, vector<1x1x64xf32>
    %280 = vector.shape_cast %279 : vector<1x1x64xf32> to vector<1x64xf32>
    %281 = vector.broadcast %280 : vector<1x64xf32> to vector<8x64xf32>
    %282 = arith.addf %278, %281 : vector<8x64xf32>
    %cst_147 = arith.constant 5.000000e-01 : f32
    %283 = vector.broadcast %cst_147 : f32 to vector<8x64xf32>
    %284 = arith.mulf %283, %282 : vector<8x64xf32>
    %cst_148 = arith.constant 2.000000e+00 : f32
    %285 = math.sqrt %cst_148 : f32
    %286 = vector.broadcast %285 : f32 to vector<8x64xf32>
    %287 = arith.divf %282, %286 : vector<8x64xf32>
    %288 = math.erf %287 : vector<8x64xf32>
    %cst_149 = arith.constant 1.000000e+00 : f32
    %289 = vector.broadcast %cst_149 : f32 to vector<8x64xf32>
    %290 = arith.addf %289, %288 : vector<8x64xf32>
    %291 = arith.mulf %284, %290 : vector<8x64xf32>
    %c1_150 = arith.constant 1 : index
    %c0_151 = arith.constant 0 : index
    %c0_152 = arith.constant 0 : index
    %292 = vector.load %arg16[%c1_150, %c0_151, %c0_152] : memref<2x64x32xf32, #tpu.memory_space<vmem>>, vector<1x64x32xf32>
    %293 = vector.shape_cast %292 : vector<1x64x32xf32> to vector<64x32xf32>
    %cst_153 = arith.constant dense<0.000000e+00> : vector<8x32xf32>
    %294 = tpu.matmul %291, %293, %cst_153 {dimension_numbers = #tpu.dot_dimension_numbers<[1], [0], [0], [1], [0, 0, 1, 1], [], []>} : vector<8x64xf32>, vector<64x32xf32>, vector<8x32xf32> -> vector<8x32xf32>
    %c1_154 = arith.constant 1 : index
    %c0_155 = arith.constant 0 : index
    %c0_156 = arith.constant 0 : index
    %295 = vector.load %arg17[%c1_154, %c0_155, %c0_156] : memref<2x1x32xf32, #tpu.memory_space<vmem>>, vector<1x1x32xf32>
    %296 = vector.shape_cast %295 : vector<1x1x32xf32> to vector<1x32xf32>
    %297 = vector.broadcast %296 : vector<1x32xf32> to vector<8x32xf32>
    %298 = arith.addf %294, %297 : vector<8x32xf32>
    %299 = arith.addf %249, %298 : vector<8x32xf32>
    %c0_157 = arith.constant 0 : index
    %c0_158 = arith.constant 0 : index
    %300 = vector.load %arg18[%c0_157, %c0_158] : memref<1x32xf32, #tpu.memory_space<vmem>>, vector<1x32xf32>
    %c0_159 = arith.constant 0 : index
    %c0_160 = arith.constant 0 : index
    %301 = vector.load %arg19[%c0_159, %c0_160] : memref<1x32xf32, #tpu.memory_space<vmem>>, vector<1x32xf32>
    %cst_161 = arith.constant dense<0.000000e+00> : vector<8xf32>
    %302 = vector.multi_reduction <add>, %299, %cst_161 [1] : vector<8x32xf32> to vector<8xf32>
    %303 = vector.shape_cast %302 : vector<8xf32> to vector<8x1xf32>
    %cst_162 = arith.constant 3.200000e+01 : f32
    %304 = vector.broadcast %cst_162 : f32 to vector<8x1xf32>
    %305 = arith.divf %303, %304 : vector<8x1xf32>
    %306 = vector.broadcast %305 : vector<8x1xf32> to vector<8x32xf32>
    %307 = arith.subf %299, %306 : vector<8x32xf32>
    %308 = arith.mulf %307, %307 : vector<8x32xf32>
    %cst_163 = arith.constant dense<0.000000e+00> : vector<8xf32>
    %309 = vector.multi_reduction <add>, %308, %cst_163 [1] : vector<8x32xf32> to vector<8xf32>
    %310 = vector.shape_cast %309 : vector<8xf32> to vector<8x1xf32>
    %cst_164 = arith.constant 3.200000e+01 : f32
    %311 = vector.broadcast %cst_164 : f32 to vector<8x1xf32>
    %312 = arith.divf %310, %311 : vector<8x1xf32>
    %313 = vector.broadcast %305 : vector<8x1xf32> to vector<8x32xf32>
    %314 = arith.subf %299, %313 : vector<8x32xf32>
    %cst_165 = arith.constant 9.99999974E-6 : f32
    %315 = vector.broadcast %cst_165 : f32 to vector<8x1xf32>
    %316 = arith.addf %312, %315 : vector<8x1xf32>
    %317 = math.rsqrt %316 : vector<8x1xf32>
    %318 = vector.broadcast %317 : vector<8x1xf32> to vector<8x32xf32>
    %319 = arith.mulf %314, %318 : vector<8x32xf32>
    %320 = vector.broadcast %300 : vector<1x32xf32> to vector<8x32xf32>
    %321 = arith.mulf %319, %320 : vector<8x32xf32>
    %322 = vector.broadcast %301 : vector<1x32xf32> to vector<8x32xf32>
    %323 = arith.addf %321, %322 : vector<8x32xf32>
    %c0_166 = arith.constant 0 : index
    %c0_167 = arith.constant 0 : index
    %324 = vector.load %arg20[%c0_166, %c0_167] : memref<32x1xf32, #tpu.memory_space<vmem>>, vector<32x1xf32>
    %cst_168 = arith.constant dense<0.000000e+00> : vector<8x1xf32>
    %325 = tpu.matmul %323, %324, %cst_168 {dimension_numbers = #tpu.dot_dimension_numbers<[1], [0], [0], [1], [0, 0, 1, 1], [], []>} : vector<8x32xf32>, vector<32x1xf32>, vector<8x1xf32> -> vector<8x1xf32>
    %c0_169 = arith.constant 0 : index
    %c0_170 = arith.constant 0 : index
    %326 = vector.load %arg21[%c0_169, %c0_170] : memref<1x1xf32, #tpu.memory_space<vmem>>, vector<1x1xf32>
    %327 = vector.broadcast %326 : vector<1x1xf32> to vector<8x1xf32>
    %328 = arith.addf %325, %327 : vector<8x1xf32>
    %329 = vector.extract_strided_slice %323 {offsets = [0, 0], sizes = [4, 32], strides = [1, 1]} : vector<8x32xf32> to vector<4x32xf32>
    %330 = vector.extract_strided_slice %328 {offsets = [0, 0], sizes = [4, 1], strides = [1, 1]} : vector<8x1xf32> to vector<4x1xf32>
    %cst_171 = arith.constant dense<0xFF800000> : vector<1xf32>
    %331 = vector.multi_reduction <maximumf>, %330, %cst_171 [0] : vector<4x1xf32> to vector<1xf32>
    %332 = vector.shape_cast %331 : vector<1xf32> to vector<1x1xf32>
    %333 = vector.broadcast %332 : vector<1x1xf32> to vector<4x1xf32>
    %334 = arith.subf %330, %333 : vector<4x1xf32>
    %335 = math.exp %334 : vector<4x1xf32>
    %cst_172 = arith.constant dense<0.000000e+00> : vector<1xf32>
    %336 = vector.multi_reduction <add>, %335, %cst_172 [0] : vector<4x1xf32> to vector<1xf32>
    %337 = vector.shape_cast %336 : vector<1xf32> to vector<1x1xf32>
    %338 = tpu.reciprocal %337 {approx = true} : vector<1x1xf32> -> vector<1x1xf32>
    %339 = vector.broadcast %338 : vector<1x1xf32> to vector<4x1xf32>
    %340 = arith.mulf %335, %339 : vector<4x1xf32>
    %341 = vector.broadcast %340 : vector<4x1xf32> to vector<4x32xf32>
    %342 = arith.mulf %341, %329 : vector<4x32xf32>
    %cst_173 = arith.constant dense<0.000000e+00> : vector<32xf32>
    %343 = vector.multi_reduction <add>, %342, %cst_173 [0] : vector<4x32xf32> to vector<32xf32>
    %344 = vector.shape_cast %343 : vector<32xf32> to vector<1x32xf32>
    %345 = vector.extract_strided_slice %323 {offsets = [4, 0], sizes = [4, 32], strides = [1, 1]} : vector<8x32xf32> to vector<4x32xf32>
    %346 = vector.extract_strided_slice %328 {offsets = [4, 0], sizes = [4, 1], strides = [1, 1]} : vector<8x1xf32> to vector<4x1xf32>
    %cst_174 = arith.constant dense<0xFF800000> : vector<1xf32>
    %347 = vector.multi_reduction <maximumf>, %346, %cst_174 [0] : vector<4x1xf32> to vector<1xf32>
    %348 = vector.shape_cast %347 : vector<1xf32> to vector<1x1xf32>
    %349 = vector.broadcast %348 : vector<1x1xf32> to vector<4x1xf32>
    %350 = arith.subf %346, %349 : vector<4x1xf32>
    %351 = math.exp %350 : vector<4x1xf32>
    %cst_175 = arith.constant dense<0.000000e+00> : vector<1xf32>
    %352 = vector.multi_reduction <add>, %351, %cst_175 [0] : vector<4x1xf32> to vector<1xf32>
    %353 = vector.shape_cast %352 : vector<1xf32> to vector<1x1xf32>
    %354 = tpu.reciprocal %353 {approx = true} : vector<1x1xf32> -> vector<1x1xf32>
    %355 = vector.broadcast %354 : vector<1x1xf32> to vector<4x1xf32>
    %356 = arith.mulf %351, %355 : vector<4x1xf32>
    %357 = vector.broadcast %356 : vector<4x1xf32> to vector<4x32xf32>
    %358 = arith.mulf %357, %345 : vector<4x32xf32>
    %cst_176 = arith.constant dense<0.000000e+00> : vector<32xf32>
    %359 = vector.multi_reduction <add>, %358, %cst_176 [0] : vector<4x32xf32> to vector<32xf32>
    %360 = vector.shape_cast %359 : vector<32xf32> to vector<1x32xf32>
    %361 = tpu.concatenate %344, %360 in 0 : vector<1x32xf32>, vector<1x32xf32> -> vector<2x32xf32>
    %c0_177 = arith.constant 0 : index
    %c0_178 = arith.constant 0 : index
    %362 = vector.load %arg22[%c0_177, %c0_178] : memref<32x2xf32, #tpu.memory_space<vmem>>, vector<32x2xf32>
    %cst_179 = arith.constant dense<0.000000e+00> : vector<2x2xf32>
    %363 = tpu.matmul %361, %362, %cst_179 {dimension_numbers = #tpu.dot_dimension_numbers<[1], [0], [0], [1], [0, 0, 1, 1], [], []>} : vector<2x32xf32>, vector<32x2xf32>, vector<2x2xf32> -> vector<2x2xf32>
    %c0_180 = arith.constant 0 : index
    %c0_181 = arith.constant 0 : index
    %364 = vector.load %arg23[%c0_180, %c0_181] : memref<1x2xf32, #tpu.memory_space<vmem>>, vector<1x2xf32>
    %365 = vector.broadcast %364 : vector<1x2xf32> to vector<2x2xf32>
    %366 = arith.addf %363, %365 : vector<2x2xf32>
    %c0_182 = arith.constant 0 : index
    %c0_183 = arith.constant 0 : index
    %367 = vector.load %arg24[%c0_182, %c0_183] : memref<2x2xf32, #tpu.memory_space<vmem>>, vector<2x2xf32>
    tpu.vector_store %arg24[%c0_182, %c0_183], %366 {strides = array<i32>} : memref<2x2xf32, #tpu.memory_space<vmem>>, vector<2x2xf32>,
    return
  }
}

</mosaic_0001>

<bundles_post_ra>
// kernel: tpu_custom_call.1
= control target key start
LH: loop header
LB: loop body
LE: loop exit
PB: predicated region body
PF: predicated region fallthrough
CT: control target
= control target key end

     0   :  { %s7207_s0 = inlined_call_operand.vmem [shape: f32[8,220], index: 0, kind: input, shape index: {}]   ;;  %s7208_s1 = inlined_call_operand.vmem [shape: f32[256,32], index: 1, kind: input, shape index: {}]   ;;  %s7209_s2 = inlined_call_operand.vmem [shape: f32[220,32], index: 2, kind: input, shape index: {}]   ;;  %s7210_s3 = inlined_call_operand.vmem [shape: f32[1,32], index: 3, kind: input, shape index: {}]   ;;  %s7211_s4 = inlined_call_operand.vmem [shape: f32[1,32], index: 4, kind: input, shape index: {}]   ;;  %s7212_s5 = inlined_call_operand.vmem [shape: f32[2,1,32], index: 5, kind: input, shape index: {}]   ;;  %s7213_s6 = inlined_call_operand.vmem [shape: f32[2,1,32], index: 6, kind: input, shape index: {}]   ;;  %s7214_s7 = inlined_call_operand.vmem [shape: f32[2,32,256], index: 7, kind: input, shape index: {}]   ;;  %s7215_s8 = inlined_call_operand.vmem [shape: f32[2,32,256], index: 8, kind: input, shape index: {}]   ;;  %s7216_s9 = inlined_call_operand.vmem [shape: f32[2,32,32], index: 9, kind: input, shape index: {}]   ;;  %s7217_s10 = inlined_call_operand.vmem [shape: f32[2,32,32], index: 10, kind: input, shape index: {}]   ;;  %s7218_s11 = inlined_call_operand.vmem [shape: f32[2,1,32], index: 11, kind: input, shape index: {}]   ;;  %s7219_s12 = inlined_call_operand.vmem [shape: f32[2,1,32], index: 12, kind: input, shape index: {}]   ;;  %s7220_s13 = inlined_call_operand.vmem [shape: f32[2,1,32], index: 13, kind: input, shape index: {}]   ;;  %s7221_s14 = inlined_call_operand.vmem [shape: f32[2,32,64], index: 14, kind: input, shape index: {}]   ;;  %s7222_s15 = inlined_call_operand.vmem [shape: f32[2,1,64], index: 15, kind: input, shape index: {}]   ;;  %s7223_s16 = inlined_call_operand.vmem [shape: f32[2,64,32], index: 16, kind: input, shape index: {}]   ;;  %s7224_s17 = inlined_call_operand.vmem [shape: f32[2,1,32], index: 17, kind: input, shape index: {}]   ;;  %s7225_s18 = inlined_call_operand.vmem [shape: f32[1,32], index: 18, kind: input, shape index: {}]   ;;  %s7226_s19 = inlined_call_operand.vmem [shape: f32[1,32], index: 19, kind: input, shape index: {}]   ;;  %s7227_s20 = inlined_call_operand.vmem [shape: f32[32,1], index: 20, kind: input, shape index: {}]   ;;  %s7228_s21 = inlined_call_operand.<no memory space> [shape: f32[1,1], index: 21, kind: input, shape index: {}]   ;;  %s7229_s22 = inlined_call_operand.vmem [shape: f32[32,2], index: 22, kind: input, shape index: {}]   ;;  %s7230_s23 = inlined_call_operand.vmem [shape: f32[1,2], index: 23, kind: input, shape index: {}]   ;;  %s7231_s24 = inlined_call_operand.hbm [shape: f32[2,2], index: 24, kind: output, shape index: {}]  }
   0x1   :  { %7283 = sst [smem:[#allocation21_spill]] %s7207_s0  ;;  %v29_v0 = vstv %s7228_s21 }
   0x2   :  { %7284 = sst [smem:[#allocation22_spill]] %s7208_s1  ;;  %30 = vst [vmem:[#allocation2] sm:$0x1] %v29_v0 }
   0x3   :  { %7285 = sst [smem:[#allocation23_spill]] %s7209_s2 }
   0x4   :  { %7286 = sst [smem:[#allocation24_spill]] %s7210_s3 }
   0x5   :  { %7287 = sst [smem:[#allocation25_spill]] %s7211_s4 }
   0x6   :  { %7288 = sst [smem:[#allocation26_spill]] %s7212_s5 }
   0x7   :  { %7289 = sst [smem:[#allocation27_spill]] %s7213_s6 }
   0x8   :  { %7290 = sst [smem:[#allocation28_spill]] %s7214_s7 }
   0x9   :  { %7291 = sst [smem:[#allocation29_spill]] %s7215_s8 }
   0xa   :  { %s7292_s6 = sld [smem:[#allocation23_spill]]  ;;  %v7239_v4 = vmov 0.0|0.0   ;;  %vm142_vm0 = vcmask 752640   ;;  %s7293_s29 = sld [smem:[#allocation21_spill]] }
   0xb   :  { %5078 = vmatprep.subr.bf16.mxu0 %v7239_v4 }
  0x10   :  { %v114_v1 = vld [vmem:[%s7292_s6] sm:$0xff]  ;;  %v115_v2 = vld [vmem:[%s7292_s6 + $0x8] sm:$0xff]  ;;  %v116_v3 = vld [vmem:[%s7292_s6 + $0x10] sm:$0xff] }
  0x11   :  { %v5079_v5 = vpack.c.bf16 %v115_v2, %v114_v1  ;;  %v117_v6 = vld [vmem:[%s7292_s6 + $0x18] sm:$0xff]  ;;  %v118_v8 = vld [vmem:[%s7292_s6 + $0x20] sm:$0xff]  ;;  %v119_v9 = vld [vmem:[%s7292_s6 + $0x28] sm:$0xff] }
  0x12   :  { %v5082_v7 = vpack.c.bf16 %v117_v6, %v116_v3  ;;  %v5085_v10 = vpack.c.bf16 %v119_v9, %v118_v8  ;;  %v120_v11 = vld [vmem:[%s7292_s6 + $0x30] sm:$0xff]  ;;  %v121_v12 = vld [vmem:[%s7292_s6 + $0x38] sm:$0xff]  ;;  %v113_v13 = vld [vmem:[%s7293_s29 + $0x8] sm:$0xff] }
  0x13   :  { %5080 = vmatpush1.bf16.msra.mxu0 %v5079_v5  ;;  %4072 = vmatprep.mubr.msk.f32.mxu0 %vm142_vm0, %v113_v13 }
  0x14   :  { %5081 = vmatprep.subr.bf16.mxu0 %v7239_v4 }
  0x17   :  { %5083 = vmatpush1.bf16.msra.mxu0 %v5082_v7 }
  0x18   :  { %5084 = vmatprep.subr.bf16.mxu0 %v7239_v4 }
  0x19   :  { %31 = vsyncpa [#allocation4], 0  ;;  %v5088_v14 = vpack.c.bf16 %v121_v12, %v120_v11  ;;  %v122_v15 = vld [vmem:[%s7292_s6 + $0x40] sm:$0xff]  ;;  %v123_v16 = vld [vmem:[%s7292_s6 + $0x48] sm:$0xff]  ;;  %vm146_vm1 = vcmask 1043456   ;;  %vm5602_vm2 = vmmov 1  }
  0x1a   :  { %v5091_v17 = vpack.c.bf16 %v123_v16, %v122_v15  ;;  %v124_v18 = vld [vmem:[%s7292_s6 + $0x50] sm:$0xff]  ;;  %v125_v19 = vld [vmem:[%s7292_s6 + $0x58] sm:$0xff]  ;;  %v126_v21 = vld [vmem:[%s7292_s6 + $0x60] sm:$0xff]  ;;  %vm222_vm4 = vcmask 261120   ;;  %s7294_s0 = sld [smem:[#allocation24_spill]]  ;;  %s7295_s3 = sld [smem:[#allocation25_spill]] }
  0x1b   :  { %5086 = vmatpush1.bf16.msra.mxu0 %v5085_v10  ;;  %v5094_v20 = vpack.c.bf16 %v125_v19, %v124_v18  ;;  %v127_v22 = vld [vmem:[%s7292_s6 + $0x68] sm:$0xff]  ;;  %v128_v24 = vld [vmem:[%s7292_s6 + $0x70] sm:$0xff]  ;;  %v129_v25 = vld [vmem:[%s7292_s6 + $0x78] sm:$0xff]  ;;  %s7297_s8 = sld [smem:[#allocation28_spill]]  ;;  %v7241_v13 = vmov 0.0   ;;  %s7298_s1 = sld [smem:[#allocation29_spill]] }
  0x1c   :  { %5087 = vmatprep.subr.bf16.mxu0 %v7239_v4  ;;  %v5097_v23 = vpack.c.bf16 %v127_v22, %v126_v21  ;;  %v5100_v26 = vpack.c.bf16 %v129_v25, %v128_v24  ;;  %v130_v27 = vld [vmem:[%s7292_s6 + $0x80] sm:$0xff]  ;;  %v131_v28 = vld [vmem:[%s7292_s6 + $0x88] sm:$0xff]  ;;  %v132_v30 = vld [vmem:[%s7292_s6 + $0x90] sm:$0xff]  ;;  %355 = vmatprep.mubr.f32.mxu1 %v7241_v13  ;;  %s7299_s2 = sld [smem:[#allocation26_spill]]  ;;  %s7300_s21 = sld [smem:[#allocation27_spill]]  ;;  %vm5604_vm5 = vmmov 0  }
  0x1d   :  { %v5103_v29 = vpack.c.bf16 %v131_v28, %v130_v27  ;;  %v133_v31 = vld [vmem:[%s7292_s6 + $0x98] sm:$0xff]  ;;  %v134_v33 = vld [vmem:[%s7292_s6 + $0xa0] sm:$0xff]  ;;  %v135_v34 = vld [vmem:[%s7292_s6 + $0xa8] sm:$0xff]  ;;  %vm603_vm8 = vcmask 31744   ;;  %vm1937_vm11 = vcmask 523264   ;;  %vm3896_vm0 = vcmask 3072  }
  0x1e   :  { %v5106_v32 = vpack.c.bf16 %v133_v31, %v132_v30  ;;  %v5109_v35 = vpack.c.bf16 %v135_v34, %v134_v33  ;;  %v136_v36 = vld [vmem:[%s7292_s6 + $0xb0] sm:$0xff]  ;;  %v137_v37 = vld [vmem:[%s7292_s6 + $0xb8] sm:$0xff]  ;;  %v138_v39 = vld [vmem:[%s7292_s6 + $0xc0] sm:$0xff]  ;;  %s5606_s26 = smov [#allocation3]  }
  0x1f   :  { %5089 = vmatpush1.bf16.msra.mxu0 %v5088_v14  ;;  %v5112_v38 = vpack.c.bf16 %v137_v37, %v136_v36  ;;  %v139_v40 = vld [vmem:[%s7292_s6 + $0xc8] sm:$0xff]  ;;  %v140_v42 = vld [vmem:[%s7292_s6 + $0xd0] sm:$0xff]  ;;  %v141_v43 = vld [vmem:[%s7292_s6 + $0xd8] sm:$0xf]  ;;  %s7301_s6 = sld [smem:[#allocation22_spill]]  ;;  %s4063_s27 = sshll.u32 %s5606_s26, 4  ;;  %s4064_s27 = int_to_ptr.vmem [resolvable:$true] %s4063_s27 }
  0x20   :  { %5090 = vmatprep.subr.bf16.mxu0 %v7239_v4  ;;  %v5115_v41 = vpack.c.bf16 %v139_v40, %v138_v39  ;;  %v5118_v44 = vpack.c.bf16 %v141_v43, %v140_v42  ;;  %vm5119_vm3 = vmpackc.low %vm146_vm1, %vm5602_vm2  ;;  %v112_v45 = vld [vmem:[%s7293_s29] sm:$0xff]  ;;  %v467_v43 = vld [vmem:[%s7216_s9 + $0x10] sm:$0xff]  ;;  %vm3922_vm2 = vcmask 257024   ;;  %s5577_s28 = scalar_lea.vmem %s4064_s27, 32  ;;  %p5582_p1 = scmp.lt.s32.totalorder %s4064_s27, %s4064_s27 }
  0x21   :  { %v4073_v58 = vld [vmem:[%s7294_s0] ss:$0 sm:$0xff]  ;;  %v281_v6 = vld [vmem:[%s7297_s8 + $0x8] sm:$0xff]  ;;  %v283_v7 = vld [vmem:[%s7297_s8 + $0x18] sm:$0xff]  ;;  %p5578_p0 = scmp.ne.s32.totalorder %s4064_s27, %s5577_s28  ;;  %p5583_p2 = scmp.lt.s32.totalorder %s5577_s28, %s5577_s28 }
  0x22   :  { %v4074_v60 = vld [vmem:[%s7295_s3] ss:$0 sm:$0xff]  ;;  %v5121_v9 = vpack.c.bf16 %v283_v7, %v281_v6  ;;  %v282_v10 = vld [vmem:[%s7297_s8 + $0x10] sm:$0xff]  ;;  %v285_v11 = vld [vmem:[%s7297_s8 + $0x28] sm:$0xff] }
  0x23   :  { %5092 = vmatpush1.bf16.msra.mxu0 %v5091_v17  ;;  %v280_v8 = vld [vmem:[%s7297_s8] sm:$0xff]  ;;  %v287_v12 = vld [vmem:[%s7297_s8 + $0x38] sm:$0xff]  ;;  %v286_v17 = vld [vmem:[%s7297_s8 + $0x30] sm:$0xff]  ;;  %p5584_p3 = por %p5583_p2, %p5582_p1 }
  0x24   :  { %5093 = vmatprep.subr.bf16.mxu0 %v7239_v4  ;;  %v5123_v14 = vpack.c.bf16 %v282_v10, %v280_v8  ;;  %v5125_v15 = vpack.c.bf16 %v287_v12, %v285_v11  ;;  %v284_v16 = vld [vmem:[%s7297_s8 + $0x20] sm:$0xff]  ;;  %v375_v18 = vld [vmem:[%s7298_s1 + $0x8] sm:$0xff]  ;;  %5122 = vmatprep.subr.bf16.mxu1 %v5121_v9  ;;  %v377_v19 = vld [vmem:[%s7298_s1 + $0x18] sm:$0xff] }
  0x25   :  { %v5129_v21 = vpack.c.bf16 %v377_v19, %v375_v18  ;;  %v374_v28 = vld [vmem:[%s7298_s1] sm:$0xff]  ;;  %v379_v31 = vld [vmem:[%s7298_s1 + $0x28] sm:$0xff]  ;;  %v5984_v9 = vld [vmem:[%s7301_s6 + $0x90] sm:$0xff]  ;;  %p5585_p4 = pnand %p5584_p3, %p5578_p0 }
  0x26   :  { %5124 = vmatpush1.bf16.msra.mxu1 %v5123_v14  ;;  %v4076_v30 = vld [vmem:[%s7300_s21] ss:$0 sm:$0xff]  ;;  %v5978_v7 = vld [vmem:[%s7301_s6 + $0x8] sm:$0xff]  ;;  %v5989_v10 = vld [vmem:[%s7301_s6 + $0x98] sm:$0xff] }
  0x27   :  { %5095 = vmatpush1.bf16.msra.mxu0 %v5094_v20  ;;  %v5127_v20 = vpack.c.bf16 %v286_v17, %v284_v16  ;;  %5126 = vmatprep.subr.bf16.mxu1 %v5125_v15  ;;  %v378_v37 = vld [vmem:[%s7298_s1 + $0x20] sm:$0xff]  ;;  %v5998_v14 = vpack.c.bf16 %v5989_v10, %v5984_v9  ;;  %v6003_v15 = vld [vmem:[%s7301_s6 + $0x10] sm:$0xff]  ;;  %v6008_v16 = vld [vmem:[%s7301_s6 + $0x18] sm:$0xff] }
  0x28   :  { %5096 = vmatprep.subr.bf16.mxu0 %v7239_v4  ;;  %v465_v40 = vld [vmem:[%s7216_s9] sm:$0xff]  ;;  %7302 = vst [vmem:[#allocation7_spill] sm:$0xff] %v6003_v15  ;;  %v6019_v19 = vld [vmem:[%s7301_s6 + $0xa8] sm:$0xff] }
  0x29   :  { %v5973_v6 = vld [vmem:[%s7301_s6] sm:$0xff] }
  0x2a   :  { %5128 = vmatpush1.bf16.msra.mxu1 %v5127_v20  ;;  %v5994_v11 = vpack.c.bf16 %v5978_v7, %v5973_v6  ;;  %v6014_v18 = vld [vmem:[%s7301_s6 + $0xa0] sm:$0xff]  ;;  %v6025_v20 = vpack.c.bf16 %v6008_v16, %v6003_v15 }
  0x2b   :  { %5098 = vmatpush1.bf16.msra.mxu0 %v5097_v23  ;;  %5130 = vmatprep.subr.bf16.mxu1 %v5129_v21 }
  0x2c   :  { %5099 = vmatprep.subr.bf16.mxu0 %v7239_v4 }
  0x2f   :  { %5101 = vmatpush1.bf16.msra.mxu0 %v5100_v26  ;;  %v4075_v26 = vld [vmem:[%s7299_s2] ss:$0 sm:$0xff] }
  0x30   :  { %5102 = vmatprep.subr.bf16.mxu0 %v7239_v4 }
  0x33   :  { %5104 = vmatpush1.bf16.msra.mxu0 %v5103_v29  ;;  %v376_v29 = vld [vmem:[%s7298_s1 + $0x10] sm:$0xff] }
  0x34   :  { %5105 = vmatprep.subr.bf16.mxu0 %v7239_v4  ;;  %v5131_v34 = vpack.c.bf16 %v376_v29, %v374_v28 }
  0x37   :  { %5107 = vmatpush1.bf16.msra.mxu0 %v5106_v32  ;;  %v381_v32 = vld [vmem:[%s7298_s1 + $0x38] sm:$0xff] }
  0x38   :  { %5108 = vmatprep.subr.bf16.mxu0 %v7239_v4  ;;  %v5133_v36 = vpack.c.bf16 %v381_v32, %v379_v31  ;;  %v6067_v31 = vld [vmem:[%s7301_s6 + $0x30] sm:$0xff]  ;;  %v6072_v32 = vld [vmem:[%s7301_s6 + $0x38] sm:$0xff] }
  0x39   :  { %7305 = vst [vmem:[#allocation10_spill] sm:$0xff] %v6067_v31 }
  0x3b   :  { %5110 = vmatpush1.bf16.msra.mxu0 %v5109_v35 }
  0x3c   :  { %5111 = vmatprep.subr.bf16.mxu0 %v7239_v4 }
  0x3f   :  { %5113 = vmatpush1.bf16.msra.mxu0 %v5112_v38  ;;  %v380_v38 = vld [vmem:[%s7298_s1 + $0x30] sm:$0xff] }
  0x40   :  { %5114 = vmatprep.subr.bf16.mxu0 %v7239_v4  ;;  %v5135_v39 = vpack.c.bf16 %v380_v38, %v378_v37 }
  0x43   :  { %5116 = vmatpush1.bf16.msra.mxu0 %v5115_v41  ;;  %v466_v41 = vld [vmem:[%s7216_s9 + $0x8] sm:$0xff] }
  0x44   :  { %5117 = vmatprep.subr.bf16.mxu0 %v7239_v4  ;;  %v5138_v42 = vpack.c.bf16 %v466_v41, %v465_v40  ;;  %v6104_v40 = vld [vmem:[%s7301_s6 + $0x48] sm:$0xff] }
  0x47   :  { %5120 = vmatpush1.bf16.msk.msra.mxu0 %vm5119_vm3, %v5118_v44  ;;  %v468_v44 = vld [vmem:[%s7216_s9 + $0x18] sm:$0xff]  ;;  %vm3969_vm3 = vcmask 1040384  }
  0x4a   :  { %215 = vmatmul.mubr.f32.vlgmr.msra.gmra.mrb[0].mxu0 %v112_v45  ;;  %v5141_v45 = vpack.c.bf16 %v468_v44, %v467_v43  ;;  %v6115_v43 = vld [vmem:[%s7301_s6 + $0xd8] sm:$0xff] }
 0x11d   :  { %v216_v46 = vpop.f32.mrb[0].mxu0 }
 0x11e   :  { %v218_v47 = vpop.f32.mrb[1].mxu0  ;;  %v223_v48 = vsel %vm222_vm4, %v216_v46, 0.0 }
 0x11f   :  { %224 = vadd.xlane.f32.xlu0 %v223_v48 }
 0x1ac   :  { %v225_v49 = vpop.xlane.xlu0 %224 }
 0x1ad   :  { %v227_v50 = vmul.f32 0.03125, %v225_v49 }
 0x1af   :  { %v228_v51 = vsub.f32 %v216_v46, %v227_v50 }
 0x1b1   :  { %v229_v52 = vmul.f32 %v228_v51, %v228_v51 }
 0x1b3   :  { %v230_v53 = vsel %vm222_vm4, %v229_v52, 0.0 }
 0x1b4   :  { %231 = vadd.xlane.f32.xlu0 %v230_v53 }
 0x241   :  { %v232_v54 = vpop.xlane.xlu0 %231 }
 0x242   :  { %v233_v55 = vmul.f32 0.03125, %v232_v54 }
 0x244   :  { %v234_v56 = vadd.f32 1e-05, %v233_v55 }
 0x246   :  { %5497 = vrsqrt.f32 %v234_v56 }
 0x250   :  { %v5498_v57 = vpop.eup %5497 }
 0x251   :  { %v236_v59 = vmul.f32 %v5498_v57, %v228_v51 }
 0x253   :  { %v243_v61 = vmul.f32 %v4073_v58, %v236_v59 }
 0x255   :  { %v5848_v62 = vadd.f32 %v4074_v60, %v243_v61 }
 0x257   :  { %7296 = vst [vmem:[#allocation6_spill] sm:$0xff] %v5848_v62  ;;  %v253_v63 = vsel %vm222_vm4, %v5848_v62, 0.0 }
 0x258   :  { %254 = vadd.xlane.f32.xlu1 %v253_v63  ;;  %v5952_v63 = vld [vmem:[%s7301_s6 + $0x80] sm:$0xff] }
 0x2e5   :  { %v255_v0 = vpop.xlane.xlu1 %254 }
 0x2e6   :  { %v256_v1 = vmul.f32 0.03125, %v255_v0  ;;  %v5957_v0 = vld [vmem:[%s7301_s6 + $0x88] sm:$0xff] }
 0x2e8   :  { %v257_v2 = vsub.f32 %v5848_v62, %v256_v1  ;;  %v5961_v1 = vpack.c.bf16 %v5957_v0, %v5952_v63 }
 0x2ea   :  { %v258_v3 = vmul.f32 %v257_v2, %v257_v2 }
 0x2ec   :  { %v259_v5 = vsel %vm222_vm4, %v258_v3, 0.0 }
 0x2ed   :  { %260 = vadd.xlane.f32.xlu1 %v259_v5 }
 0x37a   :  { %v261_v22 = vpop.xlane.xlu1 %260 }
 0x37b   :  { %v262_v23 = vmul.f32 0.03125, %v261_v22  ;;  %v6030_v22 = vpack.c.bf16 %v6019_v19, %v6014_v18 }
 0x37d   :  { %v263_v24 = vadd.f32 1e-05, %v262_v23  ;;  %v6035_v23 = vld [vmem:[%s7301_s6 + $0x20] sm:$0xff] }
 0x37e   :  { %7303 = vst [vmem:[#allocation8_spill] sm:$0xff] %v6035_v23 }
 0x37f   :  { %5499 = vrsqrt.f32 %v263_v24  ;;  %v6040_v24 = vld [vmem:[%s7301_s6 + $0x28] sm:$0xff] }
 0x380   :  { %7304 = vst [vmem:[#allocation9_spill] sm:$0xff] %v6040_v24  ;;  %v6057_v28 = vpack.c.bf16 %v6040_v24, %v6035_v23 }
 0x389   :  { %v5500_v25 = vpop.eup %5499 }
 0x38a   :  { %v265_v27 = vmul.f32 %v5500_v25, %v257_v2 }
 0x38c   :  { %v272_v33 = vmul.f32 %v4075_v26, %v265_v27  ;;  %v6046_v26 = vld [vmem:[%s7301_s6 + $0xb0] sm:$0xff]  ;;  %v6051_v27 = vld [vmem:[%s7301_s6 + $0xb8] sm:$0xff] }
 0x38e   :  { %v279_v35 = vadd.f32 %v4076_v30, %v272_v33  ;;  %v6062_v30 = vpack.c.bf16 %v6051_v27, %v6046_v26 }
 0x390   :  { %4077 = vmatmul.mubr.msk.f32.vlgmr.msra.gmra.mrb[0].mxu1 %vm222_vm4, %v279_v35 }
 0x391   :  { %5132 = vmatpush1.bf16.msra.mxu1 %v5131_v34  ;;  %446 = vmatprep.mubr.f32.mxu1 %v7241_v13  ;;  %v6078_v34 = vld [vmem:[%s7301_s6 + $0xc0] sm:$0xff] }
 0x392   :  { %5134 = vmatprep.subr.bf16.mxu1 %v5133_v36  ;;  %v6089_v36 = vpack.c.bf16 %v6072_v32, %v6067_v31 }
 0x395   :  { %5136 = vmatpush1.bf16.msra.mxu1 %v5135_v39  ;;  %v6099_v39 = vld [vmem:[%s7301_s6 + $0x40] sm:$0xff] }
 0x396   :  { %5137 = vmatprep.subr.bf16.mxu1 %v7239_v4  ;;  %7306 = vst [vmem:[#allocation11_spill] sm:$0xff] %v6099_v39  ;;  %v6121_v44 = vpack.c.bf16 %v6104_v40, %v6099_v39 }
 0x398   :  { %4078 = vmatmul.mubr.msk.f32.vlgmr.msra.gmra.mrb[2].mxu1 %vm222_vm4, %v279_v35 }
 0x399   :  { %5139 = vmatpush3.bf16.msra.mxu1 %v5138_v42  ;;  %4760 = vmatprep.mubr.msk.f32.mxu1 %vm5604_vm5, %v7241_v13  ;;  %v6110_v42 = vld [vmem:[%s7301_s6 + $0xd0] sm:$0xff] }
 0x39a   :  { %5140 = vmatprep.subr.bf16.mxu1 %v7239_v4 }
 0x39d   :  { %5142 = vmatpush3.bf16.msra.mxu1 %v5141_v45 }
 0x3a0   :  { %4761 = vmatmul.mubr.msk.f32.vlgmr.msra.gmra.mrb[4].mxu1 %vm222_vm4, %v279_v35  ;;  %v6083_v35 = vld [vmem:[%s7301_s6 + $0xc8] sm:$0xff] }
 0x3a1   :  { %v6094_v38 = vpack.c.bf16 %v6083_v35, %v6078_v34 }
 0x463   :  { %v5929_v46 = vpop.f32.mrb[0].mxu1 }
 0x464   :  { %v5931_v47 = vpop.f32.mrb[1].mxu1  ;;  %v366_v62 = vmin.f32 %v5929_v46, 0.0  ;;  %vm362_vm10 = vcmp.gt.f32.partialorder %v5929_v46, 0.0 }
 0x465   :  { %vm363_vm9 = vcmp.gt.f32.partialorder %v5931_v47, 0.0 }
 0x46b   :  { %v448_v48 = vpop.f32.mrb[2].mxu1 }
 0x46c   :  { %v457_v49 = vmin.f32 %v448_v48, 0.0  ;;  %v450_v50 = vpop.f32.mrb[3].mxu1  ;;  %v455_v56 = vadd.f32 1.0, %v448_v48  ;;  %vm453_vm6 = vcmp.gt.f32.partialorder %v448_v48, 0.0  ;;  %v6126_v48 = vpack.c.bf16 %v6115_v43, %v6110_v42 }
 0x46d   :  { %v458_v51 = vmin.f32 %v450_v50, 0.0  ;;  %v456_v58 = vadd.f32 1.0, %v450_v50  ;;  %vm454_vm7 = vcmp.gt.f32.partialorder %v450_v50, 0.0  ;;  %v6136_v50 = vld [vmem:[%s7301_s6 + $0x58] sm:$0xff] }
 0x46e   :  { %v459_v52 = vmul.f32 1.442695, %v457_v49  ;;  %7307 = vst [vmem:[#allocation12_spill] sm:$0xff] %v6126_v48  ;;  %v6131_v49 = vld [vmem:[%s7301_s6 + $0x50] sm:$0xff]  ;;  %7309 = vst [vmem:[#allocation14_spill] sm:$0xff] %v6136_v50 }
 0x46f   :  { %v461_v53 = vmul.f32 1.442695, %v458_v51  ;;  %7308 = vst [vmem:[#allocation13_spill] sm:$0xff] %v6131_v49 }
 0x470   :  { %5501 = vpow2.f32 %v459_v52  ;;  %v6142_v52 = vld [vmem:[%s7301_s6 + $0xe0] sm:$0xff] }
 0x471   :  { %5503 = vpow2.f32 %v461_v53  ;;  %v6147_v53 = vld [vmem:[%s7301_s6 + $0xe8] sm:$0xff] }
 0x473   :  { %v5933_v54 = vpop.f32.mrb[4].mxu1 }
 0x474   :  { %v4762_v55 = vpop.f32.mrb[5].mxu1  ;;  %4763 = vmatprep.subr.msk.mxu0 %vm146_vm1, %v5933_v54  ;;  %5481 = vmatprep.subr.msk.mxu1 %vm146_vm1, %v5933_v54 }
 0x475   :  { %4764 = vmatpush3.msk.msra.mxu0 %vm146_vm1, %v5933_v54  ;;  %5482 = vmatpush3.msk.msra.mxu1 %vm146_vm1, %v5933_v54  ;;  %v6153_v55 = vpack.c.bf16 %v6136_v50, %v6131_v49 }
 0x476   :  { %5176 = vmatprep.subr.bf16.mxu1 %v5961_v1 }
 0x477   :  { %7310 = vst [vmem:[#allocation15_spill] sm:$0xff] %v6153_v55 }
 0x47a   :  { %v5502_v57 = vpop.eup %5501 }
 0x47b   :  { %v5504_v59 = vpop.eup %5503  ;;  %v5943_v60 = vsel %vm453_vm6, %v455_v56, %v5502_v57  ;;  %v6158_v57 = vpack.c.bf16 %v6147_v53, %v6142_v52 }
 0x47c   :  { %539 = vxpose.xlu1.b32.start.end [1/1] (short) %v5943_v60, 128  ;;  %v5946_v61 = vsel %vm454_vm7, %v456_v58, %v5504_v59  ;;  %v7243_v2 = vrot.slane %v5943_v60, 4  ;;  %v6163_v58 = vld [vmem:[%s7301_s6 + $0x60] sm:$0xff]  ;;  %v6168_v59 = vld [vmem:[%s7301_s6 + $0x68] sm:$0xff] }
 0x47d   :  { %571 = vxpose.xlu0.b32.start.end [1/1] (short) %v5946_v61, 128  ;;  %v7244_v3 = vrot.slane %v5946_v61, 4  ;;  %7311 = vst [vmem:[#allocation16_spill] sm:$0xff] %v6158_v57  ;;  %7312 = vst [vmem:[#allocation17_spill] sm:$0xff] %v6163_v58 }
 0x4b9   :  { %1124 = vxpose.xlu1.b32.start.end [1/1] (short) %v7243_v2, 128 }
 0x4ba   :  { %1156 = vxpose.xlu0.b32.start.end [1/1] (short) %v7244_v3, 128 }
 0x4fc   :  { %v555_v5 = vpop.trf.xlu1 }
 0x4fd   :  { %v587_v8 = vpop.trf.xlu0  ;;  %4765 = vmatprep.mubr.msk.f32.mxu0 %vm603_vm8, %v555_v5 }
 0x4fe   :  { %4789 = vmatprep.mubr.msk.f32.mxu1 %vm603_vm8, %v587_v8  ;;  %v6174_v8 = vld [vmem:[%s7301_s6 + $0xf0] sm:$0xff] }
 0x500   :  { %v556_v12 = vpop.trf.xlu1 }
 0x501   :  { %v588_v17 = vpop.trf.xlu0  ;;  %4766 = vmatmul.mubr.msk.f32.vlgmr.msra.gmra.mrb[2].mxu0 %vm603_vm8, %v556_v12  ;;  %v6179_v12 = vld [vmem:[%s7301_s6 + $0xf8] sm:$0xff] }
 0x502   :  { %4790 = vmatmul.mubr.msk.f32.vlgmr.msra.gmra.mrb[6].mxu1 %vm603_vm8, %v588_v17  ;;  %v6185_v17 = vpack.c.bf16 %v6168_v59, %v6163_v58 }
 0x503   :  { %5178 = vmatpush3.bf16.msra.mxu1 %v5994_v11 }
 0x504   :  { %v557_v21 = vpop.trf.xlu1  ;;  %5180 = vmatprep.subr.bf16.mxu1 %v5998_v14  ;;  %7313 = vst [vmem:[#allocation18_spill] sm:$0xff] %v6185_v17 }
 0x505   :  { %v589_v25 = vpop.trf.xlu0  ;;  %4768 = vmatprep.mubr.msk.f32.mxu0 %vm603_vm8, %v557_v21 }
 0x506   :  { %4792 = vmatprep.mubr.msk.f32.mxu1 %vm603_vm8, %v589_v25  ;;  %v6190_v25 = vpack.c.bf16 %v6179_v12, %v6174_v8 }
 0x507   :  { %5182 = vmatpush3.bf16.msra.mxu1 %v6025_v20 }
 0x508   :  { %v558_v29 = vpop.trf.xlu1  ;;  %5184 = vmatprep.subr.bf16.mxu1 %v6030_v22  ;;  %7314 = vst [vmem:[#allocation19_spill] sm:$0xff] %v6190_v25 }
 0x509   :  { %v590_v33 = vpop.trf.xlu0  ;;  %4769 = vmatmul.mubr.msk.f32.gmra.mrb[4].mxu0 %vm603_vm8, %v558_v29  ;;  %v6195_v29 = vld [vmem:[%s7301_s6 + $0x70] sm:$0xff] }
 0x50a   :  { %4793 = vmatmul.mubr.msk.f32.gmra.mrb[8].mxu1 %vm603_vm8, %v590_v33  ;;  %v6200_v33 = vld [vmem:[%s7301_s6 + $0x78] sm:$0xff] }
 0x50b   :  { %5186 = vmatpush3.bf16.msra.mxu1 %v6057_v28 }
 0x50c   :  { %v559_v37 = vpop.trf.xlu1  ;;  %5188 = vmatprep.subr.bf16.mxu1 %v6062_v30 }
 0x50d   :  { %v591_v41 = vpop.trf.xlu0  ;;  %4771 = vmatprep.mubr.msk.f32.mxu0 %vm603_vm8, %v559_v37 }
 0x50e   :  { %4795 = vmatprep.mubr.msk.f32.mxu1 %vm603_vm8, %v591_v41  ;;  %v6207_v41 = vpack.c.bf16 %v6200_v33, %v6195_v29 }
 0x50f   :  { %5190 = vmatpush3.bf16.msra.mxu1 %v6089_v36 }
 0x510   :  { %v560_v45 = vpop.trf.xlu1  ;;  %5192 = vmatprep.subr.bf16.mxu1 %v6094_v38  ;;  %7315 = vst [vmem:[#allocation20_spill] sm:$0xff] %v6207_v41 }
 0x511   :  { %v592_v51 = vpop.trf.xlu0  ;;  %4772 = vmatmul.mubr.msk.f32.gmra.mrb[6].mxu0 %vm603_vm8, %v560_v45 }
 0x512   :  { %4796 = vmatmul.mubr.msk.f32.gmra.mrb[10].mxu1 %vm603_vm8, %v592_v51 }
 0x513   :  { %5194 = vmatpush3.bf16.msra.mxu1 %v6121_v44 }
 0x514   :  { %v561_v56 = vpop.trf.xlu1  ;;  %5196 = vmatprep.subr.bf16.mxu1 %v6126_v48 }
 0x515   :  { %v593_v5 = vpop.trf.xlu0  ;;  %4774 = vmatprep.mubr.msk.f32.mxu0 %vm603_vm8, %v561_v56  ;;  %v1037_v56 = vsel %vm146_vm1, %v5946_v61, 0.0 }
 0x516   :  { %4798 = vmatprep.mubr.msk.f32.mxu1 %vm603_vm8, %v593_v5  ;;  %v6215_v5 = vrot.slane %v5933_v54, 4  ;;  %v1038_v4 = vrot.slane %v1037_v56, 4 }
 0x517   :  { %5198 = vmatpush3.bf16.msra.mxu1 %v6153_v55 }
 0x518   :  { %v562_v21 = vpop.trf.xlu1  ;;  %5200 = vmatprep.subr.bf16.mxu1 %v6158_v57  ;;  %v1039_v2 = vadd.f32 %v1038_v4, %v1037_v56 }
 0x519   :  { %v594_v37 = vpop.trf.xlu0  ;;  %4775 = vmatmul.mubr.msk.f32.gmra.mrb[8].mxu0 %vm603_vm8, %v562_v21 }
 0x51a   :  { %4799 = vmatmul.mubr.msk.f32.gmra.mrb[12].mxu1 %vm603_vm8, %v594_v37  ;;  %v1030_v37 = vsel %vm146_vm1, %v5943_v60, 0.0  ;;  %v1040_v57 = vrot.slane %v1039_v2, 2 }
 0x51b   :  { %5202 = vmatpush3.bf16.msra.mxu1 %v6185_v17 }
 0x51c   :  { %v563_v45 = vpop.trf.xlu1  ;;  %5204 = vmatprep.subr.bf16.mxu1 %v6190_v25  ;;  %v1041_v56 = vadd.f32 %v1040_v57, %v1039_v2  ;;  %v365_v57 = vadd.f32 1.0, %v5931_v47 }
 0x51d   :  { %v595_v51 = vpop.trf.xlu0  ;;  %4777 = vmatprep.mubr.msk.f32.mxu0 %vm603_vm8, %v563_v45  ;;  %v367_v45 = vmin.f32 %v5931_v47, 0.0 }
 0x51e   :  { %4801 = vmatprep.mubr.msk.f32.mxu1 %vm603_vm8, %v595_v51  ;;  %v1031_v51 = vrot.slane %v1030_v37, 4 }
 0x51f   :  { %5206 = vmatpush3.bf16.msra.mxu1 %v6207_v41  ;;  %v370_v41 = vmul.f32 1.442695, %v367_v45 }
 0x520   :  { %5483 = vmatprep.subr.msk.mxu1 %vm146_vm1, %v6215_v5  ;;  %v564_v21 = vpop.trf.xlu1  ;;  %v1032_v25 = vadd.f32 %v1031_v51, %v1030_v37  ;;  %v1042_v51 = vrot.slane %v1041_v56, 1 }
 0x521   :  { %v596_v13 = vpop.trf.xlu0  ;;  %4778 = vmatmul.mubr.msk.f32.gmra.mrb[10].mxu0 %vm603_vm8, %v564_v21  ;;  %5505 = vpow2.f32 %v370_v41 }
 0x522   :  { %4802 = vmatmul.mubr.msk.f32.gmra.mrb[14].mxu1 %vm603_vm8, %v596_v13  ;;  %v368_v13 = vmul.f32 1.442695, %v366_v62  ;;  %v1033_v21 = vrot.slane %v1032_v25, 2  ;;  %v1043_v2 = vadd.f32 %v1042_v51, %v1041_v56 }
 0x524   :  { %v565_v54 = vpop.trf.xlu1  ;;  %5507 = vpow2.f32 %v368_v13 }
 0x525   :  { %v597_v3 = vpop.trf.xlu0  ;;  %4780 = vmatprep.mubr.msk.f32.mxu0 %vm603_vm8, %v565_v54 }
 0x526   :  { %4804 = vmatprep.mubr.msk.f32.mxu1 %vm603_vm8, %v597_v3  ;;  %v1034_v3 = vadd.f32 %v1033_v21, %v1032_v25  ;;  %v364_v21 = vadd.f32 1.0, %v5929_v46 }
 0x528   :  { %v566_v17 = vpop.trf.xlu1  ;;  %v1035_v62 = vrot.slane %v1034_v3, 1 }
 0x529   :  { %v598_v55 = vpop.trf.xlu0  ;;  %4781 = vmatmul.mubr.msk.f32.gmra.mrb[12].mxu0 %vm603_vm8, %v566_v17 }
 0x52a   :  { %4805 = vmatmul.mubr.msk.f32.gmra.mrb[16].mxu1 %vm603_vm8, %v598_v55  ;;  %v1036_v25 = vadd.f32 %v1035_v62, %v1034_v3 }
 0x52b   :  { %v5506_v17 = vpop.eup %5505 }
 0x52c   :  { %v567_v4 = vpop.trf.xlu1  ;;  %v6238_v13 = vsel %vm363_vm9, %v365_v57, %v5506_v17 }
 0x52d   :  { %v599_v48 = vpop.trf.xlu0  ;;  %4783 = vmatprep.mubr.msk.f32.mxu0 %vm603_vm8, %v567_v4 }
 0x52e   :  { %4807 = vmatprep.mubr.msk.f32.mxu1 %vm603_vm8, %v599_v48  ;;  %v5508_v48 = vpop.eup %5507 }
 0x52f   :  { %v6246_v56 = vsel %vm362_vm10, %v364_v21, %v5508_v48 }
 0x530   :  { %v568_v37 = vpop.trf.xlu1  ;;  %v1044_v47 = vmul.f32 %v1036_v25, %v6246_v56 }
 0x531   :  { %v600_v45 = vpop.trf.xlu0  ;;  %4784 = vmatmul.mubr.msk.f32.gmra.mrb[14].mxu0 %vm603_vm8, %v568_v37  ;;  %v1045_v37 = vmul.f32 %v1043_v2, %v6238_v13 }
 0x532   :  { %4808 = vmatmul.mubr.msk.f32.gmra.mrb[18].mxu1 %vm603_vm8, %v600_v45 }
 0x534   :  { %v569_v55 = vpop.trf.xlu1 }
 0x535   :  { %v601_v41 = vpop.trf.xlu0  ;;  %4786 = vmatprep.mubr.msk.f32.mxu0 %vm603_vm8, %v569_v55 }
 0x536   :  { %4810 = vmatprep.mubr.msk.f32.mxu1 %vm603_vm8, %v601_v41 }
 0x538   :  { %v570_v54 = vpop.trf.xlu1 }
 0x539   :  { %4787 = vmatmul.mubr.msk.f32.gmra.mrb[16].mxu0 %vm603_vm8, %v570_v54  ;;  %v602_v4 = vpop.trf.xlu0 }
 0x53a   :  { %4811 = vmatmul.mubr.msk.f32.gmra.mrb[20].mxu1 %vm603_vm8, %v602_v4  ;;  %1024 = vmatprep.mubr.f32.mxu0 %v6238_v13 }
 0x53b   :  { %1110 = vmatprep.mubr.f32.mxu1 %v1045_v37 }
 0x53d   :  { %v1172_v3 = vpop.trf.xlu0 }
 0x53e   :  { %1111 = vmatmul.mubr.f32.vlgmr.msra.gmra.mrb[22].mxu1 %v1044_v47  ;;  %v1547_v47 = vrot.slane %v6238_v13, 4 }
 0x53f   :  { %5484 = vmatpush3.msk.msra.mxu1 %vm146_vm1, %v6215_v5  ;;  %4839 = vmatprep.mubr.msk.f32.mxu1 %vm603_vm8, %v1172_v3 }
 0x541   :  { %v1173_v45 = vpop.trf.xlu0 }
 0x542   :  { %4840 = vmatmul.mubr.msk.f32.vlgmr.msra.gmra.mrb[24].mxu1 %vm603_vm8, %v1173_v45 }
 0x545   :  { %v1174_v46 = vpop.trf.xlu0 }
 0x546   :  { %4842 = vmatprep.mubr.msk.f32.mxu1 %vm603_vm8, %v1174_v46 }
 0x549   :  { %v1175_v51 = vpop.trf.xlu0 }
 0x54a   :  { %4843 = vmatmul.mubr.msk.f32.gmra.mrb[26].mxu1 %vm603_vm8, %v1175_v51 }
 0x54d   :  { %v1176_v62 = vpop.trf.xlu0 }
 0x54e   :  { %4845 = vmatprep.mubr.msk.f32.mxu1 %vm603_vm8, %v1176_v62 }
 0x551   :  { %v1177_v55 = vpop.trf.xlu0 }
 0x552   :  { %4846 = vmatmul.mubr.msk.f32.gmra.mrb[28].mxu1 %vm603_vm8, %v1177_v55 }
 0x555   :  { %v1178_v17 = vpop.trf.xlu0 }
 0x556   :  { %4848 = vmatprep.mubr.msk.f32.mxu1 %vm603_vm8, %v1178_v17 }
 0x559   :  { %v1179_v41 = vpop.trf.xlu0 }
 0x55a   :  { %4849 = vmatmul.mubr.msk.f32.gmra.mrb[30].mxu1 %vm603_vm8, %v1179_v41 }
 0x55d   :  { %v1180_v2 = vpop.trf.xlu0 }
 0x55e   :  { %4851 = vmatprep.mubr.msk.f32.mxu1 %vm603_vm8, %v1180_v2 }
 0x561   :  { %v1181_v57 = vpop.trf.xlu0 }
 0x562   :  { %4852 = vmatmul.mubr.msk.f32.gmra.mrb[32].mxu1 %vm603_vm8, %v1181_v57 }
 0x565   :  { %v1182_v48 = vpop.trf.xlu0 }
 0x566   :  { %4854 = vmatprep.mubr.msk.f32.mxu1 %vm603_vm8, %v1182_v48  ;;  %v6272_v48 = vpop.trf.xlu1 }
 0x569   :  { %v1183_v25 = vpop.trf.xlu0 }
 0x56a   :  { %4855 = vmatmul.mubr.msk.f32.gmra.mrb[34].mxu1 %vm603_vm8, %v1183_v25 }
 0x56d   :  { %v1184_v54 = vpop.trf.xlu0 }
 0x56e   :  { %4857 = vmatprep.mubr.msk.f32.mxu1 %vm603_vm8, %v1184_v54 }
 0x571   :  { %v1185_v21 = vpop.trf.xlu0 }
 0x572   :  { %4858 = vmatmul.mubr.msk.f32.gmra.mrb[36].mxu1 %vm603_vm8, %v1185_v21 }
 0x575   :  { %v1186_v4 = vpop.trf.xlu0 }
 0x576   :  { %4860 = vmatprep.mubr.msk.f32.mxu1 %vm603_vm8, %v1186_v4 }
 0x579   :  { %v1187_v37 = vpop.trf.xlu0 }
 0x57a   :  { %4861 = vmatmul.mubr.msk.f32.gmra.mrb[38].mxu1 %vm603_vm8, %v1187_v37 }
 0x57b   :  { %1614 = vmatprep.mubr.f32.mxu1 %v1547_v47 }
 0x5d4   :  { %v4767_v3 = vpop.f32.mrb[2].mxu0 }
 0x5d5   :  { %v929_v45 = vmul.f32 %v4767_v3, %v5978_v7  ;;  %v4791_v46 = vpop.f32.mrb[6].mxu1  ;;  %v769_v51 = vpop.f32.mrb[3].mxu0 }
 0x5d6   :  { %v945_v62 = vmul.f32 %v4791_v46, %v5957_v0  ;;  %v928_v55 = vmul.f32 %v769_v51, %v5973_v6  ;;  %v849_v17 = vpop.f32.mrb[7].mxu1 }
 0x5d7   :  { %v944_v41 = vmul.f32 %v849_v17, %v5952_v63  ;;  %v6278_v17 = vpop.trf.xlu1 }
 0x5d8   :  { %v5145_v2 = vpack.c.bf16 %v929_v45, %v928_v55 }
 0x5d9   :  { %v5143_v57 = vpack.c.bf16 %v945_v62, %v944_v41 }
 0x5db   :  { %5144 = vmatprep.subr.bf16.mxu0 %v5143_v57 }
 0x5dc   :  { %5146 = vmatpush3.bf16.msra.mxu0 %v5145_v2  ;;  %v4770_v25 = vpop.f32.mrb[4].mxu0 }
 0x5dd   :  { %v931_v54 = vmul.f32 %v4770_v25, %v6008_v16  ;;  %v4794_v21 = vpop.f32.mrb[8].mxu1  ;;  %v779_v4 = vpop.f32.mrb[5].mxu0 }
 0x5de   :  { %v947_v37 = vmul.f32 %v4794_v21, %v5989_v10  ;;  %v930_v47 = vmul.f32 %v779_v4, %v6003_v15  ;;  %v859_v3 = vpop.f32.mrb[9].mxu1  ;;  %v6283_v4 = vpop.trf.xlu1 }
 0x5df   :  { %v946_v46 = vmul.f32 %v859_v3, %v5984_v9 }
 0x5e0   :  { %v5149_v51 = vpack.c.bf16 %v931_v54, %v930_v47 }
 0x5e1   :  { %v5147_v45 = vpack.c.bf16 %v947_v37, %v946_v46 }
 0x5e2   :  { %v6286_v46 = vpop.trf.xlu1 }
 0x5e3   :  { %5148 = vmatprep.subr.bf16.mxu0 %v5147_v45 }
 0x5e4   :  { %5150 = vmatpush3.bf16.msra.mxu0 %v5149_v51  ;;  %v4773_v62 = vpop.f32.mrb[6].mxu0 }
 0x5e5   :  { %v933_v55 = vmul.f32 %v4773_v62, %v6040_v24  ;;  %v4797_v41 = vpop.f32.mrb[10].mxu1  ;;  %v789_v2 = vpop.f32.mrb[7].mxu0 }
 0x5e6   :  { %v949_v57 = vmul.f32 %v4797_v41, %v6019_v19  ;;  %v932_v25 = vmul.f32 %v789_v2, %v6035_v23  ;;  %v869_v21 = vpop.f32.mrb[11].mxu1 }
 0x5e7   :  { %v948_v3 = vmul.f32 %v869_v21, %v6014_v18 }
 0x5e8   :  { %v5153_v54 = vpack.c.bf16 %v933_v55, %v932_v25  ;;  %v6292_v55 = vpop.trf.xlu1 }
 0x5e9   :  { %v5151_v47 = vpack.c.bf16 %v949_v57, %v948_v3 }
 0x5eb   :  { %5152 = vmatprep.subr.bf16.mxu0 %v5151_v47 }
 0x5ec   :  { %5154 = vmatpush3.bf16.msra.mxu0 %v5153_v54  ;;  %v4776_v37 = vpop.f32.mrb[8].mxu0 }
 0x5ed   :  { %v935_v51 = vmul.f32 %v4776_v37, %v6072_v32  ;;  %v4800_v45 = vpop.f32.mrb[12].mxu1  ;;  %v799_v62 = vpop.f32.mrb[9].mxu0 }
 0x5ee   :  { %v951_v41 = vmul.f32 %v4800_v45, %v6051_v27  ;;  %v934_v2 = vmul.f32 %v799_v62, %v6067_v31  ;;  %v879_v23 = vpop.f32.mrb[13].mxu1 }
 0x5ef   :  { %v950_v24 = vmul.f32 %v879_v23, %v6046_v26  ;;  %v6298_v23 = vpop.trf.xlu1 }
 0x5f0   :  { %v5157_v15 = vpack.c.bf16 %v935_v51, %v934_v2 }
 0x5f1   :  { %v5155_v21 = vpack.c.bf16 %v951_v41, %v950_v24 }
 0x5f3   :  { %5156 = vmatprep.subr.bf16.mxu0 %v5155_v21 }
 0x5f4   :  { %5158 = vmatpush3.bf16.msra.mxu0 %v5157_v15  ;;  %v4779_v57 = vpop.f32.mrb[10].mxu0 }
 0x5f5   :  { %v937_v25 = vmul.f32 %v4779_v57, %v6104_v40  ;;  %v4803_v3 = vpop.f32.mrb[14].mxu1  ;;  %v809_v54 = vpop.f32.mrb[11].mxu0 }
 0x5f6   :  { %v953_v47 = vmul.f32 %v4803_v3, %v6083_v35  ;;  %v936_v37 = vmul.f32 %v809_v54, %v6099_v39  ;;  %v889_v45 = vpop.f32.mrb[15].mxu1  ;;  %v6303_v54 = vpop.trf.xlu1 }
 0x5f7   :  { %v952_v62 = vmul.f32 %v889_v45, %v6078_v34 }
 0x5f8   :  { %v5161_v31 = vpack.c.bf16 %v937_v25, %v936_v37 }
 0x5f9   :  { %v5159_v24 = vpack.c.bf16 %v953_v47, %v952_v62 }
 0x5fb   :  { %5160 = vmatprep.subr.bf16.mxu0 %v5159_v24 }
 0x5fc   :  { %5162 = vmatpush3.bf16.msra.mxu0 %v5161_v31  ;;  %v4782_v51 = vpop.f32.mrb[12].mxu0  ;;  %v6306_v31 = vpop.trf.xlu1 }
 0x5fd   :  { %v939_v15 = vmul.f32 %v4782_v51, %v6136_v50  ;;  %v4806_v41 = vpop.f32.mrb[16].mxu1  ;;  %v819_v2 = vpop.f32.mrb[13].mxu0 }
 0x5fe   :  { %v955_v21 = vmul.f32 %v4806_v41, %v6115_v43  ;;  %v938_v57 = vmul.f32 %v819_v2, %v6131_v49  ;;  %v899_v3 = vpop.f32.mrb[17].mxu1 }
 0x5ff   :  { %v954_v45 = vmul.f32 %v899_v3, %v6110_v42 }
 0x600   :  { %v5165_v25 = vpack.c.bf16 %v939_v15, %v938_v57  ;;  %v6312_v15 = vpop.trf.xlu1 }
 0x601   :  { %v5163_v37 = vpack.c.bf16 %v955_v21, %v954_v45 }
 0x603   :  { %5164 = vmatprep.subr.bf16.mxu0 %v5163_v37 }
 0x604   :  { %5166 = vmatpush3.bf16.msra.mxu0 %v5165_v25  ;;  %v4785_v47 = vpop.f32.mrb[14].mxu0 }
 0x605   :  { %v941_v62 = vmul.f32 %v4785_v47, %v6168_v59  ;;  %v4809_v24 = vpop.f32.mrb[18].mxu1  ;;  %v829_v51 = vpop.f32.mrb[15].mxu0 }
 0x606   :  { %v957_v41 = vmul.f32 %v4809_v24, %v6147_v53  ;;  %v940_v2 = vmul.f32 %v829_v51, %v6163_v58  ;;  %v909_v49 = vpop.f32.mrb[19].mxu1 }
 0x607   :  { %v956_v50 = vmul.f32 %v909_v49, %v6142_v52  ;;  %v1149_v49 = vpop.trf.xlu1 }
 0x608   :  { %v5169_v39 = vpack.c.bf16 %v941_v62, %v940_v2 }
 0x609   :  { %v5167_v3 = vpack.c.bf16 %v957_v41, %v956_v50 }
 0x60b   :  { %5168 = vmatprep.subr.bf16.mxu0 %v5167_v3  ;;  %v1150_v3 = vpop.trf.xlu1 }
 0x60c   :  { %5170 = vmatpush3.bf16.msra.mxu0 %v5169_v39  ;;  %v4788_v21 = vpop.f32.mrb[16].mxu0 }
 0x60d   :  { %v943_v57 = vmul.f32 %v4788_v21, %v6200_v33  ;;  %v4812_v45 = vpop.f32.mrb[20].mxu1  ;;  %v839_v25 = vpop.f32.mrb[17].mxu0 }
 0x60e   :  { %v959_v37 = vmul.f32 %v4812_v45, %v6179_v12  ;;  %v942_v47 = vmul.f32 %v839_v25, %v6195_v29  ;;  %v919_v24 = vpop.f32.mrb[21].mxu1  ;;  %v7316_v25 = vrot.slane %v5946_v61, 4 }
 0x60f   :  { %v958_v51 = vmul.f32 %v919_v24, %v6174_v8 }
 0x610   :  { %v5173_v58 = vpack.c.bf16 %v943_v57, %v942_v47  ;;  %v1627_v57 = vsel %vm146_vm1, %v7316_v25, 0.0 }
 0x611   :  { %v5171_v62 = vpack.c.bf16 %v959_v37, %v958_v51  ;;  %v4387_v50 = vpop.f32.mrb[22].mxu1  ;;  %v1628_v61 = vrot.slane %v1627_v57, 4 }
 0x612   :  { %v4388_v41 = vpop.f32.mrb[23].mxu1 }
 0x613   :  { %v6318_v2 = vadd.f32 %v4388_v41, %v4387_v50  ;;  %5172 = vmatprep.subr.bf16.mxu0 %v5171_v62  ;;  %v1629_v24 = vadd.f32 %v1628_v61, %v1627_v57 }
 0x614   :  { %5174 = vmatpush3.bf16.msra.mxu0 %v5173_v58 }
 0x615   :  { %4813 = vmatprep.subr.msk.mxu0 %vm146_vm1, %v6215_v5  ;;  %v4841_v39 = vpop.f32.mrb[24].mxu1  ;;  %5509 = vrcp.f32 %v6318_v2 }
 0x616   :  { %v1529_v21 = vmul.f32 %v4841_v39, %v5957_v0  ;;  %v1433_v45 = vpop.f32.mrb[25].mxu1  ;;  %v7317_v0 = vrot.slane %v5943_v60, 4 }
 0x617   :  { %1025 = vmatmul.mubr.f32.vlgmr.msra.gmra.mrb[18].mxu0 %v6246_v56  ;;  %v1528_v37 = vmul.f32 %v1433_v45, %v5952_v63  ;;  %v1151_v63 = vpop.trf.xlu1 }
 0x618   :  { %4814 = vmatpush3.msk.msra.mxu0 %vm146_vm1, %v6215_v5  ;;  %4815 = vmatprep.mubr.msk.f32.mxu0 %vm603_vm8, %v6272_v48  ;;  %v1620_v47 = vsel %vm146_vm1, %v7317_v0, 0.0 }
 0x619   :  { %5240 = vmatprep.subr.bf16.mxu0 %v5961_v1  ;;  %v5207_v58 = vpack.c.bf16 %v1529_v21, %v1528_v37  ;;  %v1621_v5 = vrot.slane %v1620_v47, 4 }
 0x61b   :  { %4816 = vmatmul.mubr.msk.f32.vlgmr.msra.gmra.mrb[20].mxu0 %vm603_vm8, %v6278_v17  ;;  %5208 = vmatprep.subr.bf16.mxu1 %v5207_v58  ;;  %v1152_v50 = vpop.trf.xlu1 }
 0x61c   :  { %4818 = vmatprep.mubr.msk.f32.mxu0 %vm603_vm8, %v6283_v4  ;;  %5242 = vmatpush3.bf16.msra.mxu0 %v5994_v11  ;;  %v1622_v4 = vadd.f32 %v1621_v5, %v1620_v47  ;;  %v7320_v47 = vld [vmem:[#allocation16_spill] sm:$0xff] }
 0x61d   :  { %5244 = vmatprep.subr.bf16.mxu0 %v5998_v14  ;;  %v4844_v48 = vpop.f32.mrb[26].mxu1 }
 0x61e   :  { %v6343_v60 = vmul.f32 %v4844_v48, %v5989_v10  ;;  %v1443_v51 = vpop.f32.mrb[27].mxu1  ;;  %v1630_v10 = vrot.slane %v1629_v24, 2  ;;  %v7322_v48 = vld [vmem:[#allocation19_spill] sm:$0xff] }
 0x61f   :  { %4819 = vmatmul.mubr.msk.f32.gmra.mrb[22].mxu0 %vm603_vm8, %v6286_v46  ;;  %v6348_v17 = vmul.f32 %v1443_v51, %v5984_v9  ;;  %v1623_v9 = vrot.slane %v1622_v4, 2  ;;  %v7323_v51 = vld [vmem:[#allocation20_spill] sm:$0xff] }
 0x620   :  { %4821 = vmatprep.mubr.msk.f32.mxu0 %vm603_vm8, %v6292_v55  ;;  %5246 = vmatpush3.bf16.msra.mxu0 %v6025_v20  ;;  %v1631_v55 = vadd.f32 %v1630_v10, %v1629_v24 }
 0x621   :  { %5248 = vmatprep.subr.bf16.mxu0 %v6030_v22  ;;  %v5211_v62 = vpack.c.bf16 %v6343_v60, %v6348_v17 }
 0x622   :  { %v1632_v45 = vrot.slane %v1631_v55, 1 }
 0x623   :  { %4822 = vmatmul.mubr.msk.f32.gmra.mrb[24].mxu0 %vm603_vm8, %v6298_v23  ;;  %v1153_v23 = vpop.trf.xlu1 }
 0x624   :  { %4824 = vmatprep.mubr.msk.f32.mxu0 %vm603_vm8, %v6303_v54  ;;  %5250 = vmatpush3.bf16.msra.mxu0 %v6057_v28  ;;  %v1624_v54 = vadd.f32 %v1623_v9, %v1622_v4  ;;  %v1633_v57 = vadd.f32 %v1632_v45, %v1631_v55 }
 0x625   :  { %5252 = vmatprep.subr.bf16.mxu0 %v6062_v30  ;;  %v4847_v46 = vpop.f32.mrb[28].mxu1 }
 0x626   :  { %v6363_v41 = vmul.f32 %v4847_v46, %v6019_v19  ;;  %v1453_v39 = vpop.f32.mrb[29].mxu1  ;;  %v1635_v5 = vmul.f32 %v1633_v57, %v6238_v13  ;;  %v7324_v13 = vmov 0.0  }
 0x627   :  { %4825 = vmatmul.mubr.msk.f32.gmra.mrb[26].mxu0 %vm603_vm8, %v6306_v31  ;;  %v6368_v21 = vmul.f32 %v1453_v39, %v6014_v18  ;;  %v1625_v18 = vrot.slane %v1624_v54, 1  ;;  %v7318_v31 = vld [vmem:[#allocation12_spill] sm:$0xff]  ;;  %v1154_v25 = vpop.trf.xlu1 }
 0x628   :  { %4827 = vmatprep.mubr.msk.f32.mxu0 %vm603_vm8, %v6312_v15  ;;  %5254 = vmatpush3.bf16.msra.mxu0 %v6089_v36  ;;  %v1639_v24 = vrot.slane %v1635_v5, 4 }
 0x629   :  { %5256 = vmatprep.subr.bf16.mxu0 %v6094_v38  ;;  %v5215_v19 = vpack.c.bf16 %v6363_v41, %v6368_v21 }
 0x62b   :  { %4828 = vmatmul.mubr.msk.f32.gmra.mrb[28].mxu0 %vm603_vm8, %v1149_v49  ;;  %v7319_v49 = vld [vmem:[#allocation15_spill] sm:$0xff] }
 0x62c   :  { %4830 = vmatprep.mubr.msk.f32.mxu0 %vm603_vm8, %v1150_v3  ;;  %5258 = vmatpush3.bf16.msra.mxu0 %v6121_v44  ;;  %v1626_v3 = vadd.f32 %v1625_v18, %v1624_v54 }
 0x62d   :  { %5260 = vmatprep.subr.bf16.mxu0 %v7318_v31  ;;  %v4850_v15 = vpop.f32.mrb[30].mxu1 }
 0x62e   :  { %v6381_v37 = vmul.f32 %v4850_v15, %v6051_v27  ;;  %v1463_v58 = vpop.f32.mrb[31].mxu1  ;;  %v7321_v27 = vld [vmem:[#allocation18_spill] sm:$0xff] }
 0x62f   :  { %4831 = vmatmul.mubr.msk.f32.gmra.mrb[30].mxu0 %vm603_vm8, %v1151_v63  ;;  %v6385_v0 = vmul.f32 %v1463_v58, %v6046_v26  ;;  %v1155_v26 = vpop.trf.xlu1  ;;  %v1634_v63 = vmul.f32 %v1626_v3, %v6246_v56 }
 0x630   :  { %4833 = vmatprep.mubr.msk.f32.mxu0 %vm603_vm8, %v1152_v50  ;;  %5262 = vmatpush3.bf16.msra.mxu0 %v7319_v49 }
 0x631   :  { %5264 = vmatprep.subr.bf16.mxu0 %v7320_v47  ;;  %v5219_v61 = vpack.c.bf16 %v6381_v37, %v6385_v0  ;;  %v1638_v4 = vrot.slane %v1634_v63, 4 }
 0x633   :  { %4834 = vmatmul.mubr.msk.f32.gmra.mrb[32].mxu0 %vm603_vm8, %v1153_v23 }
 0x634   :  { %4836 = vmatprep.mubr.msk.f32.mxu0 %vm603_vm8, %v1154_v25  ;;  %5266 = vmatpush3.bf16.msra.mxu0 %v7321_v27 }
 0x635   :  { %5268 = vmatprep.subr.bf16.mxu0 %v7322_v48  ;;  %v4853_v10 = vpop.f32.mrb[32].mxu1 }
 0x636   :  { %v1537_v50 = vmul.f32 %v4853_v10, %v6083_v35  ;;  %v1473_v9 = vpop.f32.mrb[33].mxu1 }
 0x637   :  { %4837 = vmatmul.mubr.msk.f32.gmra.mrb[34].mxu0 %vm603_vm8, %v1155_v26  ;;  %v1536_v46 = vmul.f32 %v1473_v9, %v6078_v34 }
 0x638   :  { %5270 = vmatpush3.bf16.msra.mxu0 %v7323_v51  ;;  %1706 = vmatprep.mubr.f32.mxu0 %v1639_v24 }
 0x639   :  { %v5223_v55 = vpack.c.bf16 %v1537_v50, %v1536_v46 }
 0x63b   :  { %1707 = vmatmul.mubr.f32.vlgmr.msra.gmra.mrb[36].mxu0 %v1638_v4  ;;  %v5510_v4 = vpop.eup %5509 }
 0x63c   :  { %2119 = vmatprep.mubr.f32.mxu0 %v7324_v13 }
 0x63d   :  { %v4856_v39 = vpop.f32.mrb[34].mxu1 }
 0x63e   :  { %v1539_v23 = vmul.f32 %v4856_v39, %v6115_v43  ;;  %v1483_v54 = vpop.f32.mrb[35].mxu1 }
 0x63f   :  { %v1538_v45 = vmul.f32 %v1483_v54, %v6110_v42 }
 0x641   :  { %v5227_v18 = vpack.c.bf16 %v1539_v23, %v1538_v45  ;;  %v7325_v23 = vld [vmem:[#allocation7_spill] sm:$0xff] }
 0x645   :  { %v4859_v15 = vpop.f32.mrb[36].mxu1 }
 0x646   :  { %v1541_v25 = vmul.f32 %v4859_v15, %v6147_v53  ;;  %v1493_v57 = vpop.f32.mrb[37].mxu1  ;;  %v7326_v15 = vld [vmem:[#allocation9_spill] sm:$0xff] }
 0x647   :  { %v1540_v58 = vmul.f32 %v1493_v57, %v6142_v52  ;;  %v7327_v57 = vld [vmem:[#allocation8_spill] sm:$0xff] }
 0x649   :  { %v5231_v3 = vpack.c.bf16 %v1541_v25, %v1540_v58 }
 0x64d   :  { %v4862_v5 = vpop.f32.mrb[38].mxu1 }
 0x64e   :  { %v1543_v35 = vmul.f32 %v4862_v5, %v6179_v12  ;;  %v1503_v26 = vpop.f32.mrb[39].mxu1 }
 0x64f   :  { %v1542_v34 = vmul.f32 %v1503_v26, %v6174_v8  ;;  %v7328_v26 = vld [vmem:[#allocation10_spill] sm:$0xff] }
 0x651   :  { %v5235_v63 = vpack.c.bf16 %v1543_v35, %v1542_v34 }
 0x6ea   :  { %v4352_v43 = vpop.f32.mrb[18].mxu0 }
 0x6eb   :  { %v4353_v24 = vpop.f32.mrb[19].mxu0 }
 0x6ec   :  { %v4354_v42 = vadd.f32 %v4353_v24, %v4352_v43  ;;  %v7329_v24 = vld [vmem:[#allocation11_spill] sm:$0xff] }
 0x6ee   :  { %v6410_v10 = vmul.f32 %v5510_v4, %v4354_v42  ;;  %v4817_v53 = vpop.f32.mrb[20].mxu0 }
 0x6ef   :  { %v1513_v50 = vmul.f32 %v4817_v53, %v5978_v7  ;;  %v1353_v52 = vpop.f32.mrb[21].mxu0  ;;  %v7331_v53 = vld [vmem:[#allocation13_spill] sm:$0xff] }
 0x6f0   :  { %v1512_v9 = vmul.f32 %v1353_v52, %v5973_v6 }
 0x6f2   :  { %v5209_v46 = vpack.c.bf16 %v1513_v50, %v1512_v9  ;;  %v4820_v12 = vpop.f32.mrb[22].mxu0 }
 0x6f3   :  { %v1515_v39 = vmul.f32 %v4820_v12, %v6008_v16  ;;  %v1363_v8 = vpop.f32.mrb[23].mxu0 }
 0x6f4   :  { %v1514_v54 = vmul.f32 %v1363_v8, %v7325_v23  ;;  %5210 = vmatpush3.bf16.msra.mxu1 %v5209_v46 }
 0x6f5   :  { %5212 = vmatprep.subr.bf16.mxu1 %v5211_v62 }
 0x6f6   :  { %v5213_v2 = vpack.c.bf16 %v1515_v39, %v1514_v54  ;;  %v4823_v45 = vpop.f32.mrb[24].mxu0 }
 0x6f7   :  { %v1517_v25 = vmul.f32 %v4823_v45, %v7326_v15  ;;  %v1373_v7 = vpop.f32.mrb[25].mxu0  ;;  %v7333_v45 = vmov 0.0|0.0  }
 0x6f8   :  { %v1516_v58 = vmul.f32 %v1373_v7, %v7327_v57  ;;  %5214 = vmatpush3.bf16.msra.mxu1 %v5213_v2 }
 0x6f9   :  { %5216 = vmatprep.subr.bf16.mxu1 %v5215_v19 }
 0x6fa   :  { %v5217_v6 = vpack.c.bf16 %v1517_v25, %v1516_v58  ;;  %v4826_v16 = vpop.f32.mrb[26].mxu0 }
 0x6fb   :  { %v1519_v5 = vmul.f32 %v4826_v16, %v6072_v32  ;;  %v1383_v35 = vpop.f32.mrb[27].mxu0  ;;  %v7330_v32 = vld [vmem:[#allocation14_spill] sm:$0xff] }
 0x6fc   :  { %v1518_v60 = vmul.f32 %v1383_v35, %v7328_v26  ;;  %5218 = vmatpush3.bf16.msra.mxu1 %v5217_v6  ;;  %v4146_v35 = vld [vmem:[%s7218_s11] ss:$0 sm:$0xff] }
 0x6fd   :  { %5220 = vmatprep.subr.bf16.mxu1 %v5219_v61 }
 0x6fe   :  { %v5221_v17 = vpack.c.bf16 %v1519_v5, %v1518_v60  ;;  %v4829_v62 = vpop.f32.mrb[28].mxu0 }
 0x6ff   :  { %v1521_v34 = vmul.f32 %v4829_v62, %v6104_v40  ;;  %v1393_v43 = vpop.f32.mrb[29].mxu0  ;;  %v7332_v40 = vld [vmem:[#allocation17_spill] sm:$0xff]  ;;  %v7334_v62 = vld [vmem:[#allocation6_spill] sm:$0xff] }
 0x700   :  { %v1520_v41 = vmul.f32 %v1393_v43, %v7329_v24  ;;  %5222 = vmatpush3.bf16.msra.mxu1 %v5221_v17 }
 0x701   :  { %5224 = vmatprep.subr.bf16.mxu1 %v5223_v55 }
 0x702   :  { %v5225_v21 = vpack.c.bf16 %v1521_v34, %v1520_v41  ;;  %v4832_v19 = vpop.f32.mrb[30].mxu0 }
 0x703   :  { %v1523_v42 = vmul.f32 %v4832_v19, %v7330_v32  ;;  %v1403_v4 = vpop.f32.mrb[31].mxu0  ;;  %v1832_v32 = vld [vmem:[%s7221_s14] sm:$0xff] }
 0x704   :  { %v1522_v50 = vmul.f32 %v1403_v4, %v7331_v53  ;;  %5226 = vmatpush3.bf16.msra.mxu1 %v5225_v21  ;;  %v1834_v53 = vld [vmem:[%s7221_s14 + $0x10] sm:$0xff] }
 0x705   :  { %5228 = vmatprep.subr.bf16.mxu1 %v5227_v18 }
 0x706   :  { %v5229_v37 = vpack.c.bf16 %v1523_v42, %v1522_v50  ;;  %v4835_v0 = vpop.f32.mrb[32].mxu0  ;;  %v1833_v42 = vld [vmem:[%s7221_s14 + $0x8] sm:$0xff]  ;;  %v1835_v50 = vld [vmem:[%s7221_s14 + $0x18] sm:$0xff] }
 0x707   :  { %v1525_v61 = vmul.f32 %v4835_v0, %v6168_v59  ;;  %v1413_v52 = vpop.f32.mrb[33].mxu0  ;;  %v1546_v59 = vrot.slane %v6246_v56, 4  ;;  %v1720_v56 = vld [vmem:[%s7217_s10 + $0x10] sm:$0xff]  ;;  %v5278_v4 = vpack.c.bf16 %v1833_v42, %v1832_v32 }
 0x708   :  { %v1524_v9 = vmul.f32 %v1413_v52, %v7332_v40  ;;  %5230 = vmatpush3.bf16.msra.mxu1 %v5229_v37  ;;  %v5281_v37 = vpack.c.bf16 %v1835_v50, %v1834_v53  ;;  %v4158_v50 = vld [vmem:[%s7297_s8 + $0x40] sm:$0xff] }
 0x709   :  { %5232 = vmatprep.subr.bf16.mxu1 %v5231_v3 }
 0x70a   :  { %v5233_v46 = vpack.c.bf16 %v1525_v61, %v1524_v9  ;;  %v4838_v55 = vpop.f32.mrb[34].mxu0  ;;  %v4148_v9 = vld [vmem:[%s7219_s12] ss:$0 sm:$0xff] }
 0x70b   :  { %v1527_v12 = vmul.f32 %v4838_v55, %v6200_v33  ;;  %v1423_v39 = vpop.f32.mrb[35].mxu0  ;;  %v1718_v33 = vld [vmem:[%s7217_s10] sm:$0xff] }
 0x70c   :  { %v1526_v8 = vmul.f32 %v1423_v39, %v6195_v29  ;;  %5234 = vmatpush3.bf16.msra.mxu1 %v5233_v46  ;;  %v1719_v29 = vld [vmem:[%s7217_s10 + $0x8] sm:$0xff]  ;;  %v4149_v55 = vld [vmem:[%s7220_s13] ss:$0 sm:$0xff] }
 0x70d   :  { %5236 = vmatprep.subr.bf16.mxu1 %v5235_v63  ;;  %v5272_v3 = vpack.c.bf16 %v1719_v29, %v1718_v33  ;;  %v1721_v63 = vld [vmem:[%s7217_s10 + $0x18] sm:$0xff]  ;;  %v1926_v33 = vld [vmem:[%s7223_s16 + $0x20] sm:$0xff]  ;;  %v1927_v29 = vld [vmem:[%s7223_s16 + $0x28] sm:$0xff] }
 0x70e   :  { %v5237_v23 = vpack.c.bf16 %v1527_v12, %v1526_v8  ;;  %v4490_v18 = vpop.f32.mrb[36].mxu0  ;;  %v5275_v15 = vpack.c.bf16 %v1721_v63, %v1720_v56  ;;  %v1922_v8 = vld [vmem:[%s7223_s16] sm:$0xff]  ;;  %v1928_v56 = vld [vmem:[%s7223_s16 + $0x30] sm:$0xff]  ;;  %v1929_v63 = vld [vmem:[%s7223_s16 + $0x38] sm:$0xff] }
 0x70f   :  { %v4491_v54 = vpop.f32.mrb[37].mxu0 }
 0x710   :  { %v4492_v2 = vadd.f32 %v4491_v54, %v4490_v18  ;;  %5238 = vmatpush3.bf16.msra.mxu1 %v5237_v23  ;;  %v1923_v23 = vld [vmem:[%s7223_s16 + $0x8] sm:$0xff]  ;;  %v1924_v54 = vld [vmem:[%s7223_s16 + $0x10] sm:$0xff] }
 0x711   :  { %5271 = vmatprep.subr.bf16.mxu1 %v7333_v45  ;;  %v5284_v18 = vpack.c.bf16 %v1923_v23, %v1922_v8  ;;  %v4162_v23 = vld [vmem:[%s7297_s8 + $0x60] sm:$0xff] }
 0x712   :  { %5511 = vrcp.f32 %v4492_v2  ;;  %v1925_v2 = vld [vmem:[%s7223_s16 + $0x18] sm:$0xff] }
 0x713   :  { %1615 = vmatmul.mubr.f32.vlgmr.msra.gmra.mrb[40].mxu1 %v1546_v59  ;;  %v5287_v59 = vpack.c.bf16 %v1925_v2, %v1924_v54  ;;  %v4172_v54 = vld [vmem:[%s7298_s1 + $0x68] sm:$0xff] }
 0x714   :  { %4871 = vmatprep.mubr.msk.f32.mxu1 %vm5604_vm5, %v7324_v13  ;;  %5273 = vmatpush3.bf16.msra.mxu1 %v5272_v3  ;;  %v5290_v3 = vpack.c.bf16 %v1927_v29, %v1926_v33  ;;  %v4171_v33 = vld [vmem:[%s7298_s1 + $0x60] sm:$0xff]  ;;  %v4173_v29 = vld [vmem:[%s7298_s1 + $0x70] sm:$0xff] }
 0x715   :  { %5274 = vmatprep.subr.bf16.mxu1 %v7333_v45 }
 0x718   :  { %5276 = vmatpush3.bf16.msra.mxu1 %v5275_v15  ;;  %v5293_v15 = vpack.c.bf16 %v1929_v63, %v1928_v56  ;;  %v5309_v56 = vpack.c.bf16 %v4173_v29, %v4171_v33 }
 0x719   :  { %5277 = vmatprep.subr.bf16.mxu1 %v7333_v45 }
 0x71c   :  { %v5512_v58 = vpop.eup %5511 }
 0x7e6   :  { %v4455_v25 = vpop.f32.mrb[40].mxu1 }
 0x7e7   :  { %v4456_v7 = vpop.f32.mrb[41].mxu1 }
 0x7e8   :  { %v4457_v57 = vadd.f32 %v4456_v7, %v4455_v25  ;;  %v4150_v25 = vld [vmem:[%s7222_s15] ss:$0 sm:$0xff] }
 0x7ea   :  { %v1713_v6 = vmul.f32 %v5512_v58, %v4457_v57 }
 0x7ec   :  { %v1715_v16 = vrot.slane %v1713_v6, 4 }
 0x7ee   :  { %v1717_v5 = vsel %vm146_vm1, %v6410_v10, %v1715_v16 }
 0x7ef   :  { %4872 = vmatmul.mubr.msk.f32.vlgmr.msra.gmra.mrb[42].mxu1 %vm222_vm4, %v1717_v5 }
 0x7f0   :  { %4882 = vmatprep.mubr.msk.f32.mxu1 %vm5604_vm5, %v7324_v13  ;;  %5279 = vmatpush3.bf16.msra.mxu1 %v5278_v4  ;;  %v4159_v4 = vld [vmem:[%s7297_s8 + $0x48] sm:$0xff] }
 0x7f1   :  { %5280 = vmatprep.subr.bf16.mxu1 %v7333_v45 }
 0x7f4   :  { %5282 = vmatpush3.bf16.msra.mxu1 %v5281_v37  ;;  %v4160_v37 = vld [vmem:[%s7297_s8 + $0x50] sm:$0xff] }
 0x7f5   :  { %5283 = vmatprep.subr.bf16.mxu1 %v7333_v45 }
 0x8c2   :  { %v1798_v26 = vpop.f32.mrb[42].mxu1 }
 0x8c3   :  { %v1799_v60 = vadd.f32 %v4146_v35, %v1798_v26  ;;  %v4873_v17 = vpop.f32.mrb[43].mxu1 }
 0x8c5   :  { %v6464_v34 = vadd.f32 %v1799_v60, %v7334_v62  ;;  %v4152_v60 = vld [vmem:[%s7224_s17] ss:$0 sm:$0xff] }
 0x8c7   :  { %v1805_v43 = vsel %vm222_vm4, %v6464_v34, 0.0 }
 0x8c8   :  { %1806 = vadd.xlane.f32.xlu0 %v1805_v43 }
 0x955   :  { %v1807_v10 = vpop.xlane.xlu0 %1806 }
 0x956   :  { %v1808_v24 = vmul.f32 0.03125, %v1807_v10 }
 0x958   :  { %v1809_v41 = vsub.f32 %v6464_v34, %v1808_v24 }
 0x95a   :  { %v1810_v21 = vmul.f32 %v1809_v41, %v1809_v41 }
 0x95c   :  { %v1811_v19 = vsel %vm222_vm4, %v1810_v21, 0.0 }
 0x95d   :  { %1812 = vadd.xlane.f32.xlu1 %v1811_v19 }
 0x9ea   :  { %v1813_v0 = vpop.xlane.xlu1 %1812 }
 0x9eb   :  { %v1814_v61 = vmul.f32 0.03125, %v1813_v0  ;;  %v4168_v0 = vld [vmem:[%s7298_s1 + $0x48] sm:$0xff] }
 0x9ed   :  { %v1815_v52 = vadd.f32 1e-05, %v1814_v61  ;;  %v5297_v61 = vpack.c.bf16 %v4160_v37, %v4158_v50 }
 0x9ef   :  { %5513 = vrsqrt.f32 %v1815_v52  ;;  %v4170_v52 = vld [vmem:[%s7298_s1 + $0x58] sm:$0xff] }
 0x9f9   :  { %v5514_v40 = vpop.eup %5513 }
 0x9fa   :  { %v1817_v46 = vmul.f32 %v5514_v40, %v1809_v41  ;;  %v4167_v40 = vld [vmem:[%s7298_s1 + $0x40] sm:$0xff] }
 0x9fc   :  { %v1824_v12 = vmul.f32 %v4148_v9, %v1817_v46  ;;  %v4169_v9 = vld [vmem:[%s7298_s1 + $0x50] sm:$0xff]  ;;  %v5303_v46 = vpack.c.bf16 %v4170_v52, %v4168_v0 }
 0x9fe   :  { %v1831_v39 = vadd.f32 %v4149_v55, %v1824_v12  ;;  %v5305_v55 = vpack.c.bf16 %v4169_v9, %v4167_v40  ;;  %v4163_v12 = vld [vmem:[%s7297_s8 + $0x68] sm:$0xff] }
 0xa00   :  { %4883 = vmatmul.mubr.msk.f32.vlgmr.msra.gmra.mrb[44].mxu1 %vm222_vm4, %v1831_v39  ;;  %v4165_v39 = vld [vmem:[%s7297_s8 + $0x78] sm:$0xff] }
 0xa01   :  { %4901 = vmatprep.mubr.msk.f32.mxu1 %vm5604_vm5, %v7324_v13  ;;  %5285 = vmatpush3.bf16.msra.mxu1 %v5284_v18  ;;  %v5299_v8 = vpack.c.bf16 %v4165_v39, %v4163_v12  ;;  %v4164_v18 = vld [vmem:[%s7297_s8 + $0x70] sm:$0xff] }
 0xa02   :  { %5286 = vmatprep.subr.bf16.mxu1 %v7333_v45  ;;  %v5301_v2 = vpack.c.bf16 %v4164_v18, %v4162_v23 }
 0xa05   :  { %5288 = vmatpush3.bf16.msra.mxu1 %v5287_v59  ;;  %v4174_v59 = vld [vmem:[%s7298_s1 + $0x78] sm:$0xff] }
 0xa06   :  { %5289 = vmatprep.subr.bf16.mxu1 %v7333_v45 }
 0xa09   :  { %5291 = vmatpush3.bf16.msra.mxu1 %v5290_v3  ;;  %v5307_v3 = vpack.c.bf16 %v4174_v59, %v4172_v54 }
 0xa0a   :  { %5292 = vmatprep.subr.bf16.mxu1 %v7333_v45 }
 0xa0d   :  { %5294 = vmatpush3.bf16.msra.mxu1 %v5293_v15 }
 0xa0e   :  { %5304 = vmatprep.subr.bf16.mxu1 %v5303_v46 }
 0xad3   :  { %v1912_v7 = vpop.f32.mrb[44].mxu1 }
 0xad4   :  { %v1913_v57 = vadd.f32 %v4150_v25, %v1912_v7  ;;  %v4884_v58 = vpop.f32.mrb[45].mxu1 }
 0xad6   :  { %v1918_v6 = vmul.f32 0.70710677, %v1913_v57  ;;  %v1916_v5 = vmul.f32 0.5, %v1913_v57  ;;  %v4156_v57 = vld [vmem:[%s7299_s2 + $0x1] ss:$0 sm:$0xff] }
 0xad8   :  { %5515 = verf.f32 %v1918_v6  ;;  %v4176_v6 = vld [vmem:[%s7216_s9 + $0x20] sm:$0xff] }
 0xae2   :  { %v5516_v16 = vpop.eup %5515 }
 0xae3   :  { %v1920_v35 = vadd.f32 1.0, %v5516_v16  ;;  %v4177_v16 = vld [vmem:[%s7216_s9 + $0x28] sm:$0xff] }
 0xae5   :  { %v1921_v26 = vmul.f32 %v1920_v35, %v1916_v5  ;;  %v4157_v5 = vld [vmem:[%s7300_s21 + $0x1] ss:$0 sm:$0xff] }
 0xae7   :  { %4902 = vmatmul.mubr.msk.f32.vlgmr.msra.gmra.mrb[46].mxu1 %vm1937_vm11, %v1921_v26  ;;  %v5312_v26 = vpack.c.bf16 %v4177_v16, %v4176_v6 }
 0xae8   :  { %2211 = vmatprep.mubr.f32.mxu1 %v7324_v13  ;;  %5306 = vmatpush1.bf16.msra.mxu1 %v5305_v55 }
 0xae9   :  { %5308 = vmatprep.subr.bf16.mxu1 %v5307_v3 }
 0xaec   :  { %5310 = vmatpush1.bf16.msra.mxu1 %v5309_v56 }
 0xbba   :  { %v2007_v17 = vpop.f32.mrb[46].mxu1 }
 0xbbb   :  { %v2008_v62 = vadd.f32 %v4152_v60, %v2007_v17  ;;  %v4903_v43 = vpop.f32.mrb[47].mxu1  ;;  %v4178_v17 = vld [vmem:[%s7216_s9 + $0x30] sm:$0xff] }
 0xbbd   :  { %v6529_v10 = vadd.f32 %v2008_v62, %v6464_v34  ;;  %v4161_v34 = vld [vmem:[%s7297_s8 + $0x58] sm:$0xff] }
 0xbbe   :  { %v5295_v53 = vpack.c.bf16 %v4161_v34, %v4159_v4  ;;  %v4179_v62 = vld [vmem:[%s7216_s9 + $0x38] sm:$0xff] }
 0xbbf   :  { %7335 = vst [vmem:[#allocation12_spill] sm:$0xff] %v6529_v10  ;;  %v2016_v24 = vsel %vm222_vm4, %v6529_v10, 0.0  ;;  %v5315_v43 = vpack.c.bf16 %v4179_v62, %v4178_v17 }
 0xbc0   :  { %2017 = vadd.xlane.f32.xlu0 %v2016_v24  ;;  %5296 = vmatprep.subr.bf16.mxu0 %v5295_v53 }
 0xbc1   :  { %5298 = vmatpush1.bf16.msra.mxu0 %v5297_v61 }
 0xbc2   :  { %5300 = vmatprep.subr.bf16.mxu0 %v5299_v8 }
 0xbc5   :  { %5302 = vmatpush1.bf16.msra.mxu0 %v5301_v2 }
 0xbc6   :  { %5311 = vmatprep.subr.bf16.mxu0 %v7333_v45 }
 0xc4d   :  { %v2018_v41 = vpop.xlane.xlu0 %2017 }
 0xc4e   :  { %v2019_v21 = vmul.f32 0.03125, %v2018_v41 }
 0xc50   :  { %v2020_v19 = vsub.f32 %v6529_v10, %v2019_v21  ;;  %v6884_v10 = vld [vmem:[%s7301_s6 + $0x68] sm:$0xff] }
 0xc51   :  { %7346 = vst [vmem:[#allocation14_spill] sm:$0xff] %v6884_v10 }
 0xc52   :  { %v2021_v32 = vmul.f32 %v2020_v19, %v2020_v19 }
 0xc54   :  { %v2022_v42 = vsel %vm222_vm4, %v2021_v32, 0.0 }
 0xc55   :  { %2023 = vadd.xlane.f32.xlu1 %v2022_v42 }
 0xce2   :  { %v2024_v63 = vpop.xlane.xlu1 %2023 }
 0xce3   :  { %v2025_v15 = vmul.f32 0.03125, %v2024_v63 }
 0xce5   :  { %v2026_v25 = vadd.f32 1e-05, %v2025_v15 }
 0xce7   :  { %5517 = vrsqrt.f32 %v2026_v25 }
 0xcf1   :  { %v5518_v7 = vpop.eup %5517 }
 0xcf2   :  { %v2028_v58 = vmul.f32 %v5518_v7, %v2020_v19 }
 0xcf4   :  { %v2035_v35 = vmul.f32 %v4156_v57, %v2028_v58 }
 0xcf6   :  { %v2042_v60 = vadd.f32 %v4157_v5, %v2035_v35 }
 0xcf8   :  { %4166 = vmatmul.mubr.msk.f32.vlgmr.msra.gmra.mrb[38].mxu0 %vm222_vm4, %v2042_v60  ;;  %4175 = vmatmul.mubr.msk.f32.vlgmr.msra.gmra.mrb[48].mxu1 %vm222_vm4, %v2042_v60 }
 0xcf9   :  { %5313 = vmatpush3.bf16.msra.mxu0 %v5312_v26  ;;  %4912 = vmatprep.mubr.msk.f32.mxu0 %vm5604_vm5, %v7324_v13 }
 0xcfa   :  { %5314 = vmatprep.subr.bf16.mxu0 %v7333_v45 }
 0xcfd   :  { %5316 = vmatpush3.bf16.msra.mxu0 %v5315_v43 }
 0xd00   :  { %4913 = vmatmul.mubr.msk.f32.vlgmr.msra.gmra.mrb[40].mxu0 %vm222_vm4, %v2042_v60 }
 0xdcb   :  { %v6608_v24 = vpop.f32.mrb[38].mxu0  ;;  %v2213_v41 = vpop.f32.mrb[48].mxu1 }
 0xdcc   :  { %v6610_v21 = vpop.f32.mrb[39].mxu0  ;;  %v2215_v19 = vpop.f32.mrb[49].mxu1  ;;  %v2222_v32 = vmin.f32 %v2213_v41, 0.0  ;;  %v2220_v37 = vadd.f32 1.0, %v2213_v41  ;;  %vm2218_vm12 = vcmp.gt.f32.partialorder %v2213_v41, 0.0  ;;  %vm2126_vm15 = vcmp.gt.f32.partialorder %v6608_v24, 0.0 }
 0xdcd   :  { %v2223_v4 = vmin.f32 %v2215_v19, 0.0  ;;  %v2221_v61 = vadd.f32 1.0, %v2215_v19  ;;  %vm2219_vm13 = vcmp.gt.f32.partialorder %v2215_v19, 0.0  ;;  %v2131_v17 = vmin.f32 %v6610_v21, 0.0 }
 0xdce   :  { %v2224_v42 = vmul.f32 1.442695, %v2222_v32  ;;  %v2130_v32 = vmin.f32 %v6608_v24, 0.0  ;;  %vm2127_vm14 = vcmp.gt.f32.partialorder %v6610_v21, 0.0 }
 0xdcf   :  { %v2226_v34 = vmul.f32 1.442695, %v2223_v4 }
 0xdd0   :  { %5519 = vpow2.f32 %v2224_v42  ;;  %v2134_v42 = vmul.f32 1.442695, %v2131_v17 }
 0xdd1   :  { %5521 = vpow2.f32 %v2226_v34 }
 0xdd2   :  { %5523 = vpow2.f32 %v2134_v42 }
 0xdd3   :  { %v6612_v53 = vpop.f32.mrb[40].mxu0 }
 0xdd4   :  { %v4914_v50 = vpop.f32.mrb[41].mxu0  ;;  %4915 = vmatprep.subr.msk.mxu0 %vm146_vm1, %v6612_v53  ;;  %5485 = vmatprep.subr.msk.mxu1 %vm146_vm1, %v6612_v53  ;;  %v6670_v16 = vrot.slane %v6612_v53, 4 }
 0xdd5   :  { %4916 = vmatpush3.msk.msra.mxu0 %vm146_vm1, %v6612_v53  ;;  %5486 = vmatpush3.msk.msra.mxu1 %vm146_vm1, %v6612_v53 }
 0xdd6   :  { %5350 = vmatprep.subr.bf16.mxu1 %v5961_v1 }
 0xdda   :  { %v5520_v0 = vpop.eup %5519 }
 0xddb   :  { %v6623_v52 = vsel %vm2218_vm12, %v2220_v37, %v5520_v0  ;;  %v5522_v40 = vpop.eup %5521  ;;  %v2132_v37 = vmul.f32 1.442695, %v2130_v32 }
 0xddc   :  { %2305 = vxpose.xlu1.b32.start.end [1/1] (short) %v6623_v52, 128  ;;  %v6626_v9 = vsel %vm2219_vm13, %v2221_v61, %v5522_v40  ;;  %v7266_v46 = vrot.slane %v6623_v52, 4  ;;  %v2795_v35 = vsel %vm146_vm1, %v6623_v52, 0.0 }
 0xddd   :  { %2337 = vxpose.xlu0.b32.start.end [1/1] (short) %v6626_v9, 128  ;;  %v7267_v55 = vrot.slane %v6626_v9, 4  ;;  %v2802_v6 = vsel %vm146_vm1, %v6626_v9, 0.0  ;;  %v2796_v43 = vrot.slane %v2795_v35, 4  ;;  %5525 = vpow2.f32 %v2132_v37 }
 0xdde   :  { %v2803_v26 = vrot.slane %v2802_v6, 4 }
 0xddf   :  { %v2797_v34 = vadd.f32 %v2796_v43, %v2795_v35 }
 0xde0   :  { %v2804_v41 = vadd.f32 %v2803_v26, %v2802_v6 }
 0xde1   :  { %v2798_v61 = vrot.slane %v2797_v34, 2 }
 0xde2   :  { %v2805_v53 = vrot.slane %v2804_v41, 2 }
 0xe19   :  { %2889 = vxpose.xlu1.b32.start.end [1/1] (short) %v7266_v46, 128 }
 0xe1a   :  { %2921 = vxpose.xlu0.b32.start.end [1/1] (short) %v7267_v55, 128 }
 0xe5c   :  { %v2321_v12 = vpop.trf.xlu1 }
 0xe5d   :  { %4917 = vmatprep.mubr.msk.f32.mxu0 %vm603_vm8, %v2321_v12  ;;  %v2353_v39 = vpop.trf.xlu0  ;;  %v2806_v12 = vadd.f32 %v2805_v53, %v2804_v41 }
 0xe5e   :  { %4941 = vmatprep.mubr.msk.f32.mxu1 %vm603_vm8, %v2353_v39 }
 0xe60   :  { %v2322_v8 = vpop.trf.xlu1 }
 0xe61   :  { %4918 = vmatmul.mubr.msk.f32.vlgmr.msra.gmra.mrb[42].mxu0 %vm603_vm8, %v2322_v8  ;;  %v2354_v23 = vpop.trf.xlu0  ;;  %v2799_v8 = vadd.f32 %v2798_v61, %v2797_v34  ;;  %v6726_v61 = vld [vmem:[%s7301_s6 + $0x8] sm:$0xff] }
 0xe62   :  { %4942 = vmatmul.mubr.msk.f32.vlgmr.msra.gmra.mrb[50].mxu1 %vm603_vm8, %v2354_v23 }
 0xe63   :  { %5352 = vmatpush3.bf16.msra.mxu1 %v5994_v11 }
 0xe64   :  { %v2323_v18 = vpop.trf.xlu1  ;;  %5354 = vmatprep.subr.bf16.mxu1 %v5998_v14 }
 0xe65   :  { %4920 = vmatprep.mubr.msk.f32.mxu0 %vm603_vm8, %v2323_v18  ;;  %v2355_v54 = vpop.trf.xlu0  ;;  %v2807_v18 = vrot.slane %v2806_v12, 1 }
 0xe66   :  { %4944 = vmatprep.mubr.msk.f32.mxu1 %vm603_vm8, %v2355_v54 }
 0xe67   :  { %5356 = vmatpush3.bf16.msra.mxu1 %v6025_v20 }
 0xe68   :  { %v2324_v2 = vpop.trf.xlu1  ;;  %5358 = vmatprep.subr.bf16.mxu1 %v6030_v22 }
 0xe69   :  { %4921 = vmatmul.mubr.msk.f32.gmra.mrb[44].mxu0 %vm603_vm8, %v2324_v2  ;;  %v2356_v59 = vpop.trf.xlu0  ;;  %v2800_v2 = vrot.slane %v2799_v8, 1 }
 0xe6a   :  { %4945 = vmatmul.mubr.msk.f32.gmra.mrb[52].mxu1 %vm603_vm8, %v2356_v59  ;;  %v5524_v59 = vpop.eup %5523 }
 0xe6b   :  { %5360 = vmatpush3.bf16.msra.mxu1 %v6057_v28 }
 0xe6c   :  { %v2325_v33 = vpop.trf.xlu1  ;;  %5362 = vmatprep.subr.bf16.mxu1 %v6062_v30 }
 0xe6d   :  { %4923 = vmatprep.mubr.msk.f32.mxu0 %vm603_vm8, %v2325_v33  ;;  %v2357_v29 = vpop.trf.xlu0 }
 0xe6e   :  { %4947 = vmatprep.mubr.msk.f32.mxu1 %vm603_vm8, %v2357_v29  ;;  %v2808_v29 = vadd.f32 %v2807_v18, %v2806_v12  ;;  %v6738_v18 = vld [vmem:[%s7301_s6 + $0x88] sm:$0xff] }
 0xe6f   :  { %5364 = vmatpush3.bf16.msra.mxu1 %v6089_v36 }
 0xe70   :  { %v2326_v3 = vpop.trf.xlu1  ;;  %5366 = vmatprep.subr.bf16.mxu1 %v6094_v38 }
 0xe71   :  { %4924 = vmatmul.mubr.msk.f32.gmra.mrb[46].mxu0 %vm603_vm8, %v2326_v3  ;;  %v2358_v56 = vpop.trf.xlu0  ;;  %v2129_v3 = vadd.f32 1.0, %v6610_v21 }
 0xe72   :  { %4948 = vmatmul.mubr.msk.f32.gmra.mrb[54].mxu1 %vm603_vm8, %v2358_v56 }
 0xe73   :  { %5368 = vmatpush3.bf16.msra.mxu1 %v6121_v44 }
 0xe74   :  { %v2327_v63 = vpop.trf.xlu1  ;;  %5370 = vmatprep.subr.bf16.mxu1 %v7318_v31 }
 0xe75   :  { %4926 = vmatprep.mubr.msk.f32.mxu0 %vm603_vm8, %v2327_v63  ;;  %v2359_v15 = vpop.trf.xlu0  ;;  %v5526_v63 = vpop.eup %5525 }
 0xe76   :  { %4950 = vmatprep.mubr.msk.f32.mxu1 %vm603_vm8, %v2359_v15  ;;  %v2801_v15 = vadd.f32 %v2800_v2, %v2799_v8  ;;  %v6732_v8 = vld [vmem:[%s7301_s6] sm:$0xff] }
 0xe77   :  { %5372 = vmatpush3.bf16.msra.mxu1 %v7319_v49 }
 0xe78   :  { %v2328_v25 = vpop.trf.xlu1  ;;  %5374 = vmatprep.subr.bf16.mxu1 %v7320_v47 }
 0xe79   :  { %4927 = vmatmul.mubr.msk.f32.gmra.mrb[48].mxu0 %vm603_vm8, %v2328_v25  ;;  %v2360_v7 = vpop.trf.xlu0  ;;  %v6694_v25 = vsel %vm2127_vm14, %v2129_v3, %v5524_v59 }
 0xe7a   :  { %4951 = vmatmul.mubr.msk.f32.gmra.mrb[56].mxu1 %vm603_vm8, %v2360_v7  ;;  %v2128_v7 = vadd.f32 1.0, %v6608_v24  ;;  %v3312_v37 = vrot.slane %v6694_v25, 4 }
 0xe7b   :  { %5376 = vmatpush3.bf16.msra.mxu1 %v7321_v27 }
 0xe7c   :  { %v2329_v57 = vpop.trf.xlu1  ;;  %5378 = vmatprep.subr.bf16.mxu1 %v7322_v48  ;;  %v6701_v6 = vsel %vm2126_vm15, %v2128_v7, %v5526_v63 }
 0xe7d   :  { %4929 = vmatprep.mubr.msk.f32.mxu0 %vm603_vm8, %v2329_v57  ;;  %v2361_v58 = vpop.trf.xlu0  ;;  %v2809_v21 = vmul.f32 %v2801_v15, %v6701_v6  ;;  %v6752_v15 = vld [vmem:[%s7301_s6 + $0x18] sm:$0xff] }
 0xe7e   :  { %4953 = vmatprep.mubr.msk.f32.mxu1 %vm603_vm8, %v2361_v58  ;;  %v2810_v58 = vmul.f32 %v2808_v29, %v6694_v25  ;;  %7336 = vst [vmem:[#allocation15_spill] sm:$0xff] %v6752_v15 }
 0xe7f   :  { %5380 = vmatpush3.bf16.msra.mxu1 %v7323_v51 }
 0xe80   :  { %v2330_v5 = vpop.trf.xlu1  ;;  %5487 = vmatprep.subr.msk.mxu1 %vm146_vm1, %v6670_v16 }
 0xe81   :  { %4930 = vmatmul.mubr.msk.f32.gmra.mrb[50].mxu0 %vm603_vm8, %v2330_v5  ;;  %v2362_v60 = vpop.trf.xlu0 }
 0xe82   :  { %4954 = vmatmul.mubr.msk.f32.gmra.mrb[58].mxu1 %vm603_vm8, %v2362_v60 }
 0xe84   :  { %v2331_v62 = vpop.trf.xlu1 }
 0xe85   :  { %4932 = vmatprep.mubr.msk.f32.mxu0 %vm603_vm8, %v2331_v62  ;;  %v2363_v19 = vpop.trf.xlu0 }
 0xe86   :  { %4956 = vmatprep.mubr.msk.f32.mxu1 %vm603_vm8, %v2363_v19 }
 0xe88   :  { %v2332_v4 = vpop.trf.xlu1 }
 0xe89   :  { %4933 = vmatmul.mubr.msk.f32.gmra.mrb[52].mxu0 %vm603_vm8, %v2332_v4  ;;  %v2364_v50 = vpop.trf.xlu0 }
 0xe8a   :  { %4957 = vmatmul.mubr.msk.f32.gmra.mrb[60].mxu1 %vm603_vm8, %v2364_v50 }
 0xe8c   :  { %v2333_v0 = vpop.trf.xlu1 }
 0xe8d   :  { %4935 = vmatprep.mubr.msk.f32.mxu0 %vm603_vm8, %v2333_v0  ;;  %v2365_v40 = vpop.trf.xlu0 }
 0xe8e   :  { %4959 = vmatprep.mubr.msk.f32.mxu1 %vm603_vm8, %v2365_v40 }
 0xe90   :  { %v2334_v39 = vpop.trf.xlu1 }
 0xe91   :  { %4936 = vmatmul.mubr.msk.f32.gmra.mrb[54].mxu0 %vm603_vm8, %v2334_v39  ;;  %v2366_v23 = vpop.trf.xlu0 }
 0xe92   :  { %4960 = vmatmul.mubr.msk.f32.gmra.mrb[62].mxu1 %vm603_vm8, %v2366_v23 }
 0xe94   :  { %v2335_v54 = vpop.trf.xlu1 }
 0xe95   :  { %4938 = vmatprep.mubr.msk.f32.mxu0 %vm603_vm8, %v2335_v54  ;;  %v2367_v33 = vpop.trf.xlu0 }
 0xe96   :  { %4962 = vmatprep.mubr.msk.f32.mxu1 %vm603_vm8, %v2367_v33  ;;  %v6744_v33 = vld [vmem:[%s7301_s6 + $0x80] sm:$0xff] }
 0xe98   :  { %v2336_v56 = vpop.trf.xlu1 }
 0xe99   :  { %4939 = vmatmul.mubr.msk.f32.gmra.mrb[56].mxu0 %vm603_vm8, %v2336_v56  ;;  %v2368_v57 = vpop.trf.xlu0 }
 0xe9a   :  { %2789 = vmatprep.mubr.f32.mxu0 %v6694_v25  ;;  %4963 = vmatmul.mubr.msk.f32.gmra.mrb[64].mxu1 %vm603_vm8, %v2368_v57 }
 0xe9b   :  { %2875 = vmatprep.mubr.f32.mxu1 %v2810_v58 }
 0xe9c   :  { %v6747_v56 = vpop.trf.xlu1 }
 0xe9d   :  { %v2937_v5 = vpop.trf.xlu0 }
 0xe9e   :  { %2876 = vmatmul.mubr.f32.vlgmr.msra.gmra.mrb[66].mxu1 %v2809_v21  ;;  %v6758_v21 = vld [vmem:[%s7301_s6 + $0x10] sm:$0xff] }
 0xe9f   :  { %5488 = vmatpush3.msk.msra.mxu1 %vm146_vm1, %v6670_v16  ;;  %4991 = vmatprep.mubr.msk.f32.mxu1 %vm603_vm8, %v2937_v5  ;;  %7337 = vst [vmem:[#allocation16_spill] sm:$0xff] %v6758_v21 }
 0xea1   :  { %v2938_v35 = vpop.trf.xlu0 }
 0xea2   :  { %4992 = vmatmul.mubr.msk.f32.vlgmr.msra.gmra.mrb[68].mxu1 %vm603_vm8, %v2938_v35  ;;  %v6764_v35 = vld [vmem:[%s7301_s6 + $0x98] sm:$0xff] }
 0xea5   :  { %v2939_v26 = vpop.trf.xlu0 }
 0xea6   :  { %4994 = vmatprep.mubr.msk.f32.mxu1 %vm603_vm8, %v2939_v26 }
 0xea9   :  { %v2940_v24 = vpop.trf.xlu0 }
 0xeaa   :  { %4995 = vmatmul.mubr.msk.f32.gmra.mrb[70].mxu1 %vm603_vm8, %v2940_v24 }
 0xead   :  { %v2941_v60 = vpop.trf.xlu0 }
 0xeae   :  { %4997 = vmatprep.mubr.msk.f32.mxu1 %vm603_vm8, %v2941_v60 }
 0xeb1   :  { %v2942_v17 = vpop.trf.xlu0 }
 0xeb2   :  { %4998 = vmatmul.mubr.msk.f32.gmra.mrb[72].mxu1 %vm603_vm8, %v2942_v17  ;;  %v6770_v17 = vld [vmem:[%s7301_s6 + $0x90] sm:$0xff] }
 0xeb5   :  { %v2943_v62 = vpop.trf.xlu0 }
 0xeb6   :  { %5000 = vmatprep.mubr.msk.f32.mxu1 %vm603_vm8, %v2943_v62 }
 0xeb9   :  { %v2944_v43 = vpop.trf.xlu0 }
 0xeba   :  { %5001 = vmatmul.mubr.msk.f32.gmra.mrb[74].mxu1 %vm603_vm8, %v2944_v43  ;;  %v6773_v43 = vpop.trf.xlu1 }
 0xebd   :  { %v2945_v41 = vpop.trf.xlu0 }
 0xebe   :  { %5003 = vmatprep.mubr.msk.f32.mxu1 %vm603_vm8, %v2945_v41 }
 0xec1   :  { %v2946_v19 = vpop.trf.xlu0 }
 0xec2   :  { %5004 = vmatmul.mubr.msk.f32.gmra.mrb[76].mxu1 %vm603_vm8, %v2946_v19 }
 0xec5   :  { %v2947_v32 = vpop.trf.xlu0 }
 0xec6   :  { %5006 = vmatprep.mubr.msk.f32.mxu1 %vm603_vm8, %v2947_v32  ;;  %v6778_v32 = vld [vmem:[%s7301_s6 + $0x28] sm:$0xff] }
 0xec7   :  { %7338 = vst [vmem:[#allocation18_spill] sm:$0xff] %v6778_v32 }
 0xec9   :  { %v2948_v42 = vpop.trf.xlu0 }
 0xeca   :  { %5007 = vmatmul.mubr.msk.f32.gmra.mrb[78].mxu1 %vm603_vm8, %v2948_v42 }
 0xecd   :  { %v2949_v4 = vpop.trf.xlu0 }
 0xece   :  { %5009 = vmatprep.mubr.msk.f32.mxu1 %vm603_vm8, %v2949_v4 }
 0xed1   :  { %v2950_v34 = vpop.trf.xlu0 }
 0xed2   :  { %5010 = vmatmul.mubr.msk.f32.gmra.mrb[80].mxu1 %vm603_vm8, %v2950_v34 }
 0xed5   :  { %v2951_v53 = vpop.trf.xlu0 }
 0xed6   :  { %5012 = vmatprep.mubr.msk.f32.mxu1 %vm603_vm8, %v2951_v53  ;;  %v6784_v53 = vld [vmem:[%s7301_s6 + $0x20] sm:$0xff] }
 0xed7   :  { %7339 = vst [vmem:[#allocation19_spill] sm:$0xff] %v6784_v53 }
 0xed9   :  { %v2952_v50 = vpop.trf.xlu0 }
 0xeda   :  { %5013 = vmatmul.mubr.msk.f32.gmra.mrb[82].mxu1 %vm603_vm8, %v2952_v50 }
 0xedb   :  { %3379 = vmatprep.mubr.f32.mxu1 %v3312_v37  ;;  %v6790_v37 = vld [vmem:[%s7301_s6 + $0xa8] sm:$0xff] }
 0xf34   :  { %v4919_v0 = vpop.f32.mrb[42].mxu0 }
 0xf35   :  { %v2694_v40 = vmul.f32 %v6726_v61, %v4919_v0  ;;  %v2534_v12 = vpop.f32.mrb[43].mxu0  ;;  %v4943_v39 = vpop.f32.mrb[50].mxu1 }
 0xf36   :  { %v2693_v23 = vmul.f32 %v6732_v8, %v2534_v12  ;;  %v2710_v54 = vmul.f32 %v6738_v18, %v4943_v39  ;;  %v2614_v2 = vpop.f32.mrb[51].mxu1  ;;  %v6793_v12 = vpop.trf.xlu1 }
 0xf37   :  { %v2709_v29 = vmul.f32 %v6744_v33, %v2614_v2 }
 0xf38   :  { %v5319_v59 = vpack.c.bf16 %v2694_v40, %v2693_v23  ;;  %v6798_v23 = vld [vmem:[%s7301_s6 + $0xa0] sm:$0xff] }
 0xf39   :  { %v5317_v3 = vpack.c.bf16 %v2710_v54, %v2709_v29  ;;  %v6804_v29 = vld [vmem:[%s7301_s6 + $0x38] sm:$0xff] }
 0xf3a   :  { %7340 = vst [vmem:[#allocation20_spill] sm:$0xff] %v6804_v29 }
 0xf3b   :  { %5318 = vmatprep.subr.bf16.mxu0 %v5317_v3 }
 0xf3c   :  { %v4922_v63 = vpop.f32.mrb[44].mxu0  ;;  %5320 = vmatpush3.bf16.msra.mxu0 %v5319_v59 }
 0xf3d   :  { %v2696_v7 = vmul.f32 %v6752_v15, %v4922_v63  ;;  %v2544_v57 = vpop.f32.mrb[45].mxu0  ;;  %v4946_v58 = vpop.f32.mrb[52].mxu1  ;;  %v7350_v15 = vrot.slane %v6626_v9, 4 }
 0xf3e   :  { %v2695_v5 = vmul.f32 %v6758_v21, %v2544_v57  ;;  %v2712_v26 = vmul.f32 %v6764_v35, %v4946_v58  ;;  %v2624_v24 = vpop.f32.mrb[53].mxu1  ;;  %v6812_v58 = vld [vmem:[%s7301_s6 + $0x30] sm:$0xff] }
 0xf3f   :  { %v2711_v62 = vmul.f32 %v6770_v17, %v2624_v24  ;;  %7341 = vst [vmem:[#allocation7_spill] sm:$0xff] %v6812_v58 }
 0xf40   :  { %v5323_v60 = vpack.c.bf16 %v2696_v7, %v2695_v5  ;;  %v6807_v7 = vpop.trf.xlu1 }
 0xf41   :  { %v5321_v41 = vpack.c.bf16 %v2712_v26, %v2711_v62  ;;  %v6818_v26 = vld [vmem:[%s7301_s6 + $0xb8] sm:$0xff] }
 0xf43   :  { %5322 = vmatprep.subr.bf16.mxu0 %v5321_v41  ;;  %v6824_v41 = vld [vmem:[%s7301_s6 + $0xb0] sm:$0xff] }
 0xf44   :  { %v4925_v19 = vpop.f32.mrb[46].mxu0  ;;  %5324 = vmatpush3.bf16.msra.mxu0 %v5323_v60 }
 0xf45   :  { %v2698_v42 = vmul.f32 %v6778_v32, %v4925_v19  ;;  %v2554_v4 = vpop.f32.mrb[47].mxu0  ;;  %v4949_v34 = vpop.f32.mrb[54].mxu1 }
 0xf46   :  { %v2697_v50 = vmul.f32 %v6784_v53, %v2554_v4  ;;  %v2714_v0 = vmul.f32 %v6790_v37, %v4949_v34  ;;  %v2634_v40 = vpop.f32.mrb[55].mxu1  ;;  %v6827_v4 = vpop.trf.xlu1 }
 0xf47   :  { %v2713_v54 = vmul.f32 %v6798_v23, %v2634_v40 }
 0xf48   :  { %v5327_v39 = vpack.c.bf16 %v2698_v42, %v2697_v50  ;;  %v6832_v50 = vld [vmem:[%s7301_s6 + $0x48] sm:$0xff] }
 0xf49   :  { %v5325_v2 = vpack.c.bf16 %v2714_v0, %v2713_v54  ;;  %7342 = vst [vmem:[#allocation9_spill] sm:$0xff] %v6832_v50  ;;  %v6838_v54 = vld [vmem:[%s7301_s6 + $0x40] sm:$0xff] }
 0xf4a   :  { %7343 = vst [vmem:[#allocation8_spill] sm:$0xff] %v6838_v54 }
 0xf4b   :  { %5326 = vmatprep.subr.bf16.mxu0 %v5325_v2 }
 0xf4c   :  { %v4928_v59 = vpop.f32.mrb[48].mxu0  ;;  %5328 = vmatpush3.bf16.msra.mxu0 %v5327_v39 }
 0xf4d   :  { %v2700_v3 = vmul.f32 %v6804_v29, %v4928_v59  ;;  %v2564_v63 = vpop.f32.mrb[49].mxu0  ;;  %v4952_v57 = vpop.f32.mrb[56].mxu1  ;;  %v6844_v59 = vld [vmem:[%s7301_s6 + $0xc8] sm:$0xff] }
 0xf4e   :  { %v2699_v5 = vmul.f32 %v6812_v58, %v2564_v63  ;;  %v2716_v24 = vmul.f32 %v6818_v26, %v4952_v57  ;;  %v2644_v60 = vpop.f32.mrb[57].mxu1  ;;  %v6918_v58 = vld [vmem:[%s7301_s6 + $0x70] sm:$0xff] }
 0xf4f   :  { %v2715_v19 = vmul.f32 %v6824_v41, %v2644_v60  ;;  %v6853_v60 = vpop.trf.xlu1  ;;  %7349 = vst [vmem:[#allocation6_spill] sm:$0xff] %v6918_v58 }
 0xf50   :  { %v5331_v62 = vpack.c.bf16 %v2700_v3, %v2699_v5  ;;  %v6850_v5 = vld [vmem:[%s7301_s6 + $0xc0] sm:$0xff] }
 0xf51   :  { %v5329_v42 = vpack.c.bf16 %v2716_v24, %v2715_v19 }
 0xf53   :  { %5330 = vmatprep.subr.bf16.mxu0 %v5329_v42  ;;  %v6858_v42 = vld [vmem:[%s7301_s6 + $0x58] sm:$0xff] }
 0xf54   :  { %v4931_v34 = vpop.f32.mrb[50].mxu0  ;;  %5332 = vmatpush3.bf16.msra.mxu0 %v5331_v62  ;;  %7344 = vst [vmem:[#allocation10_spill] sm:$0xff] %v6858_v42 }
 0xf55   :  { %v2702_v0 = vmul.f32 %v6832_v50, %v4931_v34  ;;  %v2574_v40 = vpop.f32.mrb[51].mxu0  ;;  %v4955_v39 = vpop.f32.mrb[58].mxu1 }
 0xf56   :  { %v2701_v2 = vmul.f32 %v6838_v54, %v2574_v40  ;;  %v2718_v3 = vmul.f32 %v6844_v59, %v4955_v39  ;;  %v2654_v63 = vpop.f32.mrb[59].mxu1  ;;  %v6864_v39 = vld [vmem:[%s7301_s6 + $0x50] sm:$0xff] }
 0xf57   :  { %v2717_v24 = vmul.f32 %v6850_v5, %v2654_v63  ;;  %7345 = vst [vmem:[#allocation11_spill] sm:$0xff] %v6864_v39 }
 0xf58   :  { %v5335_v57 = vpack.c.bf16 %v2702_v0, %v2701_v2 }
 0xf59   :  { %v5333_v62 = vpack.c.bf16 %v2718_v3, %v2717_v24  ;;  %v6870_v3 = vld [vmem:[%s7301_s6 + $0xd8] sm:$0xff]  ;;  %v6873_v24 = vpop.trf.xlu1 }
 0xf5b   :  { %5334 = vmatprep.subr.bf16.mxu0 %v5333_v62 }
 0xf5c   :  { %v4934_v19 = vpop.f32.mrb[52].mxu0  ;;  %5336 = vmatpush3.bf16.msra.mxu0 %v5335_v57 }
 0xf5d   :  { %v2704_v34 = vmul.f32 %v6858_v42, %v4934_v19  ;;  %v2584_v0 = vpop.f32.mrb[53].mxu0  ;;  %v4958_v40 = vpop.f32.mrb[60].mxu1  ;;  %v6878_v19 = vld [vmem:[%s7301_s6 + $0xd0] sm:$0xff]  ;;  %v6892_v42 = vld [vmem:[%s7301_s6 + $0x60] sm:$0xff] }
 0xf5e   :  { %v2703_v2 = vmul.f32 %v6864_v39, %v2584_v0  ;;  %v2720_v63 = vmul.f32 %v6870_v3, %v4958_v40  ;;  %v2664_v57 = vpop.f32.mrb[61].mxu1  ;;  %7347 = vst [vmem:[#allocation13_spill] sm:$0xff] %v6892_v42 }
 0xf5f   :  { %v2719_v46 = vmul.f32 %v6878_v19, %v2664_v57 }
 0xf60   :  { %v5339_v62 = vpack.c.bf16 %v2704_v34, %v2703_v2  ;;  %v6887_v34 = vpop.trf.xlu1 }
 0xf61   :  { %v5337_v55 = vpack.c.bf16 %v2720_v63, %v2719_v46 }
 0xf63   :  { %5338 = vmatprep.subr.bf16.mxu0 %v5337_v55  ;;  %v6898_v55 = vld [vmem:[%s7301_s6 + $0xe8] sm:$0xff] }
 0xf64   :  { %v4937_v0 = vpop.f32.mrb[54].mxu0  ;;  %5340 = vmatpush3.bf16.msra.mxu0 %v5339_v62  ;;  %v6907_v50 = vpop.trf.xlu1 }
 0xf65   :  { %v2706_v40 = vmul.f32 %v6884_v10, %v4937_v0  ;;  %v2594_v39 = vpop.f32.mrb[55].mxu0  ;;  %v4961_v2 = vpop.f32.mrb[62].mxu1  ;;  %v6904_v0 = vld [vmem:[%s7301_s6 + $0xe0] sm:$0xff] }
 0xf66   :  { %v2705_v46 = vmul.f32 %v6892_v42, %v2594_v39  ;;  %v2722_v63 = vmul.f32 %v6898_v55, %v4961_v2  ;;  %v2674_v57 = vpop.f32.mrb[63].mxu1  ;;  %v6912_v42 = vld [vmem:[%s7301_s6 + $0x78] sm:$0xff] }
 0xf67   :  { %v2721_v10 = vmul.f32 %v6904_v0, %v2674_v57  ;;  %7348 = vst [vmem:[#allocation17_spill] sm:$0xff] %v6912_v42 }
 0xf68   :  { %v5343_v62 = vpack.c.bf16 %v2706_v40, %v2705_v46  ;;  %v2914_v29 = vpop.trf.xlu1 }
 0xf69   :  { %v5341_v54 = vpack.c.bf16 %v2722_v63, %v2721_v10 }
 0xf6b   :  { %5342 = vmatprep.subr.bf16.mxu0 %v5341_v54  ;;  %v6924_v54 = vld [vmem:[%s7301_s6 + $0xf8] sm:$0xff] }
 0xf6c   :  { %v4940_v39 = vpop.f32.mrb[56].mxu0  ;;  %5344 = vmatpush3.bf16.msra.mxu0 %v5343_v62 }
 0xf6d   :  { %v2708_v40 = vmul.f32 %v6912_v42, %v4940_v39  ;;  %v2604_v2 = vpop.f32.mrb[57].mxu0  ;;  %v4964_v46 = vpop.f32.mrb[64].mxu1  ;;  %v6930_v39 = vld [vmem:[%s7301_s6 + $0xf0] sm:$0xff] }
 0xf6e   :  { %v2707_v10 = vmul.f32 %v6918_v58, %v2604_v2  ;;  %v2724_v63 = vmul.f32 %v6924_v54, %v4964_v46  ;;  %v2684_v57 = vpop.f32.mrb[65].mxu1 }
 0xf6f   :  { %v2723_v42 = vmul.f32 %v6930_v39, %v2684_v57  ;;  %v3392_v57 = vsel %vm146_vm1, %v7350_v15, 0.0 }
 0xf70   :  { %v5347_v62 = vpack.c.bf16 %v2708_v40, %v2707_v10  ;;  %v2915_v40 = vpop.trf.xlu1  ;;  %v3393_v9 = vrot.slane %v3392_v57, 4 }
 0xf71   :  { %v5345_v53 = vpack.c.bf16 %v2724_v63, %v2723_v42  ;;  %v4617_v32 = vpop.f32.mrb[66].mxu1 }
 0xf72   :  { %v4618_v2 = vpop.f32.mrb[67].mxu1 }
 0xf73   :  { %v6933_v58 = vadd.f32 %v4618_v2, %v4617_v32  ;;  %5346 = vmatprep.subr.bf16.mxu0 %v5345_v53 }
 0xf74   :  { %5348 = vmatpush3.bf16.msra.mxu0 %v5347_v62 }
 0xf75   :  { %4965 = vmatprep.subr.msk.mxu0 %vm146_vm1, %v6670_v16  ;;  %v4993_v46 = vpop.f32.mrb[68].mxu1  ;;  %5527 = vrcp.f32 %v6933_v58 }
 0xf76   :  { %v3294_v10 = vmul.f32 %v6738_v18, %v4993_v46  ;;  %v3198_v21 = vpop.f32.mrb[69].mxu1  ;;  %v7351_v18 = vrot.slane %v6623_v52, 4 }
 0xf77   :  { %2790 = vmatmul.mubr.f32.vlgmr.msra.gmra.mrb[58].mxu0 %v6701_v6  ;;  %v3293_v42 = vmul.f32 %v6744_v33, %v3198_v21 }
 0xf78   :  { %4966 = vmatpush3.msk.msra.mxu0 %vm146_vm1, %v6670_v16  ;;  %4967 = vmatprep.mubr.msk.f32.mxu0 %vm603_vm8, %v6747_v56  ;;  %v3385_v53 = vsel %vm146_vm1, %v7351_v18, 0.0  ;;  %v2916_v16 = vpop.trf.xlu1  ;;  %v3394_v56 = vadd.f32 %v3393_v9, %v3392_v57 }
 0xf79   :  { %5414 = vmatprep.subr.bf16.mxu0 %v5961_v1  ;;  %v5381_v32 = vpack.c.bf16 %v3294_v10, %v3293_v42  ;;  %v3386_v33 = vrot.slane %v3385_v53, 4 }
 0xf7b   :  { %4968 = vmatmul.mubr.msk.f32.vlgmr.msra.gmra.mrb[60].mxu0 %vm603_vm8, %v6773_v43  ;;  %5382 = vmatprep.subr.bf16.mxu1 %v5381_v32 }
 0xf7c   :  { %4970 = vmatprep.mubr.msk.f32.mxu0 %vm603_vm8, %v6793_v12  ;;  %5416 = vmatpush3.bf16.msra.mxu0 %v5994_v11  ;;  %v3387_v11 = vadd.f32 %v3386_v33, %v3385_v53  ;;  %v2917_v43 = vpop.trf.xlu1 }
 0xf7d   :  { %5418 = vmatprep.subr.bf16.mxu0 %v5998_v14  ;;  %v4996_v1 = vpop.f32.mrb[70].mxu1 }
 0xf7e   :  { %v6958_v52 = vmul.f32 %v6764_v35, %v4996_v1  ;;  %v3208_v15 = vpop.f32.mrb[71].mxu1  ;;  %v3395_v35 = vrot.slane %v3394_v56, 2 }
 0xf7f   :  { %4971 = vmatmul.mubr.msk.f32.gmra.mrb[62].mxu0 %vm603_vm8, %v6807_v7  ;;  %v6963_v21 = vmul.f32 %v6770_v17, %v3208_v15  ;;  %v3388_v17 = vrot.slane %v3387_v11, 2  ;;  %v5528_v15 = vpop.eup %5527 }
 0xf80   :  { %4973 = vmatprep.mubr.msk.f32.mxu0 %vm603_vm8, %v6827_v4  ;;  %5420 = vmatpush3.bf16.msra.mxu0 %v6025_v20  ;;  %v3396_v12 = vadd.f32 %v3395_v35, %v3394_v56 }
 0xf81   :  { %5422 = vmatprep.subr.bf16.mxu0 %v6030_v22  ;;  %v5385_v14 = vpack.c.bf16 %v6958_v52, %v6963_v21 }
 0xf83   :  { %4974 = vmatmul.mubr.msk.f32.gmra.mrb[64].mxu0 %vm603_vm8, %v6853_v60  ;;  %v3389_v60 = vadd.f32 %v3388_v17, %v3387_v11 }
 0xf84   :  { %4976 = vmatprep.mubr.msk.f32.mxu0 %vm603_vm8, %v6873_v24  ;;  %5424 = vmatpush3.bf16.msra.mxu0 %v6057_v28  ;;  %v2918_v28 = vpop.trf.xlu1 }
 0xf85   :  { %5426 = vmatprep.subr.bf16.mxu0 %v6062_v30  ;;  %v4999_v20 = vpop.f32.mrb[72].mxu1 }
 0xf86   :  { %v6978_v22 = vmul.f32 %v6790_v37, %v4999_v20  ;;  %v3218_v7 = vpop.f32.mrb[73].mxu1  ;;  %v3397_v37 = vrot.slane %v3396_v12, 1  ;;  %v7352_v20 = vld [vmem:[#allocation15_spill] sm:$0xff] }
 0xf87   :  { %4977 = vmatmul.mubr.msk.f32.gmra.mrb[66].mxu0 %vm603_vm8, %v6887_v34  ;;  %v6983_v4 = vmul.f32 %v6798_v23, %v3218_v7  ;;  %v3390_v23 = vrot.slane %v3389_v60, 1  ;;  %v7353_v7 = vld [vmem:[#allocation16_spill] sm:$0xff] }
 0xf88   :  { %4979 = vmatprep.mubr.msk.f32.mxu0 %vm603_vm8, %v6907_v50  ;;  %5428 = vmatpush3.bf16.msra.mxu0 %v6089_v36  ;;  %v2919_v24 = vpop.trf.xlu1  ;;  %v3398_v36 = vadd.f32 %v3397_v37, %v3396_v12  ;;  %v7354_v37 = vld [vmem:[#allocation18_spill] sm:$0xff] }
 0xf89   :  { %5430 = vmatprep.subr.bf16.mxu0 %v6094_v38  ;;  %v5389_v30 = vpack.c.bf16 %v6978_v22, %v6983_v4 }
 0xf8b   :  { %4980 = vmatmul.mubr.msk.f32.gmra.mrb[68].mxu0 %vm603_vm8, %v2914_v29  ;;  %v3400_v29 = vmul.f32 %v3398_v36, %v6694_v25 }
 0xf8c   :  { %4982 = vmatprep.mubr.msk.f32.mxu0 %vm603_vm8, %v2915_v40  ;;  %5432 = vmatpush3.bf16.msra.mxu0 %v6121_v44  ;;  %v3391_v44 = vadd.f32 %v3390_v23, %v3389_v60 }
 0xf8d   :  { %5434 = vmatprep.subr.bf16.mxu0 %v7318_v31  ;;  %v5002_v50 = vpop.f32.mrb[74].mxu1 }
 0xf8e   :  { %v6996_v34 = vmul.f32 %v6818_v26, %v5002_v50  ;;  %v3228_v38 = vpop.f32.mrb[75].mxu1  ;;  %v2920_v26 = vpop.trf.xlu1  ;;  %v7355_v50 = vld [vmem:[#allocation19_spill] sm:$0xff] }
 0xf8f   :  { %4983 = vmatmul.mubr.msk.f32.gmra.mrb[70].mxu0 %vm603_vm8, %v2916_v16  ;;  %v7000_v63 = vmul.f32 %v6824_v41, %v3228_v38  ;;  %v3399_v41 = vmul.f32 %v3391_v44, %v6701_v6  ;;  %v7356_v38 = vld [vmem:[#allocation20_spill] sm:$0xff] }
 0xf90   :  { %4985 = vmatprep.mubr.msk.f32.mxu0 %vm603_vm8, %v2917_v43  ;;  %5436 = vmatpush3.bf16.msra.mxu0 %v7319_v49  ;;  %v3404_v49 = vrot.slane %v3400_v29, 4 }
 0xf91   :  { %5438 = vmatprep.subr.bf16.mxu0 %v7320_v47  ;;  %v5393_v31 = vpack.c.bf16 %v6996_v34, %v7000_v63  ;;  %v3403_v47 = vrot.slane %v3399_v41, 4  ;;  %v7358_v41 = vld [vmem:[#allocation9_spill] sm:$0xff] }
 0xf93   :  { %4986 = vmatmul.mubr.msk.f32.gmra.mrb[72].mxu0 %vm603_vm8, %v2918_v28 }
 0xf94   :  { %4988 = vmatprep.mubr.msk.f32.mxu0 %vm603_vm8, %v2919_v24  ;;  %5440 = vmatpush3.bf16.msra.mxu0 %v7321_v27 }
 0xf95   :  { %5442 = vmatprep.subr.bf16.mxu0 %v7322_v48  ;;  %v5005_v25 = vpop.f32.mrb[76].mxu1 }
 0xf96   :  { %v3302_v27 = vmul.f32 %v6844_v59, %v5005_v25  ;;  %v3238_v62 = vpop.f32.mrb[77].mxu1  ;;  %v7359_v25 = vld [vmem:[#allocation8_spill] sm:$0xff] }
 0xf97   :  { %4989 = vmatmul.mubr.msk.f32.gmra.mrb[74].mxu0 %vm603_vm8, %v2920_v26  ;;  %v3301_v48 = vmul.f32 %v6850_v5, %v3238_v62  ;;  %v7357_v26 = vld [vmem:[#allocation7_spill] sm:$0xff] }
 0xf98   :  { %5444 = vmatpush3.bf16.msra.mxu0 %v7323_v51  ;;  %3471 = vmatprep.mubr.f32.mxu0 %v3404_v49 }
 0xf99   :  { %5451 = vmatprep.subr.bf16.mxu0 %v7333_v45  ;;  %v5397_v2 = vpack.c.bf16 %v3302_v27, %v3301_v48  ;;  %v7360_v27 = vld [vmem:[#allocation10_spill] sm:$0xff] }
 0xf9b   :  { %3472 = vmatmul.mubr.f32.vlgmr.msra.gmra.mrb[76].mxu0 %v3403_v47 }
 0xf9c   :  { %5034 = vmatprep.mubr.msk.f32.mxu0 %vm5604_vm5, %v7324_v13 }
 0xf9d   :  { %v5008_v46 = vpop.f32.mrb[78].mxu1 }
 0xf9e   :  { %v3304_v40 = vmul.f32 %v6870_v3, %v5008_v46  ;;  %v3248_v10 = vpop.f32.mrb[79].mxu1  ;;  %v7361_v46 = vld [vmem:[#allocation11_spill] sm:$0xff] }
 0xf9f   :  { %v3303_v51 = vmul.f32 %v6878_v19, %v3248_v10 }
 0xfa1   :  { %v5401_v57 = vpack.c.bf16 %v3304_v40, %v3303_v51 }
 0xfa5   :  { %v5011_v42 = vpop.f32.mrb[80].mxu1 }
 0xfa6   :  { %v3306_v32 = vmul.f32 %v6898_v55, %v5011_v42  ;;  %v3258_v18 = vpop.f32.mrb[81].mxu1  ;;  %v7363_v42 = vld [vmem:[#allocation13_spill] sm:$0xff] }
 0xfa7   :  { %v3305_v53 = vmul.f32 %v6904_v0, %v3258_v18 }
 0xfa9   :  { %v5405_v9 = vpack.c.bf16 %v3306_v32, %v3305_v53  ;;  %v7364_v53 = vld [vmem:[#allocation17_spill] sm:$0xff] }
 0xfad   :  { %v5014_v16 = vpop.f32.mrb[82].mxu1 }
 0xfae   :  { %v3308_v59 = vmul.f32 %v6924_v54, %v5014_v16  ;;  %v3268_v33 = vpop.f32.mrb[83].mxu1 }
 0xfaf   :  { %v3307_v5 = vmul.f32 %v6930_v39, %v3268_v33  ;;  %v7365_v33 = vld [vmem:[#allocation6_spill] sm:$0xff] }
 0xfb1   :  { %v5409_v1 = vpack.c.bf16 %v3308_v59, %v3307_v5 }
0x104a   :  { %v4582_v3 = vpop.f32.mrb[58].mxu0 }
0x104b   :  { %v4583_v56 = vpop.f32.mrb[59].mxu0 }
0x104c   :  { %v4584_v19 = vadd.f32 %v4583_v56, %v4582_v3 }
0x104e   :  { %v7027_v11 = vmul.f32 %v5528_v15, %v4584_v19  ;;  %v4969_v55 = vpop.f32.mrb[60].mxu0  ;;  %v3311_v15 = vrot.slane %v6701_v6, 4  ;;  %v4249_v6 = vld [vmem:[%s7217_s10 + $0x30] sm:$0xff] }
0x104f   :  { %v3278_v35 = vmul.f32 %v6726_v61, %v4969_v55  ;;  %v3118_v0 = vpop.f32.mrb[61].mxu0 }
0x1050   :  { %v3277_v43 = vmul.f32 %v6732_v8, %v3118_v0 }
0x1052   :  { %v5383_v17 = vpack.c.bf16 %v3278_v35, %v3277_v43  ;;  %v4972_v54 = vpop.f32.mrb[62].mxu0  ;;  %v4250_v35 = vld [vmem:[%s7217_s10 + $0x38] sm:$0xff] }
0x1053   :  { %v3280_v12 = vmul.f32 %v7352_v20, %v4972_v54  ;;  %v3128_v39 = vpop.f32.mrb[63].mxu0  ;;  %v5449_v0 = vpack.c.bf16 %v4250_v35, %v4249_v6 }
0x1054   :  { %v3279_v28 = vmul.f32 %v7353_v7, %v3128_v39  ;;  %5384 = vmatpush3.bf16.msra.mxu1 %v5383_v17 }
0x1055   :  { %5386 = vmatprep.subr.bf16.mxu1 %v5385_v14 }
0x1056   :  { %v5387_v58 = vpack.c.bf16 %v3280_v12, %v3279_v28  ;;  %v4975_v60 = vpop.f32.mrb[64].mxu0  ;;  %v4252_v28 = vld [vmem:[%s7218_s11 + $0x1] ss:$0 sm:$0xff] }
0x1057   :  { %v3282_v23 = vmul.f32 %v7354_v37, %v4975_v60  ;;  %v3138_v61 = vpop.f32.mrb[65].mxu0 }
0x1058   :  { %v3281_v24 = vmul.f32 %v7355_v50, %v3138_v61  ;;  %5388 = vmatpush3.bf16.msra.mxu1 %v5387_v58 }
0x1059   :  { %5390 = vmatprep.subr.bf16.mxu1 %v5389_v30 }
0x105a   :  { %v5391_v8 = vpack.c.bf16 %v3282_v23, %v3281_v24  ;;  %v4978_v36 = vpop.f32.mrb[66].mxu0  ;;  %v7366_v23 = vld [vmem:[#allocation12_spill] sm:$0xff] }
0x105b   :  { %v3284_v44 = vmul.f32 %v7356_v38, %v4978_v36  ;;  %v3148_v29 = vpop.f32.mrb[67].mxu0 }
0x105c   :  { %v3283_v52 = vmul.f32 %v7357_v26, %v3148_v29  ;;  %5392 = vmatpush3.bf16.msra.mxu1 %v5391_v8  ;;  %v4259_v29 = vld [vmem:[%s7221_s14 + $0x28] sm:$0xff] }
0x105d   :  { %5394 = vmatprep.subr.bf16.mxu1 %v5393_v31  ;;  %v7362_v31 = vld [vmem:[#allocation14_spill] sm:$0xff] }
0x105e   :  { %v5395_v21 = vpack.c.bf16 %v3284_v44, %v3283_v52  ;;  %v4981_v14 = vpop.f32.mrb[68].mxu0  ;;  %v4258_v44 = vld [vmem:[%s7221_s14 + $0x20] sm:$0xff]  ;;  %v4260_v52 = vld [vmem:[%s7221_s14 + $0x30] sm:$0xff] }
0x105f   :  { %v3286_v49 = vmul.f32 %v7358_v41, %v4981_v14  ;;  %v3158_v47 = vpop.f32.mrb[69].mxu0  ;;  %v5452_v26 = vpack.c.bf16 %v4259_v29, %v4258_v44  ;;  %v5605_v44 = vmov 0   ;;  %v4278_v29 = vld [vmem:[#allocation2] ss:$0 sm:$0xff] }
0x1060   :  { %v3285_v22 = vmul.f32 %v7359_v25, %v3158_v47  ;;  %5396 = vmatpush3.bf16.msra.mxu1 %v5395_v21  ;;  %v4261_v21 = vld [vmem:[%s7221_s14 + $0x38] sm:$0xff]  ;;  %5496 = vset.pattern.permute.xlu1 %v5605_v44 }
0x1061   :  { %5398 = vmatprep.subr.bf16.mxu1 %v5397_v2  ;;  %5453 = vmatpush3.bf16.msra.mxu0 %v5452_v26  ;;  %v5455_v14 = vpack.c.bf16 %v4261_v21, %v4260_v52 }
0x1062   :  { %v5399_v4 = vpack.c.bf16 %v3286_v49, %v3285_v22  ;;  %v4984_v30 = vpop.f32.mrb[70].mxu0  ;;  %5454 = vmatprep.subr.bf16.mxu0 %v7333_v45  ;;  %v4256_v22 = vld [vmem:[%s7219_s12 + $0x1] ss:$0 sm:$0xff]  ;;  %5495 = vset.pattern.permute.xlu0 %v5605_v44 }
0x1063   :  { %v3288_v62 = vmul.f32 %v7360_v27, %v4984_v30  ;;  %v3168_v48 = vpop.f32.mrb[71].mxu0  ;;  %v4257_v30 = vld [vmem:[%s7220_s13 + $0x1] ss:$0 sm:$0xff] }
0x1064   :  { %v3287_v40 = vmul.f32 %v7361_v46, %v3168_v48  ;;  %5400 = vmatpush3.bf16.msra.mxu1 %v5399_v4  ;;  %v4265_v48 = vld [vmem:[%s7223_s16 + $0x40] sm:$0xff]  ;;  %v4266_v46 = vld [vmem:[%s7223_s16 + $0x48] sm:$0xff] }
0x1065   :  { %5402 = vmatprep.subr.bf16.mxu1 %v5401_v57  ;;  %5456 = vmatpush3.bf16.msra.mxu0 %v5455_v14 }
0x1066   :  { %v5403_v34 = vpack.c.bf16 %v3288_v62, %v3287_v40  ;;  %v4987_v63 = vpop.f32.mrb[72].mxu0  ;;  %5469 = vmatprep.subr.bf16.mxu0 %v7333_v45  ;;  %v5458_v40 = vpack.c.bf16 %v4266_v46, %v4265_v48 }
0x1067   :  { %v3290_v10 = vmul.f32 %v7362_v31, %v4987_v63  ;;  %v3178_v51 = vpop.f32.mrb[73].mxu0  ;;  %v4268_v63 = vld [vmem:[%s7223_s16 + $0x58] sm:$0xff] }
0x1068   :  { %v3289_v32 = vmul.f32 %v7363_v42, %v3178_v51  ;;  %5404 = vmatpush3.bf16.msra.mxu1 %v5403_v34  ;;  %v4267_v34 = vld [vmem:[%s7223_s16 + $0x50] sm:$0xff]  ;;  %v4270_v51 = vld [vmem:[%s7223_s16 + $0x68] sm:$0xff] }
0x1069   :  { %5406 = vmatprep.subr.bf16.mxu1 %v5405_v9  ;;  %v4247_v9 = vld [vmem:[%s7217_s10 + $0x20] sm:$0xff]  ;;  %v5461_v31 = vpack.c.bf16 %v4268_v63, %v4267_v34 }
0x106a   :  { %v5407_v18 = vpack.c.bf16 %v3290_v10, %v3289_v32  ;;  %v4990_v2 = vpop.f32.mrb[74].mxu0  ;;  %v4269_v10 = vld [vmem:[%s7223_s16 + $0x60] sm:$0xff]  ;;  %v4271_v32 = vld [vmem:[%s7223_s16 + $0x70] sm:$0xff] }
0x106b   :  { %v3292_v16 = vmul.f32 %v7364_v53, %v4990_v2  ;;  %v3188_v59 = vpop.f32.mrb[75].mxu0  ;;  %v5464_v42 = vpack.c.bf16 %v4270_v51, %v4269_v10  ;;  %v4263_v53 = vld [vmem:[%s7222_s15 + $0x1] ss:$0 sm:$0xff] }
0x106c   :  { %v3291_v5 = vmul.f32 %v7365_v33, %v3188_v59  ;;  %5408 = vmatpush3.bf16.msra.mxu1 %v5407_v18  ;;  %v4272_v18 = vld [vmem:[%s7223_s16 + $0x78] sm:$0xff] }
0x106d   :  { %5410 = vmatprep.subr.bf16.mxu1 %v5409_v1  ;;  %v4248_v1 = vld [vmem:[%s7217_s10 + $0x28] sm:$0xff]  ;;  %v5467_v2 = vpack.c.bf16 %v4272_v18, %v4271_v32 }
0x106e   :  { %v5411_v3 = vpack.c.bf16 %v3292_v16, %v3291_v5  ;;  %v4720_v57 = vpop.f32.mrb[76].mxu0  ;;  %v5446_v55 = vpack.c.bf16 %v4248_v1, %v4247_v9 }
0x106f   :  { %v4721_v56 = vpop.f32.mrb[77].mxu0 }
0x1070   :  { %v4722_v19 = vadd.f32 %v4721_v56, %v4720_v57  ;;  %5412 = vmatpush3.bf16.msra.mxu1 %v5411_v3 }
0x1071   :  { %5445 = vmatprep.subr.bf16.mxu1 %v7333_v45 }
0x1072   :  { %5529 = vrcp.f32 %v4722_v19 }
0x1073   :  { %3380 = vmatmul.mubr.f32.vlgmr.msra.gmra.mrb[84].mxu1 %v3311_v15  ;;  %v4274_v15 = vld [vmem:[%s7224_s17 + $0x1] ss:$0 sm:$0xff] }
0x1074   :  { %5023 = vmatprep.mubr.msk.f32.mxu1 %vm5604_vm5, %v7324_v13  ;;  %5447 = vmatpush3.bf16.msra.mxu1 %v5446_v55 }
0x1075   :  { %5448 = vmatprep.subr.bf16.mxu1 %v7333_v45 }
0x1078   :  { %5450 = vmatpush3.bf16.msra.mxu1 %v5449_v0 }
0x1079   :  { %5457 = vmatprep.subr.bf16.mxu1 %v7333_v45 }
0x107c   :  { %v5530_v20 = vpop.eup %5529 }
0x1146   :  { %v4685_v43 = vpop.f32.mrb[84].mxu1 }
0x1147   :  { %v4686_v17 = vpop.f32.mrb[85].mxu1 }
0x1148   :  { %v4687_v54 = vadd.f32 %v4686_v17, %v4685_v43 }
0x114a   :  { %v3478_v12 = vmul.f32 %v5530_v20, %v4687_v54 }
0x114c   :  { %v3480_v39 = vrot.slane %v3478_v12, 4  ;;  %v3812_v12 = vld [vmem:[%s7227_s20] sm:$0xff] }
0x114e   :  { %v3482_v7 = vsel %vm146_vm1, %v7027_v11, %v3480_v39  ;;  %v3813_v39 = vld [vmem:[%s7227_s20 + $0x8] sm:$0xff]  ;;  %vm3930_vm1 = vcmask 7172  }
0x114f   :  { %5024 = vmatmul.mubr.msk.f32.vlgmr.msra.gmra.mrb[86].mxu1 %vm222_vm4, %v3482_v7  ;;  %v5470_v7 = vpack.c.bf16 %v3813_v39, %v3812_v12  ;;  %v3974_v12 = vld [vmem:[%s7229_s22 + $0x18] sm:$0xff] }
0x1150   :  { %5053 = vmatprep.mubr.msk.f32.mxu1 %vm5604_vm5, %v7324_v13  ;;  %5459 = vmatpush3.bf16.msra.mxu1 %v5458_v40 }
0x1151   :  { %5460 = vmatprep.subr.bf16.mxu1 %v7333_v45 }
0x1154   :  { %5462 = vmatpush3.bf16.msra.mxu1 %v5461_v31 }
0x1155   :  { %5463 = vmatprep.subr.bf16.mxu1 %v7333_v45 }
0x1158   :  { %5465 = vmatpush3.bf16.msra.mxu1 %v5464_v42 }
0x1159   :  { %5466 = vmatprep.subr.bf16.mxu1 %v7333_v45 }
0x115c   :  { %5468 = vmatpush3.bf16.msra.mxu1 %v5467_v2 }
0x1222   :  { %v3565_v58 = vpop.f32.mrb[86].mxu1 }
0x1223   :  { %v3566_v60 = vadd.f32 %v4252_v28, %v3565_v58  ;;  %v5025_v37 = vpop.f32.mrb[87].mxu1  ;;  %v3814_v28 = vld [vmem:[%s7227_s20 + $0x10] sm:$0xff]  ;;  %v3815_v58 = vld [vmem:[%s7227_s20 + $0x18] sm:$0xff] }
0x1225   :  { %v7081_v61 = vadd.f32 %v3566_v60, %v7366_v23  ;;  %v5473_v60 = vpack.c.bf16 %v3815_v58, %v3814_v28 }
0x1227   :  { %v3574_v50 = vsel %vm222_vm4, %v7081_v61, 0.0 }
0x1228   :  { %3575 = vadd.xlane.f32.xlu0 %v3574_v50 }
0x12b5   :  { %v3576_v11 = vpop.xlane.xlu0 %3575 }
0x12b6   :  { %v3577_v24 = vmul.f32 0.03125, %v3576_v11  ;;  %v4276_v11 = vld [vmem:[%s7225_s18] ss:$0 sm:$0xff] }
0x12b8   :  { %v3578_v8 = vsub.f32 %v7081_v61, %v3577_v24 }
0x12ba   :  { %v3579_v36 = vmul.f32 %v3578_v8, %v3578_v8 }
0x12bc   :  { %v3580_v38 = vsel %vm222_vm4, %v3579_v36, 0.0 }
0x12bd   :  { %3581 = vadd.xlane.f32.xlu1 %v3580_v38 }
0x134a   :  { %v3582_v41 = vpop.xlane.xlu1 %3581 }
0x134b   :  { %v3583_v49 = vmul.f32 0.03125, %v3582_v41 }
0x134d   :  { %v3584_v47 = vadd.f32 1e-05, %v3583_v49 }
0x134f   :  { %5531 = vrsqrt.f32 %v3584_v47 }
0x1359   :  { %v5532_v25 = vpop.eup %5531 }
0x135a   :  { %v3586_v4 = vmul.f32 %v5532_v25, %v3578_v8  ;;  %v4277_v8 = vld [vmem:[%s7226_s19] ss:$0 sm:$0xff] }
0x135c   :  { %v3593_v27 = vmul.f32 %v4256_v22, %v3586_v4 }
0x135e   :  { %v3600_v62 = vadd.f32 %v4257_v30, %v3593_v27 }
0x1360   :  { %5035 = vmatmul.mubr.msk.f32.vlgmr.msra.gmra.mrb[78].mxu0 %vm222_vm4, %v3600_v62 }
0x1361   :  { %5064 = vmatprep.mubr.msk.f32.mxu0 %vm5604_vm5, %v7324_v13  ;;  %5471 = vmatpush3.bf16.msra.mxu0 %v5470_v7 }
0x1362   :  { %5472 = vmatprep.subr.bf16.mxu0 %v7333_v45 }
0x1365   :  { %5474 = vmatpush3.bf16.msra.mxu0 %v5473_v60 }
0x1366   :  { %5475 = vmatprep.subr.bf16.mxu0 %v7333_v45 }
0x1433   :  { %v3683_v16 = vpop.f32.mrb[78].mxu0 }
0x1434   :  { %v3684_v59 = vadd.f32 %v4263_v53, %v3683_v16  ;;  %v5036_v33 = vpop.f32.mrb[79].mxu0 }
0x1436   :  { %v3688_v5 = vmul.f32 0.70710677, %v3684_v59  ;;  %v3687_v57 = vmul.f32 0.5, %v3684_v59 }
0x1438   :  { %5533 = verf.f32 %v3688_v5 }
0x1442   :  { %v5534_v3 = vpop.eup %5533 }
0x1443   :  { %v3690_v56 = vadd.f32 1.0, %v5534_v3 }
0x1445   :  { %v3691_v19 = vmul.f32 %v3690_v56, %v3687_v57 }
0x1447   :  { %5054 = vmatmul.mubr.msk.f32.vlgmr.msra.gmra.mrb[88].mxu1 %vm1937_vm11, %v3691_v19 }
0x151a   :  { %v3778_v9 = vpop.f32.mrb[88].mxu1 }
0x151b   :  { %v3779_v1 = vadd.f32 %v4274_v15, %v3778_v9  ;;  %v5055_v55 = vpop.f32.mrb[89].mxu1 }
0x151d   :  { %v3782_v6 = vadd.f32 %v3779_v1, %v7081_v61 }
0x151f   :  { %v3785_v35 = vsel %vm222_vm4, %v3782_v6, 0.0 }
0x1520   :  { %3786 = vadd.xlane.f32.xlu0 %v3785_v35 }
0x15ad   :  { %v3787_v0 = vpop.xlane.xlu0 %3786 }
0x15ae   :  { %v3788_v43 = vmul.f32 0.03125, %v3787_v0 }
0x15b0   :  { %v3789_v17 = vsub.f32 %v3782_v6, %v3788_v43  ;;  %v3971_v43 = vld [vmem:[%s7229_s22] sm:$0xff] }
0x15b2   :  { %v3790_v54 = vmul.f32 %v3789_v17, %v3789_v17 }
0x15b4   :  { %v3791_v20 = vsel %vm222_vm4, %v3790_v54, 0.0 }
0x15b5   :  { %3792 = vadd.xlane.f32.xlu1 %v3791_v20  ;;  %v3973_v20 = vld [vmem:[%s7229_s22 + $0x10] sm:$0xff] }
0x15b6   :  { %v5479_v39 = vpack.c.bf16 %v3974_v12, %v3973_v20 }
0x1642   :  { %v3793_v37 = vpop.xlane.xlu1 %3792 }
0x1643   :  { %v3794_v23 = vmul.f32 0.03125, %v3793_v37 }
0x1645   :  { %v3795_v61 = vadd.f32 1e-05, %v3794_v23 }
0x1647   :  { %5535 = vrsqrt.f32 %v3795_v61 }
0x1651   :  { %v5536_v50 = vpop.eup %5535 }
0x1652   :  { %v3797_v24 = vmul.f32 %v5536_v50, %v3789_v17  ;;  %v3972_v17 = vld [vmem:[%s7229_s22 + $0x8] sm:$0xff] }
0x1653   :  { %v5476_v54 = vpack.c.bf16 %v3972_v17, %v3971_v43 }
0x1654   :  { %v3804_v36 = vmul.f32 %v4276_v11, %v3797_v24 }
0x1656   :  { %v7167_v38 = vadd.f32 %v4277_v8, %v3804_v36 }
0x1658   :  { %5065 = vmatmul.mubr.msk.f32.vlgmr.msra.gmra.mrb[80].mxu0 %vm222_vm4, %v7167_v38 }
0x1659   :  { %5075 = vmatprep.mubr.msk.f32.mxu0 %vm5604_vm5, %v7324_v13  ;;  %5477 = vmatpush3.bf16.msra.mxu0 %v5476_v54  ;;  %vm4055_vm5 = vcmask 9216  }
0x165a   :  { %5478 = vmatprep.subr.bf16.mxu0 %v7333_v45 }
0x165d   :  { %5480 = vmatpush3.bf16.msra.mxu0 %v5479_v39 }
0x172b   :  { %v3892_v26 = vpop.f32.mrb[80].mxu0 }
0x172c   :  { %v3893_v52 = vadd.f32 %v4278_v29, %v3892_v26  ;;  %v5066_v21 = vpop.f32.mrb[81].mxu0 }
0x172e   :  { %v3897_v14 = vsel %vm3896_vm0, %v3893_v52, -inf  ;;  %v3931_v41 = vsel %vm3930_vm1, %v3893_v52, -inf }
0x172f   :  { %v3898_v49 = vrot.slane %v3897_v14, 4  ;;  %v3932_v47 = vrot.slane %v3931_v41, 4 }
0x1731   :  { %v3899_v25 = vmax.f32 %v3897_v14, %v3898_v49  ;;  %v3933_v22 = vmax.f32 %v3931_v41, %v3932_v47 }
0x1733   :  { %v3900_v4 = vrot.slane %v3899_v25, 2  ;;  %v3934_v30 = vrot.slane %v3933_v22, 2 }
0x1735   :  { %v3901_v27 = vmax.f32 %v3899_v25, %v3900_v4  ;;  %v3935_v13 = vmax.f32 %v3933_v22, %v3934_v30 }
0x1737   :  { %v3902_v62 = vrot.slane %v3901_v27, 1  ;;  %v3936_v48 = vrot.slane %v3935_v13, 1 }
0x1739   :  { %v3903_v46 = vmax.f32 %v3901_v27, %v3902_v62  ;;  %v3937_v40 = vmax.f32 %v3935_v13, %v3936_v48 }
0x173b   :  { %v3904_v34 = vsub.f32 %v3893_v52, %v3903_v46  ;;  %v3938_v63 = vsub.f32 %v3893_v52, %v3937_v40 }
0x173d   :  { %v3905_v31 = vmul.f32 1.442695, %v3904_v34  ;;  %v3939_v10 = vmul.f32 1.442695, %v3938_v63 }
0x173f   :  { %5537 = vpow2.f32 %v3905_v31 }
0x1740   :  { %5539 = vpow2.f32 %v3939_v10 }
0x1749   :  { %v5538_v51 = vpop.eup %5537 }
0x174a   :  { %v5540_v42 = vpop.eup %5539  ;;  %v3907_v32 = vsel %vm3896_vm0, %v5538_v51, 0.0 }
0x174b   :  { %v3908_v18 = vrot.slane %v3907_v32, 4  ;;  %v3942_v2 = vrot.slane %v5540_v42, 4 }
0x174d   :  { %v3909_v53 = vadd.f32 %v3908_v18, %v3907_v32  ;;  %v3944_v16 = vsel %vm3896_vm0, %v3942_v2, 0.0 }
0x174e   :  { %v3945_v59 = vrot.slane %v3944_v16, 4 }
0x174f   :  { %v3910_v33 = vrot.slane %v3909_v53, 2 }
0x1750   :  { %v3946_v5 = vadd.f32 %v3945_v59, %v3944_v16 }
0x1751   :  { %v3911_v3 = vadd.f32 %v3910_v33, %v3909_v53 }
0x1752   :  { %v3947_v57 = vrot.slane %v3946_v5, 2 }
0x1753   :  { %v3912_v56 = vrot.slane %v3911_v3, 1 }
0x1754   :  { %v3948_v19 = vadd.f32 %v3947_v57, %v3946_v5 }
0x1755   :  { %v3913_v15 = vadd.f32 %v3912_v56, %v3911_v3 }
0x1756   :  { %v3949_v9 = vrot.slane %v3948_v19, 1 }
0x1757   :  { %5541 = vrcp.f32 %v3913_v15 }
0x1758   :  { %v3950_v1 = vadd.f32 %v3949_v9, %v3948_v19 }
0x175a   :  { %5543 = vrcp.f32 %v3950_v1 }
0x1761   :  { %v5542_v55 = vpop.eup %5541 }
0x1762   :  { %v3915_v6 = vmul.f32 %v5542_v55, %v5538_v51 }
0x1764   :  { %v5544_v35 = vpop.eup %5543  ;;  %3918 = vperm.xlu1 %5496, %v3915_v6  }
0x1765   :  { %v3952_v0 = vmul.f32 %v5544_v35, %v5540_v42 }
0x1767   :  { %3955 = vperm.xlu0 %5495, %v3952_v0  }
0x17e3   :  { %v3919_v7 = vpop.permute.xlu1 %3918 }
0x17e4   :  { %v3921_v28 = vmul.f32 %v3919_v7, %v7167_v38 }
0x17e6   :  { %v3923_v58 = vsel %vm3922_vm2, %v3921_v28, 0.0  ;;  %v3956_v60 = vpop.permute.xlu0 %3955 }
0x17e7   :  { %v3924_v37 = vrot.slane %v3923_v58, 4  ;;  %v3958_v23 = vmul.f32 %v3956_v60, %v7167_v38  ;;  %v4280_v38 = vld [vmem:[%s7230_s23] ss:$0 sm:$0xff] }
0x17e9   :  { %v3925_v45 = vadd.f32 %v3924_v37, %v3923_v58  ;;  %v3960_v61 = vrot.slane %v3958_v23, 4 }
0x17eb   :  { %v3926_v50 = vrot.slane %v3925_v45, 2  ;;  %v3962_v11 = vsel %vm3922_vm2, %v3960_v61, 0.0 }
0x17ec   :  { %v3963_v24 = vrot.slane %v3962_v11, 4 }
0x17ed   :  { %v3927_v8 = vadd.f32 %v3926_v50, %v3925_v45 }
0x17ee   :  { %v3964_v36 = vadd.f32 %v3963_v24, %v3962_v11 }
0x17ef   :  { %v3928_v29 = vrot.slane %v3927_v8, 1 }
0x17f0   :  { %v3965_v44 = vrot.slane %v3964_v36, 2 }
0x17f1   :  { %v3929_v21 = vadd.f32 %v3928_v29, %v3927_v8 }
0x17f2   :  { %v3966_v26 = vadd.f32 %v3965_v44, %v3964_v36 }
0x17f4   :  { %v3967_v52 = vrot.slane %v3966_v26, 1 }
0x17f6   :  { %v3968_v14 = vadd.f32 %v3967_v52, %v3966_v26 }
0x17f8   :  { %v3970_v41 = vsel %vm3969_vm3, %v3929_v21, %v3968_v14 }
0x17f9   :  { %5076 = vmatmul.mubr.msk.f32.vlgmr.msra.gmra.mrb[82].mxu0 %vm222_vm4, %v3970_v41 }
0x18cc   :  { %v4051_v49 = vpop.f32.mrb[82].mxu0 }
0x18cd   :  { %v4052_v47 = vadd.f32 %v4280_v38, %v4051_v49  ;;  %v5077_v25 = vpop.f32.mrb[83].mxu0 }
0x18cf   :  { %4056 = vst.msk [vmem:[#allocation3] sm:$0x3] %vm4055_vm5, %v4052_v47 }
0x18d0   :  { %5588 = shalt.err (!%p5585_p4)
}
0x18d1   :  { %s5589_s0 = scalar_lea.hbm %s7231_s24, 32 }
0x18d2   :  { %p5590_p5 = scmp.ne.s32.totalorder %s7231_s24, %s5589_s0  ;;  %p5593_p6 = scmp.lt.u32.totalorder %s5589_s0, %s7231_s24 }
0x18d4   :  { %p5595_p7 = pnand %p5593_p6, %p5590_p5 }
0x18d6   :  { %5598 = shalt.err (!%p5595_p7)
}
0x18d7   :  { %4066 = dma.vmem_to_hbm [thread:$0]  %s4064_s27, 32, %s7231_s24, [#allocation4]  }
0x18d8   :  { %5599 = dma.done.wait [#allocation4], 32  }
0x18d9   :  { %5600 = vsyncadd [#allocation4], 4294967264 }
0x18da   :  { %4070 = vsyncpa [#allocation4], 1 }

</bundles_post_ra>
